<compile_context>
chip_gen: v5e
topology: v5e:2x2
jax: 0.10.0
libtpu: 0.0.40
codegen_flags: <defaults>
</compile_context>

<pallas_src>
import numpy as np

import jax
import jax.numpy as jnp
from jax import lax
from jax.experimental import pallas as pl
from jax.experimental.pallas import tpu as pltpu

# ----- fixed Block configuration -----
IN_F, OUT_F, REPS, STRIDES = 4, 8, 2, 2
BN_EPS = 1e-5

_VMEM = pl.BlockSpec(memory_space=pltpu.MemorySpace.VMEM)
_SMEM = pl.BlockSpec(memory_space=pltpu.MemorySpace.SMEM)


# ------------------------------ fused kernel --------------------------------


def _block_kernel(x_ref, dw1_s, w1_ref, b1_ref, dw2_ref, p2_ref, b2_ref,
                  s_ref, r_ref, ks_ref, bs_ref, out_ref,
                  pad1, pad2, pad3):
    """Whole Block forward in one kernel.

    x_ref : (N, Cin, H, W)  raw NCHW input (VMEM)
    dw1_s : (9*Cin,)        stage-1 depthwise weights, flat (ky,kx,ci) (SMEM)
    w1_ref: (Cin, W, W*Cout)   per-input-channel pointwise-1 spread matrices
                               (kron(I_W, pw1[ci]) with BN1 scale folded)
    b1_ref: (1, W*Cout)        BN1 shift tiled over the interleaved lanes
    dw2_ref:(9, W*Cout)        stage-2 depthwise tap vectors (tiled over x)
    p2_ref: (W*Cout, W*Cout)   kron(I_W, pw2) with BN2 scale folded
    b2_ref: (1, W*Cout)        BN2 shift tiled
    s_ref : (W*Cout, Cout*Wo)  pool: even-x subsample + reorder lanes to (c,ox)
    r_ref : (N*Ho, N*H)        even-y row subsample
    ks_ref: (Cin, W, Cout*Wo)  skip 1x1 stride-2 conv (+BN scale), even-x folded
    bs_ref: (1, Cout*Wo)       skip BN shift, (c, ox) lane order
    out_ref:(N, Cout, Ho, Wo)  raw NCHW output
    pad1  : (N, H+2, W+2)          zero-padded planar scratch (stage 1)
    pad2  : (N, H+2, (W+2)*Cout)   zero-padded interleaved scratch (stage 2)
    pad3  : (N, H+2, (W+2)*Cout)   -inf padded interleaved scratch (pool)
    """
    N, Cin, H, W = x_ref.shape
    Cout, Ho, Wo = out_ref.shape[1], out_ref.shape[2], out_ref.shape[3]
    L = W * Cout                      # interleaved (x*Cout + c) lane width
    f32 = jnp.float32

    # ---- stage 1: ReLU -> depthwise 3x3 (planar, per input channel)
    #      -> pointwise 1x1 (Cin->Cout) with BN1 scale folded, interleaved out
    pad1[...] = jnp.zeros(pad1.shape, f32)          # zero border once
    h1 = jnp.zeros((N * H, L), f32)                 # rows (n,y), lanes (x*Cout+co)
    for ci in range(Cin):
        pad1[:, 1:H + 1, 1:W + 1] = jnp.maximum(x_ref[:, ci, :, :], 0.0)
        acc = jnp.zeros((N, H, W), f32)
        for ky in range(3):
            for kx in range(3):
                wk = dw1_s[(ky * 3 + kx) * Cin + ci]          # SMEM scalar
                acc = acc + wk * pad1[:, ky:ky + H, kx:kx + W]
        h1 = h1 + jnp.dot(acc.reshape(N * H, W), w1_ref[ci],
                          preferred_element_type=f32)
    h1 = h1 + b1_ref[...]

    # ---- stage 2: ReLU -> depthwise 3x3 (interleaved W*C lanes, 128 wide)
    #      -> pointwise 1x1 (Cout->Cout) as block-diag matmul, BN2 folded
    pad2[...] = jnp.zeros(pad2.shape, f32)
    pad2[:, 1:H + 1, Cout:Cout + L] = jnp.maximum(h1, 0.0).reshape(N, H, L)
    acc2 = jnp.zeros((N, H, L), f32)
    for ky in range(3):
        for kx in range(3):
            acc2 = acc2 + dw2_ref[ky * 3 + kx] * pad2[:, ky:ky + H,
                                                      kx * Cout:kx * Cout + L]
    h2 = jnp.dot(acc2.reshape(N * H, L), p2_ref[...],
                 preferred_element_type=f32) + b2_ref[...]

    # ---- MaxPool 3x3 / stride 2 / pad 1: stride-1 window max on the -inf
    #      padded scratch, then in-kernel even-(x,y) subsampling via selection
    #      matmuls (no full-res HBM writeback, no wrapper gather).
    pad3[...] = jnp.full(pad3.shape, -jnp.inf, f32)
    pad3[:, 1:H + 1, Cout:Cout + L] = h2.reshape(N, H, L)
    m = pad3[:, 0:H, 0:L]
    for ky in range(3):
        for kx in range(3):
            if ky == 0 and kx == 0:
                continue
            m = jnp.maximum(m, pad3[:, ky:ky + H, kx * Cout:kx * Cout + L])
    # even-x subsample + reorder lanes from (x, c) to (c, ox)
    pooled = jnp.dot(m.reshape(N * H, L), s_ref[...], preferred_element_type=f32)

    # ---- skip path: 1x1 conv stride 2 + BN, reading x straight from VMEM;
    #      even-x selection and BN scale are folded into ks matrices.
    skip = jnp.zeros((N * H, Cout * Wo), f32)
    for ci in range(Cin):
        xc = x_ref[:, ci, :, :].reshape(N * H, W)
        skip = skip + jnp.dot(xc, ks_ref[ci], preferred_element_type=f32)

    combined = pooled + skip + bs_ref[...]          # odd-y rows dropped below
    final = jnp.dot(r_ref[...], combined, preferred_element_type=f32)  # (N*Ho, Cout*Wo)

    # ---- write NCHW output directly (per-channel planes; lanes are (c, ox))
    for co in range(Cout):
        plane = final[:, co * Wo:(co + 1) * Wo]      # (N*Ho, Wo)
        out_ref[:, co, :, :] = plane.reshape(N, Ho, Wo).astype(out_ref.dtype)


# --------------------------- parameter repacking -----------------------------


def _fold_bn(gamma, beta, mean, var):
    scale = gamma / jnp.sqrt(var + BN_EPS)
    return scale, beta - mean * scale


def prepare_params(params, W=16):
    """One-time repack of the Block weights into kernel-friendly operands."""
    Wo = W // STRIDES
    s1, b1 = _fold_bn(*params['bn1'])
    s2, b2 = _fold_bn(*params['bn2'])
    ss, bs = _fold_bn(*params['skipbn'])

    eye_w = np.eye(W, dtype=np.float32)
    # even-x selection: sel_x[x, ox] = 1 iff x == 2*ox
    sel_x = np.zeros((W, Wo), np.float32)
    sel_x[2 * np.arange(Wo), np.arange(Wo)] = 1.0

    # stage-1 pointwise spread matrices (BN1 scale folded):
    #   w1[ci][x, x*OUT_F + co] = pw1[ci, co] * s1[co]
    w1 = jnp.stack([jnp.kron(eye_w, (params['pw1'][ci] * s1)[None, :])
                    for ci in range(IN_F)])
    # stage-2 depthwise tap vectors over interleaved lanes (x*OUT_F + c)
    dw2 = jnp.tile(params['dw2'].reshape(9, OUT_F), (1, W))
    # stage-2 pointwise as block-diagonal matmul, BN2 scale folded
    p2 = jnp.kron(eye_w, params['pw2'] * s2[None, :])
    # skip 1x1 stride-2 conv with BN scale and even-x selection folded in:
    #   ks[ci][x, co*Wo + ox] = skip_w[ci, co] * ss[co] * (x == 2*ox)
    ks = jnp.stack([jnp.kron((params['skip_w'][ci] * ss)[None, :], sel_x)
                    for ci in range(IN_F)])

    return {
        'dw1': params['dw1'].reshape(-1),            # (9*IN_F,)  -> SMEM scalars
        'w1': w1,                                    # (IN_F, W, W*OUT_F)
        'b1': jnp.tile(b1, W)[None, :],              # (1, W*OUT_F)
        'dw2': dw2,                                  # (9, W*OUT_F)
        'p2': p2,                                    # (W*OUT_F, W*OUT_F)
        'b2': jnp.tile(b2, W)[None, :],              # (1, W*OUT_F)
        'ks': ks,                                    # (IN_F, W, OUT_F*Wo)
        'bs': jnp.repeat(bs, Wo)[None, :],           # (1, OUT_F*Wo)
    }


# ------------------------------ forward wrapper ------------------------------


@jax.jit
def block_forward(prep, x_nchw):
    """Block(4, 8, reps=2, strides=2, start_with_relu=True, grow_first=True)."""
    N, _, H, W = x_nchw.shape
    Ho, Wo = H // STRIDES, W // STRIDES
    L = W * OUT_F

    # trace-time numpy constants (become literals; no runtime XLA ops)
    s_mat = np.zeros((L, OUT_F * Wo), np.float32)     # even-x + lane reorder
    for ox in range(Wo):
        for c in range(OUT_F):
            s_mat[(2 * ox) * OUT_F + c, c * Wo + ox] = 1.0
    r_mat = np.zeros((N * Ho, N * H), np.float32)     # even-y rows per batch
    for n in range(N):
        r_mat[n * Ho + np.arange(Ho), n * H + 2 * np.arange(Ho)] = 1.0

    return pl.pallas_call(
        _block_kernel,
        out_shape=jax.ShapeDtypeStruct((N, OUT_F, Ho, Wo), x_nchw.dtype),
        in_specs=[_VMEM, _SMEM, _VMEM, _VMEM, _VMEM, _VMEM, _VMEM,
                  _VMEM, _VMEM, _VMEM, _VMEM],
        out_specs=_VMEM,
        scratch_shapes=[
            pltpu.VMEM((N, H + 2, W + 2), jnp.float32),
            pltpu.VMEM((N, H + 2, (W + 2) * OUT_F), jnp.float32),
            pltpu.VMEM((N, H + 2, (W + 2) * OUT_F), jnp.float32),
        ],
    )(x_nchw, prep['dw1'], prep['w1'], prep['b1'], prep['dw2'], prep['p2'],
      prep['b2'], s_mat, r_mat, prep['ks'], prep['bs'])


# ------------------------ pure-JAX reference check ---------------------------


def reference_forward(params, x_nchw):
    x = jnp.transpose(x_nchw, (0, 2, 3, 1))
    dn = ('NHWC', 'HWIO', 'NHWC')

    def bn(y, p):
        gamma, beta, mean, var = p
        return (y - mean) * gamma / jnp.sqrt(var + BN_EPS) + beta

    def sep(y, dw, pw):
        c = y.shape[-1]
        y = lax.conv_general_dilated(y, dw.reshape(3, 3, 1, c), (1, 1),
                                     [(1, 1), (1, 1)], dimension_numbers=dn,
                                     feature_group_count=c)
        return lax.conv_general_dilated(y, pw.reshape(1, 1, *pw.shape), (1, 1),
                                        [(0, 0), (0, 0)], dimension_numbers=dn)

    h = jax.nn.relu(x)
    h = bn(sep(h, params['dw1'], params['pw1']), params['bn1'])
    h = jax.nn.relu(h)
    h = bn(sep(h, params['dw2'], params['pw2']), params['bn2'])
    h = lax.reduce_window(h, -jnp.inf, lax.max, (1, 3, 3, 1),
                          (1, STRIDES, STRIDES, 1),
                          [(0, 0), (1, 1), (1, 1), (0, 0)])
    skip = lax.conv_general_dilated(x, params['skip_w'].reshape(1, 1, IN_F, OUT_F),
                                    (STRIDES, STRIDES), [(0, 0), (0, 0)],
                                    dimension_numbers=dn)
    skip = bn(skip, params['skipbn'])
    return jnp.transpose(h + skip, (0, 3, 1, 2))


# ----------------------------------- main ------------------------------------

if __name__ == "__main__":
    key = jax.random.PRNGKey(0)
    ks = jax.random.split(key, 9)
    N, H, W = 2, 16, 16
    x = jax.random.normal(ks[0], (N, IN_F, H, W), jnp.float32)

    def bn_params(k, c):
        k1, k2, k3, k4 = jax.random.split(k, 4)
        return (0.5 + jax.random.uniform(k1, (c,), jnp.float32),   # gamma
                0.1 * jax.random.normal(k2, (c,), jnp.float32),    # beta
                0.1 * jax.random.normal(k3, (c,), jnp.float32),    # running_mean
                0.5 + jax.random.uniform(k4, (c,), jnp.float32))   # running_var

    params = {
        'dw1': 0.2 * jax.random.normal(ks[1], (3, 3, IN_F), jnp.float32),   # torch (4,1,3,3)
        'pw1': 0.2 * jax.random.normal(ks[2], (IN_F, OUT_F), jnp.float32),  # torch (8,4,1,1)
        'bn1': bn_params(ks[3], OUT_F),
        'dw2': 0.2 * jax.random.normal(ks[4], (3, 3, OUT_F), jnp.float32),
        'pw2': 0.2 * jax.random.normal(ks[5], (OUT_F, OUT_F), jnp.float32),
        'bn2': bn_params(ks[6], OUT_F),
        'skip_w': 0.2 * jax.random.normal(ks[7], (IN_F, OUT_F), jnp.float32),  # torch (8,4,1,1)
        'skipbn': bn_params(ks[8], OUT_F),
    }

    prep = prepare_params(params, W=W)                 # one-time weight repack
    out = jax.block_until_ready(block_forward(prep, x))
    ref = jax.block_until_ready(reference_forward(params, x))

    assert out.shape == (N, OUT_F, H // STRIDES, W // STRIDES), out.shape
    err = float(jnp.max(jnp.abs(out - ref)))
    assert err < 2e-4, f"max abs err {err}"
    print("KERNEL_OK")
</pallas_src>

<mosaic_0001>
module attributes {stable_mosaic.version = 11 : i64} {
  func.func @_block_kernel(%arg0: memref<2x4x16x16xf32, #tpu.memory_space<vmem>>, %arg1: memref<36xf32, #tpu.memory_space<smem>>, %arg2: memref<4x16x128xf32, #tpu.memory_space<vmem>>, %arg3: memref<1x128xf32, #tpu.memory_space<vmem>>, %arg4: memref<9x128xf32, #tpu.memory_space<vmem>>, %arg5: memref<128x128xf32, #tpu.memory_space<vmem>>, %arg6: memref<1x128xf32, #tpu.memory_space<vmem>>, %arg7: memref<128x64xf32, #tpu.memory_space<vmem>>, %arg8: memref<16x32xf32, #tpu.memory_space<vmem>>, %arg9: memref<4x16x64xf32, #tpu.memory_space<vmem>>, %arg10: memref<1x64xf32, #tpu.memory_space<vmem>>, %arg11: memref<2x8x8x8xf32, #tpu.memory_space<vmem>>, %arg12: memref<2x18x18xf32, #tpu.memory_space<vmem>>, %arg13: memref<2x18x144xf32, #tpu.memory_space<vmem>>, %arg14: memref<2x18x144xf32, #tpu.memory_space<vmem>>) attributes {dimension_semantics = [], scalar_prefetch = 0 : i64, scratch_operands = 3 : i64, tpu.core_type = #tpu.core_type<tc>} {
    %cst = arith.constant 0.000000e+00 : f32
    %0 = vector.broadcast %cst : f32 to vector<2x18x18xf32>
    %c0 = arith.constant 0 : index
    %c0_0 = arith.constant 0 : index
    %c0_1 = arith.constant 0 : index
    %1 = vector.load %arg12[%c0, %c0_0, %c0_1] : memref<2x18x18xf32, #tpu.memory_space<vmem>>, vector<2x18x18xf32>
    tpu.vector_store %arg12[%c0, %c0_0, %c0_1], %0 {strides = array<i32>} : memref<2x18x18xf32, #tpu.memory_space<vmem>>, vector<2x18x18xf32>,
    %cst_2 = arith.constant 0.000000e+00 : f32
    %2 = vector.broadcast %cst_2 : f32 to vector<32x128xf32>
    %c0_3 = arith.constant 0 : index
    %c0_4 = arith.constant 0 : index
    %c0_5 = arith.constant 0 : index
    %c0_6 = arith.constant 0 : index
    %3 = vector.load %arg0[%c0_3, %c0_4, %c0_5, %c0_6] : memref<2x4x16x16xf32, #tpu.memory_space<vmem>>, vector<2x1x16x16xf32>
    %4 = vector.shape_cast %3 : vector<2x1x16x16xf32> to vector<2x16x16xf32>
    %cst_7 = arith.constant 0.000000e+00 : f32
    %5 = vector.broadcast %cst_7 : f32 to vector<2x16x16xf32>
    %6 = arith.maximumf %4, %5 : vector<2x16x16xf32>
    %c0_8 = arith.constant 0 : index
    %c1 = arith.constant 1 : index
    %c1_9 = arith.constant 1 : index
    %7 = vector.load %arg12[%c0_8, %c1, %c1_9] : memref<2x18x18xf32, #tpu.memory_space<vmem>>, vector<2x16x16xf32>
    tpu.vector_store %arg12[%c0_8, %c1, %c1_9], %6 {strides = array<i32>} : memref<2x18x18xf32, #tpu.memory_space<vmem>>, vector<2x16x16xf32>,
    %cst_10 = arith.constant 0.000000e+00 : f32
    %8 = vector.broadcast %cst_10 : f32 to vector<2x16x16xf32>
    %c0_11 = arith.constant 0 : index
    %9 = memref.load %arg1[%c0_11] : memref<36xf32, #tpu.memory_space<smem>>
    %c0_12 = arith.constant 0 : index
    %c0_13 = arith.constant 0 : index
    %c0_14 = arith.constant 0 : index
    %10 = vector.load %arg12[%c0_12, %c0_13, %c0_14] : memref<2x18x18xf32, #tpu.memory_space<vmem>>, vector<2x16x16xf32>
    %11 = vector.broadcast %9 : f32 to vector<2x16x16xf32>
    %12 = arith.mulf %11, %10 : vector<2x16x16xf32>
    %13 = arith.addf %8, %12 : vector<2x16x16xf32>
    %c4 = arith.constant 4 : index
    %14 = memref.load %arg1[%c4] : memref<36xf32, #tpu.memory_space<smem>>
    %c0_15 = arith.constant 0 : index
    %c0_16 = arith.constant 0 : index
    %c1_17 = arith.constant 1 : index
    %15 = vector.load %arg12[%c0_15, %c0_16, %c1_17] : memref<2x18x18xf32, #tpu.memory_space<vmem>>, vector<2x16x16xf32>
    %16 = vector.broadcast %14 : f32 to vector<2x16x16xf32>
    %17 = arith.mulf %16, %15 : vector<2x16x16xf32>
    %18 = arith.addf %13, %17 : vector<2x16x16xf32>
    %c8 = arith.constant 8 : index
    %19 = memref.load %arg1[%c8] : memref<36xf32, #tpu.memory_space<smem>>
    %c0_18 = arith.constant 0 : index
    %c0_19 = arith.constant 0 : index
    %c2 = arith.constant 2 : index
    %20 = vector.load %arg12[%c0_18, %c0_19, %c2] : memref<2x18x18xf32, #tpu.memory_space<vmem>>, vector<2x16x16xf32>
    %21 = vector.broadcast %19 : f32 to vector<2x16x16xf32>
    %22 = arith.mulf %21, %20 : vector<2x16x16xf32>
    %23 = arith.addf %18, %22 : vector<2x16x16xf32>
    %c12 = arith.constant 12 : index
    %24 = memref.load %arg1[%c12] : memref<36xf32, #tpu.memory_space<smem>>
    %c0_20 = arith.constant 0 : index
    %c1_21 = arith.constant 1 : index
    %c0_22 = arith.constant 0 : index
    %25 = vector.load %arg12[%c0_20, %c1_21, %c0_22] : memref<2x18x18xf32, #tpu.memory_space<vmem>>, vector<2x16x16xf32>
    %26 = vector.broadcast %24 : f32 to vector<2x16x16xf32>
    %27 = arith.mulf %26, %25 : vector<2x16x16xf32>
    %28 = arith.addf %23, %27 : vector<2x16x16xf32>
    %c16 = arith.constant 16 : index
    %29 = memref.load %arg1[%c16] : memref<36xf32, #tpu.memory_space<smem>>
    %c0_23 = arith.constant 0 : index
    %c1_24 = arith.constant 1 : index
    %c1_25 = arith.constant 1 : index
    %30 = vector.load %arg12[%c0_23, %c1_24, %c1_25] : memref<2x18x18xf32, #tpu.memory_space<vmem>>, vector<2x16x16xf32>
    %31 = vector.broadcast %29 : f32 to vector<2x16x16xf32>
    %32 = arith.mulf %31, %30 : vector<2x16x16xf32>
    %33 = arith.addf %28, %32 : vector<2x16x16xf32>
    %c20 = arith.constant 20 : index
    %34 = memref.load %arg1[%c20] : memref<36xf32, #tpu.memory_space<smem>>
    %c0_26 = arith.constant 0 : index
    %c1_27 = arith.constant 1 : index
    %c2_28 = arith.constant 2 : index
    %35 = vector.load %arg12[%c0_26, %c1_27, %c2_28] : memref<2x18x18xf32, #tpu.memory_space<vmem>>, vector<2x16x16xf32>
    %36 = vector.broadcast %34 : f32 to vector<2x16x16xf32>
    %37 = arith.mulf %36, %35 : vector<2x16x16xf32>
    %38 = arith.addf %33, %37 : vector<2x16x16xf32>
    %c24 = arith.constant 24 : index
    %39 = memref.load %arg1[%c24] : memref<36xf32, #tpu.memory_space<smem>>
    %c0_29 = arith.constant 0 : index
    %c2_30 = arith.constant 2 : index
    %c0_31 = arith.constant 0 : index
    %40 = vector.load %arg12[%c0_29, %c2_30, %c0_31] : memref<2x18x18xf32, #tpu.memory_space<vmem>>, vector<2x16x16xf32>
    %41 = vector.broadcast %39 : f32 to vector<2x16x16xf32>
    %42 = arith.mulf %41, %40 : vector<2x16x16xf32>
    %43 = arith.addf %38, %42 : vector<2x16x16xf32>
    %c28 = arith.constant 28 : index
    %44 = memref.load %arg1[%c28] : memref<36xf32, #tpu.memory_space<smem>>
    %c0_32 = arith.constant 0 : index
    %c2_33 = arith.constant 2 : index
    %c1_34 = arith.constant 1 : index
    %45 = vector.load %arg12[%c0_32, %c2_33, %c1_34] : memref<2x18x18xf32, #tpu.memory_space<vmem>>, vector<2x16x16xf32>
    %46 = vector.broadcast %44 : f32 to vector<2x16x16xf32>
    %47 = arith.mulf %46, %45 : vector<2x16x16xf32>
    %48 = arith.addf %43, %47 : vector<2x16x16xf32>
    %c32 = arith.constant 32 : index
    %49 = memref.load %arg1[%c32] : memref<36xf32, #tpu.memory_space<smem>>
    %c0_35 = arith.constant 0 : index
    %c2_36 = arith.constant 2 : index
    %c2_37 = arith.constant 2 : index
    %50 = vector.load %arg12[%c0_35, %c2_36, %c2_37] : memref<2x18x18xf32, #tpu.memory_space<vmem>>, vector<2x16x16xf32>
    %51 = vector.broadcast %49 : f32 to vector<2x16x16xf32>
    %52 = arith.mulf %51, %50 : vector<2x16x16xf32>
    %53 = arith.addf %48, %52 : vector<2x16x16xf32>
    %54 = vector.shape_cast %53 : vector<2x16x16xf32> to vector<32x16xf32>
    %c0_38 = arith.constant 0 : index
    %c0_39 = arith.constant 0 : index
    %c0_40 = arith.constant 0 : index
    %55 = vector.load %arg2[%c0_38, %c0_39, %c0_40] : memref<4x16x128xf32, #tpu.memory_space<vmem>>, vector<1x16x128xf32>
    %56 = vector.shape_cast %55 : vector<1x16x128xf32> to vector<16x128xf32>
    %cst_41 = arith.constant dense<0.000000e+00> : vector<32x128xf32>
    %57 = tpu.matmul %54, %56, %cst_41 {dimension_numbers = #tpu.dot_dimension_numbers<[1], [0], [0], [1], [0, 0, 1, 1], [], []>} : vector<32x16xf32>, vector<16x128xf32>, vector<32x128xf32> -> vector<32x128xf32>
    %58 = arith.addf %2, %57 : vector<32x128xf32>
    %c0_42 = arith.constant 0 : index
    %c1_43 = arith.constant 1 : index
    %c0_44 = arith.constant 0 : index
    %c0_45 = arith.constant 0 : index
    %59 = vector.load %arg0[%c0_42, %c1_43, %c0_44, %c0_45] : memref<2x4x16x16xf32, #tpu.memory_space<vmem>>, vector<2x1x16x16xf32>
    %60 = vector.shape_cast %59 : vector<2x1x16x16xf32> to vector<2x16x16xf32>
    %cst_46 = arith.constant 0.000000e+00 : f32
    %61 = vector.broadcast %cst_46 : f32 to vector<2x16x16xf32>
    %62 = arith.maximumf %60, %61 : vector<2x16x16xf32>
    %c0_47 = arith.constant 0 : index
    %c1_48 = arith.constant 1 : index
    %c1_49 = arith.constant 1 : index
    %63 = vector.load %arg12[%c0_47, %c1_48, %c1_49] : memref<2x18x18xf32, #tpu.memory_space<vmem>>, vector<2x16x16xf32>
    tpu.vector_store %arg12[%c0_47, %c1_48, %c1_49], %62 {strides = array<i32>} : memref<2x18x18xf32, #tpu.memory_space<vmem>>, vector<2x16x16xf32>,
    %cst_50 = arith.constant 0.000000e+00 : f32
    %64 = vector.broadcast %cst_50 : f32 to vector<2x16x16xf32>
    %c1_51 = arith.constant 1 : index
    %65 = memref.load %arg1[%c1_51] : memref<36xf32, #tpu.memory_space<smem>>
    %c0_52 = arith.constant 0 : index
    %c0_53 = arith.constant 0 : index
    %c0_54 = arith.constant 0 : index
    %66 = vector.load %arg12[%c0_52, %c0_53, %c0_54] : memref<2x18x18xf32, #tpu.memory_space<vmem>>, vector<2x16x16xf32>
    %67 = vector.broadcast %65 : f32 to vector<2x16x16xf32>
    %68 = arith.mulf %67, %66 : vector<2x16x16xf32>
    %69 = arith.addf %64, %68 : vector<2x16x16xf32>
    %c5 = arith.constant 5 : index
    %70 = memref.load %arg1[%c5] : memref<36xf32, #tpu.memory_space<smem>>
    %c0_55 = arith.constant 0 : index
    %c0_56 = arith.constant 0 : index
    %c1_57 = arith.constant 1 : index
    %71 = vector.load %arg12[%c0_55, %c0_56, %c1_57] : memref<2x18x18xf32, #tpu.memory_space<vmem>>, vector<2x16x16xf32>
    %72 = vector.broadcast %70 : f32 to vector<2x16x16xf32>
    %73 = arith.mulf %72, %71 : vector<2x16x16xf32>
    %74 = arith.addf %69, %73 : vector<2x16x16xf32>
    %c9 = arith.constant 9 : index
    %75 = memref.load %arg1[%c9] : memref<36xf32, #tpu.memory_space<smem>>
    %c0_58 = arith.constant 0 : index
    %c0_59 = arith.constant 0 : index
    %c2_60 = arith.constant 2 : index
    %76 = vector.load %arg12[%c0_58, %c0_59, %c2_60] : memref<2x18x18xf32, #tpu.memory_space<vmem>>, vector<2x16x16xf32>
    %77 = vector.broadcast %75 : f32 to vector<2x16x16xf32>
    %78 = arith.mulf %77, %76 : vector<2x16x16xf32>
    %79 = arith.addf %74, %78 : vector<2x16x16xf32>
    %c13 = arith.constant 13 : index
    %80 = memref.load %arg1[%c13] : memref<36xf32, #tpu.memory_space<smem>>
    %c0_61 = arith.constant 0 : index
    %c1_62 = arith.constant 1 : index
    %c0_63 = arith.constant 0 : index
    %81 = vector.load %arg12[%c0_61, %c1_62, %c0_63] : memref<2x18x18xf32, #tpu.memory_space<vmem>>, vector<2x16x16xf32>
    %82 = vector.broadcast %80 : f32 to vector<2x16x16xf32>
    %83 = arith.mulf %82, %81 : vector<2x16x16xf32>
    %84 = arith.addf %79, %83 : vector<2x16x16xf32>
    %c17 = arith.constant 17 : index
    %85 = memref.load %arg1[%c17] : memref<36xf32, #tpu.memory_space<smem>>
    %c0_64 = arith.constant 0 : index
    %c1_65 = arith.constant 1 : index
    %c1_66 = arith.constant 1 : index
    %86 = vector.load %arg12[%c0_64, %c1_65, %c1_66] : memref<2x18x18xf32, #tpu.memory_space<vmem>>, vector<2x16x16xf32>
    %87 = vector.broadcast %85 : f32 to vector<2x16x16xf32>
    %88 = arith.mulf %87, %86 : vector<2x16x16xf32>
    %89 = arith.addf %84, %88 : vector<2x16x16xf32>
    %c21 = arith.constant 21 : index
    %90 = memref.load %arg1[%c21] : memref<36xf32, #tpu.memory_space<smem>>
    %c0_67 = arith.constant 0 : index
    %c1_68 = arith.constant 1 : index
    %c2_69 = arith.constant 2 : index
    %91 = vector.load %arg12[%c0_67, %c1_68, %c2_69] : memref<2x18x18xf32, #tpu.memory_space<vmem>>, vector<2x16x16xf32>
    %92 = vector.broadcast %90 : f32 to vector<2x16x16xf32>
    %93 = arith.mulf %92, %91 : vector<2x16x16xf32>
    %94 = arith.addf %89, %93 : vector<2x16x16xf32>
    %c25 = arith.constant 25 : index
    %95 = memref.load %arg1[%c25] : memref<36xf32, #tpu.memory_space<smem>>
    %c0_70 = arith.constant 0 : index
    %c2_71 = arith.constant 2 : index
    %c0_72 = arith.constant 0 : index
    %96 = vector.load %arg12[%c0_70, %c2_71, %c0_72] : memref<2x18x18xf32, #tpu.memory_space<vmem>>, vector<2x16x16xf32>
    %97 = vector.broadcast %95 : f32 to vector<2x16x16xf32>
    %98 = arith.mulf %97, %96 : vector<2x16x16xf32>
    %99 = arith.addf %94, %98 : vector<2x16x16xf32>
    %c29 = arith.constant 29 : index
    %100 = memref.load %arg1[%c29] : memref<36xf32, #tpu.memory_space<smem>>
    %c0_73 = arith.constant 0 : index
    %c2_74 = arith.constant 2 : index
    %c1_75 = arith.constant 1 : index
    %101 = vector.load %arg12[%c0_73, %c2_74, %c1_75] : memref<2x18x18xf32, #tpu.memory_space<vmem>>, vector<2x16x16xf32>
    %102 = vector.broadcast %100 : f32 to vector<2x16x16xf32>
    %103 = arith.mulf %102, %101 : vector<2x16x16xf32>
    %104 = arith.addf %99, %103 : vector<2x16x16xf32>
    %c33 = arith.constant 33 : index
    %105 = memref.load %arg1[%c33] : memref<36xf32, #tpu.memory_space<smem>>
    %c0_76 = arith.constant 0 : index
    %c2_77 = arith.constant 2 : index
    %c2_78 = arith.constant 2 : index
    %106 = vector.load %arg12[%c0_76, %c2_77, %c2_78] : memref<2x18x18xf32, #tpu.memory_space<vmem>>, vector<2x16x16xf32>
    %107 = vector.broadcast %105 : f32 to vector<2x16x16xf32>
    %108 = arith.mulf %107, %106 : vector<2x16x16xf32>
    %109 = arith.addf %104, %108 : vector<2x16x16xf32>
    %110 = vector.shape_cast %109 : vector<2x16x16xf32> to vector<32x16xf32>
    %c1_79 = arith.constant 1 : index
    %c0_80 = arith.constant 0 : index
    %c0_81 = arith.constant 0 : index
    %111 = vector.load %arg2[%c1_79, %c0_80, %c0_81] : memref<4x16x128xf32, #tpu.memory_space<vmem>>, vector<1x16x128xf32>
    %112 = vector.shape_cast %111 : vector<1x16x128xf32> to vector<16x128xf32>
    %cst_82 = arith.constant dense<0.000000e+00> : vector<32x128xf32>
    %113 = tpu.matmul %110, %112, %cst_82 {dimension_numbers = #tpu.dot_dimension_numbers<[1], [0], [0], [1], [0, 0, 1, 1], [], []>} : vector<32x16xf32>, vector<16x128xf32>, vector<32x128xf32> -> vector<32x128xf32>
    %114 = arith.addf %58, %113 : vector<32x128xf32>
    %c0_83 = arith.constant 0 : index
    %c2_84 = arith.constant 2 : index
    %c0_85 = arith.constant 0 : index
    %c0_86 = arith.constant 0 : index
    %115 = vector.load %arg0[%c0_83, %c2_84, %c0_85, %c0_86] : memref<2x4x16x16xf32, #tpu.memory_space<vmem>>, vector<2x1x16x16xf32>
    %116 = vector.shape_cast %115 : vector<2x1x16x16xf32> to vector<2x16x16xf32>
    %cst_87 = arith.constant 0.000000e+00 : f32
    %117 = vector.broadcast %cst_87 : f32 to vector<2x16x16xf32>
    %118 = arith.maximumf %116, %117 : vector<2x16x16xf32>
    %c0_88 = arith.constant 0 : index
    %c1_89 = arith.constant 1 : index
    %c1_90 = arith.constant 1 : index
    %119 = vector.load %arg12[%c0_88, %c1_89, %c1_90] : memref<2x18x18xf32, #tpu.memory_space<vmem>>, vector<2x16x16xf32>
    tpu.vector_store %arg12[%c0_88, %c1_89, %c1_90], %118 {strides = array<i32>} : memref<2x18x18xf32, #tpu.memory_space<vmem>>, vector<2x16x16xf32>,
    %cst_91 = arith.constant 0.000000e+00 : f32
    %120 = vector.broadcast %cst_91 : f32 to vector<2x16x16xf32>
    %c2_92 = arith.constant 2 : index
    %121 = memref.load %arg1[%c2_92] : memref<36xf32, #tpu.memory_space<smem>>
    %c0_93 = arith.constant 0 : index
    %c0_94 = arith.constant 0 : index
    %c0_95 = arith.constant 0 : index
    %122 = vector.load %arg12[%c0_93, %c0_94, %c0_95] : memref<2x18x18xf32, #tpu.memory_space<vmem>>, vector<2x16x16xf32>
    %123 = vector.broadcast %121 : f32 to vector<2x16x16xf32>
    %124 = arith.mulf %123, %122 : vector<2x16x16xf32>
    %125 = arith.addf %120, %124 : vector<2x16x16xf32>
    %c6 = arith.constant 6 : index
    %126 = memref.load %arg1[%c6] : memref<36xf32, #tpu.memory_space<smem>>
    %c0_96 = arith.constant 0 : index
    %c0_97 = arith.constant 0 : index
    %c1_98 = arith.constant 1 : index
    %127 = vector.load %arg12[%c0_96, %c0_97, %c1_98] : memref<2x18x18xf32, #tpu.memory_space<vmem>>, vector<2x16x16xf32>
    %128 = vector.broadcast %126 : f32 to vector<2x16x16xf32>
    %129 = arith.mulf %128, %127 : vector<2x16x16xf32>
    %130 = arith.addf %125, %129 : vector<2x16x16xf32>
    %c10 = arith.constant 10 : index
    %131 = memref.load %arg1[%c10] : memref<36xf32, #tpu.memory_space<smem>>
    %c0_99 = arith.constant 0 : index
    %c0_100 = arith.constant 0 : index
    %c2_101 = arith.constant 2 : index
    %132 = vector.load %arg12[%c0_99, %c0_100, %c2_101] : memref<2x18x18xf32, #tpu.memory_space<vmem>>, vector<2x16x16xf32>
    %133 = vector.broadcast %131 : f32 to vector<2x16x16xf32>
    %134 = arith.mulf %133, %132 : vector<2x16x16xf32>
    %135 = arith.addf %130, %134 : vector<2x16x16xf32>
    %c14 = arith.constant 14 : index
    %136 = memref.load %arg1[%c14] : memref<36xf32, #tpu.memory_space<smem>>
    %c0_102 = arith.constant 0 : index
    %c1_103 = arith.constant 1 : index
    %c0_104 = arith.constant 0 : index
    %137 = vector.load %arg12[%c0_102, %c1_103, %c0_104] : memref<2x18x18xf32, #tpu.memory_space<vmem>>, vector<2x16x16xf32>
    %138 = vector.broadcast %136 : f32 to vector<2x16x16xf32>
    %139 = arith.mulf %138, %137 : vector<2x16x16xf32>
    %140 = arith.addf %135, %139 : vector<2x16x16xf32>
    %c18 = arith.constant 18 : index
    %141 = memref.load %arg1[%c18] : memref<36xf32, #tpu.memory_space<smem>>
    %c0_105 = arith.constant 0 : index
    %c1_106 = arith.constant 1 : index
    %c1_107 = arith.constant 1 : index
    %142 = vector.load %arg12[%c0_105, %c1_106, %c1_107] : memref<2x18x18xf32, #tpu.memory_space<vmem>>, vector<2x16x16xf32>
    %143 = vector.broadcast %141 : f32 to vector<2x16x16xf32>
    %144 = arith.mulf %143, %142 : vector<2x16x16xf32>
    %145 = arith.addf %140, %144 : vector<2x16x16xf32>
    %c22 = arith.constant 22 : index
    %146 = memref.load %arg1[%c22] : memref<36xf32, #tpu.memory_space<smem>>
    %c0_108 = arith.constant 0 : index
    %c1_109 = arith.constant 1 : index
    %c2_110 = arith.constant 2 : index
    %147 = vector.load %arg12[%c0_108, %c1_109, %c2_110] : memref<2x18x18xf32, #tpu.memory_space<vmem>>, vector<2x16x16xf32>
    %148 = vector.broadcast %146 : f32 to vector<2x16x16xf32>
    %149 = arith.mulf %148, %147 : vector<2x16x16xf32>
    %150 = arith.addf %145, %149 : vector<2x16x16xf32>
    %c26 = arith.constant 26 : index
    %151 = memref.load %arg1[%c26] : memref<36xf32, #tpu.memory_space<smem>>
    %c0_111 = arith.constant 0 : index
    %c2_112 = arith.constant 2 : index
    %c0_113 = arith.constant 0 : index
    %152 = vector.load %arg12[%c0_111, %c2_112, %c0_113] : memref<2x18x18xf32, #tpu.memory_space<vmem>>, vector<2x16x16xf32>
    %153 = vector.broadcast %151 : f32 to vector<2x16x16xf32>
    %154 = arith.mulf %153, %152 : vector<2x16x16xf32>
    %155 = arith.addf %150, %154 : vector<2x16x16xf32>
    %c30 = arith.constant 30 : index
    %156 = memref.load %arg1[%c30] : memref<36xf32, #tpu.memory_space<smem>>
    %c0_114 = arith.constant 0 : index
    %c2_115 = arith.constant 2 : index
    %c1_116 = arith.constant 1 : index
    %157 = vector.load %arg12[%c0_114, %c2_115, %c1_116] : memref<2x18x18xf32, #tpu.memory_space<vmem>>, vector<2x16x16xf32>
    %158 = vector.broadcast %156 : f32 to vector<2x16x16xf32>
    %159 = arith.mulf %158, %157 : vector<2x16x16xf32>
    %160 = arith.addf %155, %159 : vector<2x16x16xf32>
    %c34 = arith.constant 34 : index
    %161 = memref.load %arg1[%c34] : memref<36xf32, #tpu.memory_space<smem>>
    %c0_117 = arith.constant 0 : index
    %c2_118 = arith.constant 2 : index
    %c2_119 = arith.constant 2 : index
    %162 = vector.load %arg12[%c0_117, %c2_118, %c2_119] : memref<2x18x18xf32, #tpu.memory_space<vmem>>, vector<2x16x16xf32>
    %163 = vector.broadcast %161 : f32 to vector<2x16x16xf32>
    %164 = arith.mulf %163, %162 : vector<2x16x16xf32>
    %165 = arith.addf %160, %164 : vector<2x16x16xf32>
    %166 = vector.shape_cast %165 : vector<2x16x16xf32> to vector<32x16xf32>
    %c2_120 = arith.constant 2 : index
    %c0_121 = arith.constant 0 : index
    %c0_122 = arith.constant 0 : index
    %167 = vector.load %arg2[%c2_120, %c0_121, %c0_122] : memref<4x16x128xf32, #tpu.memory_space<vmem>>, vector<1x16x128xf32>
    %168 = vector.shape_cast %167 : vector<1x16x128xf32> to vector<16x128xf32>
    %cst_123 = arith.constant dense<0.000000e+00> : vector<32x128xf32>
    %169 = tpu.matmul %166, %168, %cst_123 {dimension_numbers = #tpu.dot_dimension_numbers<[1], [0], [0], [1], [0, 0, 1, 1], [], []>} : vector<32x16xf32>, vector<16x128xf32>, vector<32x128xf32> -> vector<32x128xf32>
    %170 = arith.addf %114, %169 : vector<32x128xf32>
    %c0_124 = arith.constant 0 : index
    %c3 = arith.constant 3 : index
    %c0_125 = arith.constant 0 : index
    %c0_126 = arith.constant 0 : index
    %171 = vector.load %arg0[%c0_124, %c3, %c0_125, %c0_126] : memref<2x4x16x16xf32, #tpu.memory_space<vmem>>, vector<2x1x16x16xf32>
    %172 = vector.shape_cast %171 : vector<2x1x16x16xf32> to vector<2x16x16xf32>
    %cst_127 = arith.constant 0.000000e+00 : f32
    %173 = vector.broadcast %cst_127 : f32 to vector<2x16x16xf32>
    %174 = arith.maximumf %172, %173 : vector<2x16x16xf32>
    %c0_128 = arith.constant 0 : index
    %c1_129 = arith.constant 1 : index
    %c1_130 = arith.constant 1 : index
    %175 = vector.load %arg12[%c0_128, %c1_129, %c1_130] : memref<2x18x18xf32, #tpu.memory_space<vmem>>, vector<2x16x16xf32>
    tpu.vector_store %arg12[%c0_128, %c1_129, %c1_130], %174 {strides = array<i32>} : memref<2x18x18xf32, #tpu.memory_space<vmem>>, vector<2x16x16xf32>,
    %cst_131 = arith.constant 0.000000e+00 : f32
    %176 = vector.broadcast %cst_131 : f32 to vector<2x16x16xf32>
    %c3_132 = arith.constant 3 : index
    %177 = memref.load %arg1[%c3_132] : memref<36xf32, #tpu.memory_space<smem>>
    %c0_133 = arith.constant 0 : index
    %c0_134 = arith.constant 0 : index
    %c0_135 = arith.constant 0 : index
    %178 = vector.load %arg12[%c0_133, %c0_134, %c0_135] : memref<2x18x18xf32, #tpu.memory_space<vmem>>, vector<2x16x16xf32>
    %179 = vector.broadcast %177 : f32 to vector<2x16x16xf32>
    %180 = arith.mulf %179, %178 : vector<2x16x16xf32>
    %181 = arith.addf %176, %180 : vector<2x16x16xf32>
    %c7 = arith.constant 7 : index
    %182 = memref.load %arg1[%c7] : memref<36xf32, #tpu.memory_space<smem>>
    %c0_136 = arith.constant 0 : index
    %c0_137 = arith.constant 0 : index
    %c1_138 = arith.constant 1 : index
    %183 = vector.load %arg12[%c0_136, %c0_137, %c1_138] : memref<2x18x18xf32, #tpu.memory_space<vmem>>, vector<2x16x16xf32>
    %184 = vector.broadcast %182 : f32 to vector<2x16x16xf32>
    %185 = arith.mulf %184, %183 : vector<2x16x16xf32>
    %186 = arith.addf %181, %185 : vector<2x16x16xf32>
    %c11 = arith.constant 11 : index
    %187 = memref.load %arg1[%c11] : memref<36xf32, #tpu.memory_space<smem>>
    %c0_139 = arith.constant 0 : index
    %c0_140 = arith.constant 0 : index
    %c2_141 = arith.constant 2 : index
    %188 = vector.load %arg12[%c0_139, %c0_140, %c2_141] : memref<2x18x18xf32, #tpu.memory_space<vmem>>, vector<2x16x16xf32>
    %189 = vector.broadcast %187 : f32 to vector<2x16x16xf32>
    %190 = arith.mulf %189, %188 : vector<2x16x16xf32>
    %191 = arith.addf %186, %190 : vector<2x16x16xf32>
    %c15 = arith.constant 15 : index
    %192 = memref.load %arg1[%c15] : memref<36xf32, #tpu.memory_space<smem>>
    %c0_142 = arith.constant 0 : index
    %c1_143 = arith.constant 1 : index
    %c0_144 = arith.constant 0 : index
    %193 = vector.load %arg12[%c0_142, %c1_143, %c0_144] : memref<2x18x18xf32, #tpu.memory_space<vmem>>, vector<2x16x16xf32>
    %194 = vector.broadcast %192 : f32 to vector<2x16x16xf32>
    %195 = arith.mulf %194, %193 : vector<2x16x16xf32>
    %196 = arith.addf %191, %195 : vector<2x16x16xf32>
    %c19 = arith.constant 19 : index
    %197 = memref.load %arg1[%c19] : memref<36xf32, #tpu.memory_space<smem>>
    %c0_145 = arith.constant 0 : index
    %c1_146 = arith.constant 1 : index
    %c1_147 = arith.constant 1 : index
    %198 = vector.load %arg12[%c0_145, %c1_146, %c1_147] : memref<2x18x18xf32, #tpu.memory_space<vmem>>, vector<2x16x16xf32>
    %199 = vector.broadcast %197 : f32 to vector<2x16x16xf32>
    %200 = arith.mulf %199, %198 : vector<2x16x16xf32>
    %201 = arith.addf %196, %200 : vector<2x16x16xf32>
    %c23 = arith.constant 23 : index
    %202 = memref.load %arg1[%c23] : memref<36xf32, #tpu.memory_space<smem>>
    %c0_148 = arith.constant 0 : index
    %c1_149 = arith.constant 1 : index
    %c2_150 = arith.constant 2 : index
    %203 = vector.load %arg12[%c0_148, %c1_149, %c2_150] : memref<2x18x18xf32, #tpu.memory_space<vmem>>, vector<2x16x16xf32>
    %204 = vector.broadcast %202 : f32 to vector<2x16x16xf32>
    %205 = arith.mulf %204, %203 : vector<2x16x16xf32>
    %206 = arith.addf %201, %205 : vector<2x16x16xf32>
    %c27 = arith.constant 27 : index
    %207 = memref.load %arg1[%c27] : memref<36xf32, #tpu.memory_space<smem>>
    %c0_151 = arith.constant 0 : index
    %c2_152 = arith.constant 2 : index
    %c0_153 = arith.constant 0 : index
    %208 = vector.load %arg12[%c0_151, %c2_152, %c0_153] : memref<2x18x18xf32, #tpu.memory_space<vmem>>, vector<2x16x16xf32>
    %209 = vector.broadcast %207 : f32 to vector<2x16x16xf32>
    %210 = arith.mulf %209, %208 : vector<2x16x16xf32>
    %211 = arith.addf %206, %210 : vector<2x16x16xf32>
    %c31 = arith.constant 31 : index
    %212 = memref.load %arg1[%c31] : memref<36xf32, #tpu.memory_space<smem>>
    %c0_154 = arith.constant 0 : index
    %c2_155 = arith.constant 2 : index
    %c1_156 = arith.constant 1 : index
    %213 = vector.load %arg12[%c0_154, %c2_155, %c1_156] : memref<2x18x18xf32, #tpu.memory_space<vmem>>, vector<2x16x16xf32>
    %214 = vector.broadcast %212 : f32 to vector<2x16x16xf32>
    %215 = arith.mulf %214, %213 : vector<2x16x16xf32>
    %216 = arith.addf %211, %215 : vector<2x16x16xf32>
    %c35 = arith.constant 35 : index
    %217 = memref.load %arg1[%c35] : memref<36xf32, #tpu.memory_space<smem>>
    %c0_157 = arith.constant 0 : index
    %c2_158 = arith.constant 2 : index
    %c2_159 = arith.constant 2 : index
    %218 = vector.load %arg12[%c0_157, %c2_158, %c2_159] : memref<2x18x18xf32, #tpu.memory_space<vmem>>, vector<2x16x16xf32>
    %219 = vector.broadcast %217 : f32 to vector<2x16x16xf32>
    %220 = arith.mulf %219, %218 : vector<2x16x16xf32>
    %221 = arith.addf %216, %220 : vector<2x16x16xf32>
    %222 = vector.shape_cast %221 : vector<2x16x16xf32> to vector<32x16xf32>
    %c3_160 = arith.constant 3 : index
    %c0_161 = arith.constant 0 : index
    %c0_162 = arith.constant 0 : index
    %223 = vector.load %arg2[%c3_160, %c0_161, %c0_162] : memref<4x16x128xf32, #tpu.memory_space<vmem>>, vector<1x16x128xf32>
    %224 = vector.shape_cast %223 : vector<1x16x128xf32> to vector<16x128xf32>
    %cst_163 = arith.constant dense<0.000000e+00> : vector<32x128xf32>
    %225 = tpu.matmul %222, %224, %cst_163 {dimension_numbers = #tpu.dot_dimension_numbers<[1], [0], [0], [1], [0, 0, 1, 1], [], []>} : vector<32x16xf32>, vector<16x128xf32>, vector<32x128xf32> -> vector<32x128xf32>
    %226 = arith.addf %170, %225 : vector<32x128xf32>
    %c0_164 = arith.constant 0 : index
    %c0_165 = arith.constant 0 : index
    %227 = vector.load %arg3[%c0_164, %c0_165] : memref<1x128xf32, #tpu.memory_space<vmem>>, vector<1x128xf32>
    %228 = vector.broadcast %227 : vector<1x128xf32> to vector<32x128xf32>
    %229 = arith.addf %226, %228 : vector<32x128xf32>
    %cst_166 = arith.constant 0.000000e+00 : f32
    %230 = vector.broadcast %cst_166 : f32 to vector<2x18x144xf32>
    %c0_167 = arith.constant 0 : index
    %c0_168 = arith.constant 0 : index
    %c0_169 = arith.constant 0 : index
    %231 = vector.load %arg13[%c0_167, %c0_168, %c0_169] : memref<2x18x144xf32, #tpu.memory_space<vmem>>, vector<2x18x144xf32>
    tpu.vector_store %arg13[%c0_167, %c0_168, %c0_169], %230 {strides = array<i32>} : memref<2x18x144xf32, #tpu.memory_space<vmem>>, vector<2x18x144xf32>,
    %cst_170 = arith.constant 0.000000e+00 : f32
    %232 = vector.broadcast %cst_170 : f32 to vector<32x128xf32>
    %233 = arith.maximumf %229, %232 : vector<32x128xf32>
    %234 = vector.shape_cast %233 : vector<32x128xf32> to vector<2x16x128xf32>
    %c0_171 = arith.constant 0 : index
    %c1_172 = arith.constant 1 : index
    %c8_173 = arith.constant 8 : index
    %235 = vector.load %arg13[%c0_171, %c1_172, %c8_173] : memref<2x18x144xf32, #tpu.memory_space<vmem>>, vector<2x16x128xf32>
    tpu.vector_store %arg13[%c0_171, %c1_172, %c8_173], %234 {strides = array<i32>} : memref<2x18x144xf32, #tpu.memory_space<vmem>>, vector<2x16x128xf32>,
    %cst_174 = arith.constant 0.000000e+00 : f32
    %236 = vector.broadcast %cst_174 : f32 to vector<2x16x128xf32>
    %c0_175 = arith.constant 0 : index
    %c0_176 = arith.constant 0 : index
    %237 = vector.load %arg4[%c0_175, %c0_176] : memref<9x128xf32, #tpu.memory_space<vmem>>, vector<1x128xf32>
    %238 = vector.shape_cast %237 : vector<1x128xf32> to vector<128xf32>
    %c0_177 = arith.constant 0 : index
    %c0_178 = arith.constant 0 : index
    %c0_179 = arith.constant 0 : index
    %239 = vector.load %arg13[%c0_177, %c0_178, %c0_179] : memref<2x18x144xf32, #tpu.memory_space<vmem>>, vector<2x16x128xf32>
    %240 = vector.shape_cast %238 : vector<128xf32> to vector<1x1x128xf32>
    %241 = vector.broadcast %240 : vector<1x1x128xf32> to vector<2x16x128xf32>
    %242 = arith.mulf %241, %239 : vector<2x16x128xf32>
    %243 = arith.addf %236, %242 : vector<2x16x128xf32>
    %c1_180 = arith.constant 1 : index
    %c0_181 = arith.constant 0 : index
    %244 = vector.load %arg4[%c1_180, %c0_181] : memref<9x128xf32, #tpu.memory_space<vmem>>, vector<1x128xf32>
    %245 = vector.shape_cast %244 : vector<1x128xf32> to vector<128xf32>
    %c0_182 = arith.constant 0 : index
    %c0_183 = arith.constant 0 : index
    %c8_184 = arith.constant 8 : index
    %246 = vector.load %arg13[%c0_182, %c0_183, %c8_184] : memref<2x18x144xf32, #tpu.memory_space<vmem>>, vector<2x16x128xf32>
    %247 = vector.shape_cast %245 : vector<128xf32> to vector<1x1x128xf32>
    %248 = vector.broadcast %247 : vector<1x1x128xf32> to vector<2x16x128xf32>
    %249 = arith.mulf %248, %246 : vector<2x16x128xf32>
    %250 = arith.addf %243, %249 : vector<2x16x128xf32>
    %c2_185 = arith.constant 2 : index
    %c0_186 = arith.constant 0 : index
    %251 = vector.load %arg4[%c2_185, %c0_186] : memref<9x128xf32, #tpu.memory_space<vmem>>, vector<1x128xf32>
    %252 = vector.shape_cast %251 : vector<1x128xf32> to vector<128xf32>
    %c0_187 = arith.constant 0 : index
    %c0_188 = arith.constant 0 : index
    %c16_189 = arith.constant 16 : index
    %253 = vector.load %arg13[%c0_187, %c0_188, %c16_189] : memref<2x18x144xf32, #tpu.memory_space<vmem>>, vector<2x16x128xf32>
    %254 = vector.shape_cast %252 : vector<128xf32> to vector<1x1x128xf32>
    %255 = vector.broadcast %254 : vector<1x1x128xf32> to vector<2x16x128xf32>
    %256 = arith.mulf %255, %253 : vector<2x16x128xf32>
    %257 = arith.addf %250, %256 : vector<2x16x128xf32>
    %c3_190 = arith.constant 3 : index
    %c0_191 = arith.constant 0 : index
    %258 = vector.load %arg4[%c3_190, %c0_191] : memref<9x128xf32, #tpu.memory_space<vmem>>, vector<1x128xf32>
    %259 = vector.shape_cast %258 : vector<1x128xf32> to vector<128xf32>
    %c0_192 = arith.constant 0 : index
    %c1_193 = arith.constant 1 : index
    %c0_194 = arith.constant 0 : index
    %260 = vector.load %arg13[%c0_192, %c1_193, %c0_194] : memref<2x18x144xf32, #tpu.memory_space<vmem>>, vector<2x16x128xf32>
    %261 = vector.shape_cast %259 : vector<128xf32> to vector<1x1x128xf32>
    %262 = vector.broadcast %261 : vector<1x1x128xf32> to vector<2x16x128xf32>
    %263 = arith.mulf %262, %260 : vector<2x16x128xf32>
    %264 = arith.addf %257, %263 : vector<2x16x128xf32>
    %c4_195 = arith.constant 4 : index
    %c0_196 = arith.constant 0 : index
    %265 = vector.load %arg4[%c4_195, %c0_196] : memref<9x128xf32, #tpu.memory_space<vmem>>, vector<1x128xf32>
    %266 = vector.shape_cast %265 : vector<1x128xf32> to vector<128xf32>
    %c0_197 = arith.constant 0 : index
    %c1_198 = arith.constant 1 : index
    %c8_199 = arith.constant 8 : index
    %267 = vector.load %arg13[%c0_197, %c1_198, %c8_199] : memref<2x18x144xf32, #tpu.memory_space<vmem>>, vector<2x16x128xf32>
    %268 = vector.shape_cast %266 : vector<128xf32> to vector<1x1x128xf32>
    %269 = vector.broadcast %268 : vector<1x1x128xf32> to vector<2x16x128xf32>
    %270 = arith.mulf %269, %267 : vector<2x16x128xf32>
    %271 = arith.addf %264, %270 : vector<2x16x128xf32>
    %c5_200 = arith.constant 5 : index
    %c0_201 = arith.constant 0 : index
    %272 = vector.load %arg4[%c5_200, %c0_201] : memref<9x128xf32, #tpu.memory_space<vmem>>, vector<1x128xf32>
    %273 = vector.shape_cast %272 : vector<1x128xf32> to vector<128xf32>
    %c0_202 = arith.constant 0 : index
    %c1_203 = arith.constant 1 : index
    %c16_204 = arith.constant 16 : index
    %274 = vector.load %arg13[%c0_202, %c1_203, %c16_204] : memref<2x18x144xf32, #tpu.memory_space<vmem>>, vector<2x16x128xf32>
    %275 = vector.shape_cast %273 : vector<128xf32> to vector<1x1x128xf32>
    %276 = vector.broadcast %275 : vector<1x1x128xf32> to vector<2x16x128xf32>
    %277 = arith.mulf %276, %274 : vector<2x16x128xf32>
    %278 = arith.addf %271, %277 : vector<2x16x128xf32>
    %c6_205 = arith.constant 6 : index
    %c0_206 = arith.constant 0 : index
    %279 = vector.load %arg4[%c6_205, %c0_206] : memref<9x128xf32, #tpu.memory_space<vmem>>, vector<1x128xf32>
    %280 = vector.shape_cast %279 : vector<1x128xf32> to vector<128xf32>
    %c0_207 = arith.constant 0 : index
    %c2_208 = arith.constant 2 : index
    %c0_209 = arith.constant 0 : index
    %281 = vector.load %arg13[%c0_207, %c2_208, %c0_209] : memref<2x18x144xf32, #tpu.memory_space<vmem>>, vector<2x16x128xf32>
    %282 = vector.shape_cast %280 : vector<128xf32> to vector<1x1x128xf32>
    %283 = vector.broadcast %282 : vector<1x1x128xf32> to vector<2x16x128xf32>
    %284 = arith.mulf %283, %281 : vector<2x16x128xf32>
    %285 = arith.addf %278, %284 : vector<2x16x128xf32>
    %c7_210 = arith.constant 7 : index
    %c0_211 = arith.constant 0 : index
    %286 = vector.load %arg4[%c7_210, %c0_211] : memref<9x128xf32, #tpu.memory_space<vmem>>, vector<1x128xf32>
    %287 = vector.shape_cast %286 : vector<1x128xf32> to vector<128xf32>
    %c0_212 = arith.constant 0 : index
    %c2_213 = arith.constant 2 : index
    %c8_214 = arith.constant 8 : index
    %288 = vector.load %arg13[%c0_212, %c2_213, %c8_214] : memref<2x18x144xf32, #tpu.memory_space<vmem>>, vector<2x16x128xf32>
    %289 = vector.shape_cast %287 : vector<128xf32> to vector<1x1x128xf32>
    %290 = vector.broadcast %289 : vector<1x1x128xf32> to vector<2x16x128xf32>
    %291 = arith.mulf %290, %288 : vector<2x16x128xf32>
    %292 = arith.addf %285, %291 : vector<2x16x128xf32>
    %c8_215 = arith.constant 8 : index
    %c0_216 = arith.constant 0 : index
    %293 = vector.load %arg4[%c8_215, %c0_216] : memref<9x128xf32, #tpu.memory_space<vmem>>, vector<1x128xf32>
    %294 = vector.shape_cast %293 : vector<1x128xf32> to vector<128xf32>
    %c0_217 = arith.constant 0 : index
    %c2_218 = arith.constant 2 : index
    %c16_219 = arith.constant 16 : index
    %295 = vector.load %arg13[%c0_217, %c2_218, %c16_219] : memref<2x18x144xf32, #tpu.memory_space<vmem>>, vector<2x16x128xf32>
    %296 = vector.shape_cast %294 : vector<128xf32> to vector<1x1x128xf32>
    %297 = vector.broadcast %296 : vector<1x1x128xf32> to vector<2x16x128xf32>
    %298 = arith.mulf %297, %295 : vector<2x16x128xf32>
    %299 = arith.addf %292, %298 : vector<2x16x128xf32>
    %300 = vector.shape_cast %299 : vector<2x16x128xf32> to vector<32x128xf32>
    %c0_220 = arith.constant 0 : index
    %c0_221 = arith.constant 0 : index
    %301 = vector.load %arg5[%c0_220, %c0_221] : memref<128x128xf32, #tpu.memory_space<vmem>>, vector<128x128xf32>
    %cst_222 = arith.constant dense<0.000000e+00> : vector<32x128xf32>
    %302 = tpu.matmul %300, %301, %cst_222 {dimension_numbers = #tpu.dot_dimension_numbers<[1], [0], [0], [1], [0, 0, 1, 1], [], []>} : vector<32x128xf32>, vector<128x128xf32>, vector<32x128xf32> -> vector<32x128xf32>
    %c0_223 = arith.constant 0 : index
    %c0_224 = arith.constant 0 : index
    %303 = vector.load %arg6[%c0_223, %c0_224] : memref<1x128xf32, #tpu.memory_space<vmem>>, vector<1x128xf32>
    %304 = vector.broadcast %303 : vector<1x128xf32> to vector<32x128xf32>
    %305 = arith.addf %302, %304 : vector<32x128xf32>
    %cst_225 = arith.constant 0xFF800000 : f32
    %306 = vector.broadcast %cst_225 : f32 to vector<2x18x144xf32>
    %c0_226 = arith.constant 0 : index
    %c0_227 = arith.constant 0 : index
    %c0_228 = arith.constant 0 : index
    %307 = vector.load %arg14[%c0_226, %c0_227, %c0_228] : memref<2x18x144xf32, #tpu.memory_space<vmem>>, vector<2x18x144xf32>
    tpu.vector_store %arg14[%c0_226, %c0_227, %c0_228], %306 {strides = array<i32>} : memref<2x18x144xf32, #tpu.memory_space<vmem>>, vector<2x18x144xf32>,
    %308 = vector.shape_cast %305 : vector<32x128xf32> to vector<2x16x128xf32>
    %c0_229 = arith.constant 0 : index
    %c1_230 = arith.constant 1 : index
    %c8_231 = arith.constant 8 : index
    %309 = vector.load %arg14[%c0_229, %c1_230, %c8_231] : memref<2x18x144xf32, #tpu.memory_space<vmem>>, vector<2x16x128xf32>
    tpu.vector_store %arg14[%c0_229, %c1_230, %c8_231], %308 {strides = array<i32>} : memref<2x18x144xf32, #tpu.memory_space<vmem>>, vector<2x16x128xf32>,
    %c0_232 = arith.constant 0 : index
    %c0_233 = arith.constant 0 : index
    %c0_234 = arith.constant 0 : index
    %310 = vector.load %arg14[%c0_232, %c0_233, %c0_234] : memref<2x18x144xf32, #tpu.memory_space<vmem>>, vector<2x16x128xf32>
    %c0_235 = arith.constant 0 : index
    %c0_236 = arith.constant 0 : index
    %c8_237 = arith.constant 8 : index
    %311 = vector.load %arg14[%c0_235, %c0_236, %c8_237] : memref<2x18x144xf32, #tpu.memory_space<vmem>>, vector<2x16x128xf32>
    %312 = arith.maximumf %310, %311 : vector<2x16x128xf32>
    %c0_238 = arith.constant 0 : index
    %c0_239 = arith.constant 0 : index
    %c16_240 = arith.constant 16 : index
    %313 = vector.load %arg14[%c0_238, %c0_239, %c16_240] : memref<2x18x144xf32, #tpu.memory_space<vmem>>, vector<2x16x128xf32>
    %314 = arith.maximumf %312, %313 : vector<2x16x128xf32>
    %c0_241 = arith.constant 0 : index
    %c1_242 = arith.constant 1 : index
    %c0_243 = arith.constant 0 : index
    %315 = vector.load %arg14[%c0_241, %c1_242, %c0_243] : memref<2x18x144xf32, #tpu.memory_space<vmem>>, vector<2x16x128xf32>
    %316 = arith.maximumf %314, %315 : vector<2x16x128xf32>
    %c0_244 = arith.constant 0 : index
    %c1_245 = arith.constant 1 : index
    %c8_246 = arith.constant 8 : index
    %317 = vector.load %arg14[%c0_244, %c1_245, %c8_246] : memref<2x18x144xf32, #tpu.memory_space<vmem>>, vector<2x16x128xf32>
    %318 = arith.maximumf %316, %317 : vector<2x16x128xf32>
    %c0_247 = arith.constant 0 : index
    %c1_248 = arith.constant 1 : index
    %c16_249 = arith.constant 16 : index
    %319 = vector.load %arg14[%c0_247, %c1_248, %c16_249] : memref<2x18x144xf32, #tpu.memory_space<vmem>>, vector<2x16x128xf32>
    %320 = arith.maximumf %318, %319 : vector<2x16x128xf32>
    %c0_250 = arith.constant 0 : index
    %c2_251 = arith.constant 2 : index
    %c0_252 = arith.constant 0 : index
    %321 = vector.load %arg14[%c0_250, %c2_251, %c0_252] : memref<2x18x144xf32, #tpu.memory_space<vmem>>, vector<2x16x128xf32>
    %322 = arith.maximumf %320, %321 : vector<2x16x128xf32>
    %c0_253 = arith.constant 0 : index
    %c2_254 = arith.constant 2 : index
    %c8_255 = arith.constant 8 : index
    %323 = vector.load %arg14[%c0_253, %c2_254, %c8_255] : memref<2x18x144xf32, #tpu.memory_space<vmem>>, vector<2x16x128xf32>
    %324 = arith.maximumf %322, %323 : vector<2x16x128xf32>
    %c0_256 = arith.constant 0 : index
    %c2_257 = arith.constant 2 : index
    %c16_258 = arith.constant 16 : index
    %325 = vector.load %arg14[%c0_256, %c2_257, %c16_258] : memref<2x18x144xf32, #tpu.memory_space<vmem>>, vector<2x16x128xf32>
    %326 = arith.maximumf %324, %325 : vector<2x16x128xf32>
    %327 = vector.shape_cast %326 : vector<2x16x128xf32> to vector<32x128xf32>
    %c0_259 = arith.constant 0 : index
    %c0_260 = arith.constant 0 : index
    %328 = vector.load %arg7[%c0_259, %c0_260] : memref<128x64xf32, #tpu.memory_space<vmem>>, vector<128x64xf32>
    %cst_261 = arith.constant dense<0.000000e+00> : vector<32x64xf32>
    %329 = tpu.matmul %327, %328, %cst_261 {dimension_numbers = #tpu.dot_dimension_numbers<[1], [0], [0], [1], [0, 0, 1, 1], [], []>} : vector<32x128xf32>, vector<128x64xf32>, vector<32x64xf32> -> vector<32x64xf32>
    %cst_262 = arith.constant 0.000000e+00 : f32
    %330 = vector.broadcast %cst_262 : f32 to vector<32x64xf32>
    %c0_263 = arith.constant 0 : index
    %c0_264 = arith.constant 0 : index
    %c0_265 = arith.constant 0 : index
    %c0_266 = arith.constant 0 : index
    %331 = vector.load %arg0[%c0_263, %c0_264, %c0_265, %c0_266] : memref<2x4x16x16xf32, #tpu.memory_space<vmem>>, vector<2x1x16x16xf32>
    %332 = vector.shape_cast %331 : vector<2x1x16x16xf32> to vector<2x16x16xf32>
    %333 = vector.shape_cast %332 : vector<2x16x16xf32> to vector<32x16xf32>
    %c0_267 = arith.constant 0 : index
    %c0_268 = arith.constant 0 : index
    %c0_269 = arith.constant 0 : index
    %334 = vector.load %arg9[%c0_267, %c0_268, %c0_269] : memref<4x16x64xf32, #tpu.memory_space<vmem>>, vector<1x16x64xf32>
    %335 = vector.shape_cast %334 : vector<1x16x64xf32> to vector<16x64xf32>
    %cst_270 = arith.constant dense<0.000000e+00> : vector<32x64xf32>
    %336 = tpu.matmul %333, %335, %cst_270 {dimension_numbers = #tpu.dot_dimension_numbers<[1], [0], [0], [1], [0, 0, 1, 1], [], []>} : vector<32x16xf32>, vector<16x64xf32>, vector<32x64xf32> -> vector<32x64xf32>
    %337 = arith.addf %330, %336 : vector<32x64xf32>
    %c0_271 = arith.constant 0 : index
    %c1_272 = arith.constant 1 : index
    %c0_273 = arith.constant 0 : index
    %c0_274 = arith.constant 0 : index
    %338 = vector.load %arg0[%c0_271, %c1_272, %c0_273, %c0_274] : memref<2x4x16x16xf32, #tpu.memory_space<vmem>>, vector<2x1x16x16xf32>
    %339 = vector.shape_cast %338 : vector<2x1x16x16xf32> to vector<2x16x16xf32>
    %340 = vector.shape_cast %339 : vector<2x16x16xf32> to vector<32x16xf32>
    %c1_275 = arith.constant 1 : index
    %c0_276 = arith.constant 0 : index
    %c0_277 = arith.constant 0 : index
    %341 = vector.load %arg9[%c1_275, %c0_276, %c0_277] : memref<4x16x64xf32, #tpu.memory_space<vmem>>, vector<1x16x64xf32>
    %342 = vector.shape_cast %341 : vector<1x16x64xf32> to vector<16x64xf32>
    %cst_278 = arith.constant dense<0.000000e+00> : vector<32x64xf32>
    %343 = tpu.matmul %340, %342, %cst_278 {dimension_numbers = #tpu.dot_dimension_numbers<[1], [0], [0], [1], [0, 0, 1, 1], [], []>} : vector<32x16xf32>, vector<16x64xf32>, vector<32x64xf32> -> vector<32x64xf32>
    %344 = arith.addf %337, %343 : vector<32x64xf32>
    %c0_279 = arith.constant 0 : index
    %c2_280 = arith.constant 2 : index
    %c0_281 = arith.constant 0 : index
    %c0_282 = arith.constant 0 : index
    %345 = vector.load %arg0[%c0_279, %c2_280, %c0_281, %c0_282] : memref<2x4x16x16xf32, #tpu.memory_space<vmem>>, vector<2x1x16x16xf32>
    %346 = vector.shape_cast %345 : vector<2x1x16x16xf32> to vector<2x16x16xf32>
    %347 = vector.shape_cast %346 : vector<2x16x16xf32> to vector<32x16xf32>
    %c2_283 = arith.constant 2 : index
    %c0_284 = arith.constant 0 : index
    %c0_285 = arith.constant 0 : index
    %348 = vector.load %arg9[%c2_283, %c0_284, %c0_285] : memref<4x16x64xf32, #tpu.memory_space<vmem>>, vector<1x16x64xf32>
    %349 = vector.shape_cast %348 : vector<1x16x64xf32> to vector<16x64xf32>
    %cst_286 = arith.constant dense<0.000000e+00> : vector<32x64xf32>
    %350 = tpu.matmul %347, %349, %cst_286 {dimension_numbers = #tpu.dot_dimension_numbers<[1], [0], [0], [1], [0, 0, 1, 1], [], []>} : vector<32x16xf32>, vector<16x64xf32>, vector<32x64xf32> -> vector<32x64xf32>
    %351 = arith.addf %344, %350 : vector<32x64xf32>
    %c0_287 = arith.constant 0 : index
    %c3_288 = arith.constant 3 : index
    %c0_289 = arith.constant 0 : index
    %c0_290 = arith.constant 0 : index
    %352 = vector.load %arg0[%c0_287, %c3_288, %c0_289, %c0_290] : memref<2x4x16x16xf32, #tpu.memory_space<vmem>>, vector<2x1x16x16xf32>
    %353 = vector.shape_cast %352 : vector<2x1x16x16xf32> to vector<2x16x16xf32>
    %354 = vector.shape_cast %353 : vector<2x16x16xf32> to vector<32x16xf32>
    %c3_291 = arith.constant 3 : index
    %c0_292 = arith.constant 0 : index
    %c0_293 = arith.constant 0 : index
    %355 = vector.load %arg9[%c3_291, %c0_292, %c0_293] : memref<4x16x64xf32, #tpu.memory_space<vmem>>, vector<1x16x64xf32>
    %356 = vector.shape_cast %355 : vector<1x16x64xf32> to vector<16x64xf32>
    %cst_294 = arith.constant dense<0.000000e+00> : vector<32x64xf32>
    %357 = tpu.matmul %354, %356, %cst_294 {dimension_numbers = #tpu.dot_dimension_numbers<[1], [0], [0], [1], [0, 0, 1, 1], [], []>} : vector<32x16xf32>, vector<16x64xf32>, vector<32x64xf32> -> vector<32x64xf32>
    %358 = arith.addf %351, %357 : vector<32x64xf32>
    %359 = arith.addf %329, %358 : vector<32x64xf32>
    %c0_295 = arith.constant 0 : index
    %c0_296 = arith.constant 0 : index
    %360 = vector.load %arg10[%c0_295, %c0_296] : memref<1x64xf32, #tpu.memory_space<vmem>>, vector<1x64xf32>
    %361 = vector.broadcast %360 : vector<1x64xf32> to vector<32x64xf32>
    %362 = arith.addf %359, %361 : vector<32x64xf32>
    %c0_297 = arith.constant 0 : index
    %c0_298 = arith.constant 0 : index
    %363 = vector.load %arg8[%c0_297, %c0_298] : memref<16x32xf32, #tpu.memory_space<vmem>>, vector<16x32xf32>
    %cst_299 = arith.constant dense<0.000000e+00> : vector<16x64xf32>
    %364 = tpu.matmul %363, %362, %cst_299 {dimension_numbers = #tpu.dot_dimension_numbers<[1], [0], [0], [1], [0, 0, 1, 1], [], []>} : vector<16x32xf32>, vector<32x64xf32>, vector<16x64xf32> -> vector<16x64xf32>
    %365 = vector.extract_strided_slice %364 {offsets = [0, 0], sizes = [16, 8], strides = [1, 1]} : vector<16x64xf32> to vector<16x8xf32>
    %366 = vector.shape_cast %365 : vector<16x8xf32> to vector<2x8x8xf32>
    %c0_300 = arith.constant 0 : index
    %c0_301 = arith.constant 0 : index
    %c0_302 = arith.constant 0 : index
    %c0_303 = arith.constant 0 : index
    %367 = vector.load %arg11[%c0_300, %c0_301, %c0_302, %c0_303] : memref<2x8x8x8xf32, #tpu.memory_space<vmem>>, vector<2x1x8x8xf32>
    %368 = vector.shape_cast %367 : vector<2x1x8x8xf32> to vector<2x8x8xf32>
    %369 = vector.shape_cast %366 : vector<2x8x8xf32> to vector<2x1x8x8xf32>
    tpu.vector_store %arg11[%c0_300, %c0_301, %c0_302, %c0_303], %369 {strides = array<i32>} : memref<2x8x8x8xf32, #tpu.memory_space<vmem>>, vector<2x1x8x8xf32>,
    %370 = vector.extract_strided_slice %364 {offsets = [0, 8], sizes = [16, 8], strides = [1, 1]} : vector<16x64xf32> to vector<16x8xf32>
    %371 = vector.shape_cast %370 : vector<16x8xf32> to vector<2x8x8xf32>
    %c0_304 = arith.constant 0 : index
    %c1_305 = arith.constant 1 : index
    %c0_306 = arith.constant 0 : index
    %c0_307 = arith.constant 0 : index
    %372 = vector.load %arg11[%c0_304, %c1_305, %c0_306, %c0_307] : memref<2x8x8x8xf32, #tpu.memory_space<vmem>>, vector<2x1x8x8xf32>
    %373 = vector.shape_cast %372 : vector<2x1x8x8xf32> to vector<2x8x8xf32>
    %374 = vector.shape_cast %371 : vector<2x8x8xf32> to vector<2x1x8x8xf32>
    tpu.vector_store %arg11[%c0_304, %c1_305, %c0_306, %c0_307], %374 {strides = array<i32>} : memref<2x8x8x8xf32, #tpu.memory_space<vmem>>, vector<2x1x8x8xf32>,
    %375 = vector.extract_strided_slice %364 {offsets = [0, 16], sizes = [16, 8], strides = [1, 1]} : vector<16x64xf32> to vector<16x8xf32>
    %376 = vector.shape_cast %375 : vector<16x8xf32> to vector<2x8x8xf32>
    %c0_308 = arith.constant 0 : index
    %c2_309 = arith.constant 2 : index
    %c0_310 = arith.constant 0 : index
    %c0_311 = arith.constant 0 : index
    %377 = vector.load %arg11[%c0_308, %c2_309, %c0_310, %c0_311] : memref<2x8x8x8xf32, #tpu.memory_space<vmem>>, vector<2x1x8x8xf32>
    %378 = vector.shape_cast %377 : vector<2x1x8x8xf32> to vector<2x8x8xf32>
    %379 = vector.shape_cast %376 : vector<2x8x8xf32> to vector<2x1x8x8xf32>
    tpu.vector_store %arg11[%c0_308, %c2_309, %c0_310, %c0_311], %379 {strides = array<i32>} : memref<2x8x8x8xf32, #tpu.memory_space<vmem>>, vector<2x1x8x8xf32>,
    %380 = vector.extract_strided_slice %364 {offsets = [0, 24], sizes = [16, 8], strides = [1, 1]} : vector<16x64xf32> to vector<16x8xf32>
    %381 = vector.shape_cast %380 : vector<16x8xf32> to vector<2x8x8xf32>
    %c0_312 = arith.constant 0 : index
    %c3_313 = arith.constant 3 : index
    %c0_314 = arith.constant 0 : index
    %c0_315 = arith.constant 0 : index
    %382 = vector.load %arg11[%c0_312, %c3_313, %c0_314, %c0_315] : memref<2x8x8x8xf32, #tpu.memory_space<vmem>>, vector<2x1x8x8xf32>
    %383 = vector.shape_cast %382 : vector<2x1x8x8xf32> to vector<2x8x8xf32>
    %384 = vector.shape_cast %381 : vector<2x8x8xf32> to vector<2x1x8x8xf32>
    tpu.vector_store %arg11[%c0_312, %c3_313, %c0_314, %c0_315], %384 {strides = array<i32>} : memref<2x8x8x8xf32, #tpu.memory_space<vmem>>, vector<2x1x8x8xf32>,
    %385 = vector.extract_strided_slice %364 {offsets = [0, 32], sizes = [16, 8], strides = [1, 1]} : vector<16x64xf32> to vector<16x8xf32>
    %386 = vector.shape_cast %385 : vector<16x8xf32> to vector<2x8x8xf32>
    %c0_316 = arith.constant 0 : index
    %c4_317 = arith.constant 4 : index
    %c0_318 = arith.constant 0 : index
    %c0_319 = arith.constant 0 : index
    %387 = vector.load %arg11[%c0_316, %c4_317, %c0_318, %c0_319] : memref<2x8x8x8xf32, #tpu.memory_space<vmem>>, vector<2x1x8x8xf32>
    %388 = vector.shape_cast %387 : vector<2x1x8x8xf32> to vector<2x8x8xf32>
    %389 = vector.shape_cast %386 : vector<2x8x8xf32> to vector<2x1x8x8xf32>
    tpu.vector_store %arg11[%c0_316, %c4_317, %c0_318, %c0_319], %389 {strides = array<i32>} : memref<2x8x8x8xf32, #tpu.memory_space<vmem>>, vector<2x1x8x8xf32>,
    %390 = vector.extract_strided_slice %364 {offsets = [0, 40], sizes = [16, 8], strides = [1, 1]} : vector<16x64xf32> to vector<16x8xf32>
    %391 = vector.shape_cast %390 : vector<16x8xf32> to vector<2x8x8xf32>
    %c0_320 = arith.constant 0 : index
    %c5_321 = arith.constant 5 : index
    %c0_322 = arith.constant 0 : index
    %c0_323 = arith.constant 0 : index
    %392 = vector.load %arg11[%c0_320, %c5_321, %c0_322, %c0_323] : memref<2x8x8x8xf32, #tpu.memory_space<vmem>>, vector<2x1x8x8xf32>
    %393 = vector.shape_cast %392 : vector<2x1x8x8xf32> to vector<2x8x8xf32>
    %394 = vector.shape_cast %391 : vector<2x8x8xf32> to vector<2x1x8x8xf32>
    tpu.vector_store %arg11[%c0_320, %c5_321, %c0_322, %c0_323], %394 {strides = array<i32>} : memref<2x8x8x8xf32, #tpu.memory_space<vmem>>, vector<2x1x8x8xf32>,
    %395 = vector.extract_strided_slice %364 {offsets = [0, 48], sizes = [16, 8], strides = [1, 1]} : vector<16x64xf32> to vector<16x8xf32>
    %396 = vector.shape_cast %395 : vector<16x8xf32> to vector<2x8x8xf32>
    %c0_324 = arith.constant 0 : index
    %c6_325 = arith.constant 6 : index
    %c0_326 = arith.constant 0 : index
    %c0_327 = arith.constant 0 : index
    %397 = vector.load %arg11[%c0_324, %c6_325, %c0_326, %c0_327] : memref<2x8x8x8xf32, #tpu.memory_space<vmem>>, vector<2x1x8x8xf32>
    %398 = vector.shape_cast %397 : vector<2x1x8x8xf32> to vector<2x8x8xf32>
    %399 = vector.shape_cast %396 : vector<2x8x8xf32> to vector<2x1x8x8xf32>
    tpu.vector_store %arg11[%c0_324, %c6_325, %c0_326, %c0_327], %399 {strides = array<i32>} : memref<2x8x8x8xf32, #tpu.memory_space<vmem>>, vector<2x1x8x8xf32>,
    %400 = vector.extract_strided_slice %364 {offsets = [0, 56], sizes = [16, 8], strides = [1, 1]} : vector<16x64xf32> to vector<16x8xf32>
    %401 = vector.shape_cast %400 : vector<16x8xf32> to vector<2x8x8xf32>
    %c0_328 = arith.constant 0 : index
    %c7_329 = arith.constant 7 : index
    %c0_330 = arith.constant 0 : index
    %c0_331 = arith.constant 0 : index
    %402 = vector.load %arg11[%c0_328, %c7_329, %c0_330, %c0_331] : memref<2x8x8x8xf32, #tpu.memory_space<vmem>>, vector<2x1x8x8xf32>
    %403 = vector.shape_cast %402 : vector<2x1x8x8xf32> to vector<2x8x8xf32>
    %404 = vector.shape_cast %401 : vector<2x8x8xf32> to vector<2x1x8x8xf32>
    tpu.vector_store %arg11[%c0_328, %c7_329, %c0_330, %c0_331], %404 {strides = array<i32>} : memref<2x8x8x8xf32, #tpu.memory_space<vmem>>, vector<2x1x8x8xf32>,
    return
  }
}

</mosaic_0001>

<bundles_post_ra>
// kernel: block_forward.1
= control target key start
LH: loop header
LB: loop body
LE: loop exit
PB: predicated region body
PF: predicated region fallthrough
CT: control target
= control target key end

     0   :  { %16 = vsyncpa [#allocation6], 0  ;;  %s4422_s0 = inlined_call_operand.hbm [shape: f32[2,4,16,16], index: 0, kind: input, shape index: {}]   ;;  %s4423_s1 = inlined_call_operand.vmem [shape: f32[36], index: 1, kind: input, shape index: {}]   ;;  %s4424_s2 = inlined_call_operand.hbm [shape: f32[4,16,128], index: 2, kind: input, shape index: {}]   ;;  %s4425_s3 = inlined_call_operand.hbm [shape: f32[1,128], index: 3, kind: input, shape index: {}]   ;;  %s4426_s4 = inlined_call_operand.hbm [shape: f32[9,128], index: 4, kind: input, shape index: {}]   ;;  %s4427_s5 = inlined_call_operand.hbm [shape: f32[128,128], index: 5, kind: input, shape index: {}]   ;;  %s4428_s6 = inlined_call_operand.hbm [shape: f32[1,128], index: 6, kind: input, shape index: {}]   ;;  %s4429_s7 = inlined_call_operand.hbm [shape: f32[128,64], index: 7, kind: input, shape index: {}]   ;;  %s4430_s8 = inlined_call_operand.hbm [shape: f32[16,32], index: 8, kind: input, shape index: {}]   ;;  %s4431_s9 = inlined_call_operand.hbm [shape: f32[4,16,64], index: 9, kind: input, shape index: {}]   ;;  %s4432_s10 = inlined_call_operand.hbm [shape: f32[1,64], index: 10, kind: input, shape index: {}]   ;;  %s4433_s11 = inlined_call_operand.hbm [shape: f32[2,8,8,8], index: 11, kind: output, shape index: {}]  }
   0x1   :  { %17 = vsyncpa [#allocation8], 0 }
   0x2   :  { %18 = vsyncpa [#allocation11], 0 }
   0x3   :  { %19 = vsyncpa [#allocation14], 0 }
   0x4   :  { %20 = vsyncpa [#allocation17], 0 }
   0x5   :  { %21 = vsyncpa [#allocation20], 0 }
   0x6   :  { %22 = vsyncpa [#allocation23], 0 }
   0x7   :  { %23 = vsyncpa [#allocation7], 0  ;;  %s50_s19 = sshll.u32 %s4424_s2, 4  ;;  %s3045_s20 = smov [#allocation10]   ;;  %s51_s19 = int_to_ptr.hbm [resolvable:$true] %s50_s19 }
   0x8   :  { %s52_s21 = sshll.u32 %s3045_s20, 4  ;;  %s74_s24 = sshll.u32 %s4426_s4, 4  ;;  %s53_s21 = int_to_ptr.vmem [resolvable:$true] %s52_s21  ;;  %s75_s24 = int_to_ptr.hbm [resolvable:$true] %s74_s24 }
   0x9   :  { %s3046_s25 = smov 128   ;;  %s3047_s26 = smov 8  }
   0xa   :  { %58 = dma.hbm_to_vmem [thread:$0]  %s51_s19, 1024, %s53_s21, [#allocation11], %s3046_s25, %s3046_s25, %s3047_s26  }
   0xb   :  { %s3048_s27 = smov [#allocation13]   ;;  %s101_s2 = sshll.u32 %s4428_s6, 4  ;;  %s102_s2 = int_to_ptr.hbm [resolvable:$true] %s101_s2 }
   0xc   :  { %s76_s28 = sshll.u32 %s3048_s27, 4  ;;  %s124_s13 = sshll.u32 %s4430_s8, 4  ;;  %s77_s28 = int_to_ptr.vmem [resolvable:$true] %s76_s28  ;;  %s125_s13 = int_to_ptr.hbm [resolvable:$true] %s124_s13 }
   0xd   :  { %82 = dma.hbm_to_vmem [thread:$0]  %s75_s24, 256, %s77_s28, [#allocation14], %s3046_s25, %s3046_s25, %s3047_s26  }
   0xe   :  { %s3049_s14 = smov [#allocation16]   ;;  %s3050_s16 = smov [#allocation19]  }
   0xf   :  { %s103_s15 = sshll.u32 %s3049_s14, 4  ;;  %s126_s17 = sshll.u32 %s3050_s16, 4  ;;  %s104_s15 = int_to_ptr.vmem [resolvable:$true] %s103_s15  ;;  %s127_s17 = int_to_ptr.vmem [resolvable:$true] %s126_s17 }
  0x10   :  { %106 = dma.hbm_to_vmem [thread:$0]  %s102_s2, 16, %s104_s15, [#allocation17]  }
  0x11   :  { %s28_s6 = sshll.u32 %s4422_s0, 4  ;;  %s42_s8 = sshll.u32 %s4423_s1, 4  ;;  %s29_s6 = int_to_ptr.hbm [resolvable:$true] %s28_s6  ;;  %s43_s8 = int_to_ptr.vmem [resolvable:$true] %s42_s8 }
  0x12   :  { %132 = dma.hbm_to_vmem [thread:$0]  %s125_s13, 256, %s127_s17, [#allocation20], %s3046_s25, %s3046_s25, %s3047_s26  }
  0x13   :  { %s3051_s22 = smov [#allocation5]   ;;  %s3052_s24 = smov [#allocation9]  }
  0x14   :  { %s30_s23 = sshll.u32 %s3051_s22, 4  ;;  %s64_s28 = sshll.u32 %s4425_s3, 4  ;;  %s31_s23 = int_to_ptr.vmem [resolvable:$true] %s30_s23  ;;  %s65_s28 = int_to_ptr.hbm [resolvable:$true] %s64_s28 }
  0x15   :  { %36 = dma.hbm_to_vmem [thread:$0]  %s29_s6, 2048, %s31_s23, [#allocation6], %s3046_s25, %s3046_s25, %s3047_s26  }
  0x16   :  { %45 = dma.vmem_to_smem %s43_s8, 16, %s3052_s24, [#allocation8]  }
  0x17   :  { %s3053_s29 = smov [#allocation12]   ;;  %s87_s4 = sshll.u32 %s4427_s5, 4  ;;  %s88_s4 = int_to_ptr.hbm [resolvable:$true] %s87_s4 }
  0x18   :  { %s66_s30 = sshll.u32 %s3053_s29, 4  ;;  %s3054_s12 = smov [#allocation15]   ;;  %s67_s30 = int_to_ptr.vmem [resolvable:$true] %s66_s30 }
  0x19   :  { %69 = dma.hbm_to_vmem [thread:$0]  %s65_s28, 16, %s67_s30, [#allocation11]  }
  0x1a   :  { %s89_s13 = sshll.u32 %s3054_s12, 4  ;;  %s111_s16 = sshll.u32 %s4429_s7, 4  ;;  %s90_s13 = int_to_ptr.vmem [resolvable:$true] %s89_s13  ;;  %s112_s16 = int_to_ptr.hbm [resolvable:$true] %s111_s16 }
  0x1b   :  { %95 = dma.hbm_to_vmem [thread:$0]  %s88_s4, 2048, %s90_s13, [#allocation14], %s3046_s25, %s3046_s25, %s3047_s26  }
  0x1c   :  { %s137_s18 = sshll.u32 %s4431_s9, 4  ;;  %s3055_s19 = smov [#allocation18]   ;;  %s138_s18 = int_to_ptr.hbm [resolvable:$true] %s137_s18 }
  0x1d   :  { %s113_s5 = sshll.u32 %s3055_s19, 4  ;;  %s3056_s6 = smov [#allocation21]   ;;  %s114_s5 = int_to_ptr.vmem [resolvable:$true] %s113_s5 }
  0x1e   :  { %119 = dma.hbm_to_vmem [thread:$0]  %s112_s16, 2048, %s114_s5, [#allocation17], %s3046_s25, %s3046_s25, %s3047_s26  }
  0x1f   :  { %s139_s7 = sshll.u32 %s3056_s6, 4  ;;  %s151_s8 = sshll.u32 %s4432_s10, 4  ;;  %s140_s7 = int_to_ptr.vmem [resolvable:$true] %s139_s7  ;;  %s152_s8 = int_to_ptr.hbm [resolvable:$true] %s151_s8 }
  0x20   :  { %145 = dma.hbm_to_vmem [thread:$0]  %s138_s18, 1024, %s140_s7, [#allocation20], %s3046_s25, %s3046_s25, %s3047_s26  }
  0x21   :  { %s3057_s9 = smov [#allocation22]  }
  0x22   :  { %s153_s22 = sshll.u32 %s3057_s9, 4  ;;  %s154_s22 = int_to_ptr.vmem [resolvable:$true] %s153_s22 }
  0x23   :  { %156 = dma.hbm_to_vmem [thread:$0]  %s152_s8, 16, %s154_s22, [#allocation23]  }
  0x24   :  { %3029 = dma.done.wait [#allocation6], 2048  }
  0x25   :  { %3030 = vsyncadd [#allocation6], 4294965248 }
  0x26   :  { %3031 = dma.done.wait [#allocation8], 16  }
  0x27   :  { %3032 = vsyncadd [#allocation8], 4294967280 }
  0x28   :  { %3033 = dma.done.wait [#allocation11], 1040  }
  0x29   :  { %3034 = vsyncadd [#allocation11], 4294966256 }
  0x2a   :  { %3035 = dma.done.wait [#allocation14], 2304  }
  0x2b   :  { %3036 = vsyncadd [#allocation14], 4294964992 }
  0x2c   :  { %3037 = dma.done.wait [#allocation17], 2064  }
  0x2d   :  { %3038 = vsyncadd [#allocation17], 4294965232 }
  0x2e   :  { %3039 = dma.done.wait [#allocation20], 1280  }
  0x2f   :  { %3040 = vsyncadd [#allocation20], 4294966016 }
  0x30   :  { %3041 = dma.done.wait [#allocation23], 16  }
  0x31   :  { %3042 = vsyncadd [#allocation23], 4294967280 }
  0x32   :  { %201 = sfence }
  0x33   :  { %v210_v0 = vld [vmem:[#allocation5] sm:$0xff]  ;;  %v440_v1 = vld [vmem:[#allocation5 + $0x10] sm:$0xff]  ;;  %s3058_s10 = smov 1   ;;  %v211_v6 = vld [vmem:[#allocation5 + $0x8] sm:$0xff]  ;;  %vm202_vm0 = vcmask 146432   ;;  %v4434_v30 = vmov 0.0  }
  0x34   :  { %v214_v2 = vmax.f32 %v210_v0, 0.0  ;;  %v444_v3 = vmax.f32 %v440_v1, 0.0  ;;  %v212_v4 = vld [vmem:[#allocation5 + $0x40] sm:$0xff]  ;;  %v441_v7 = vld [vmem:[#allocation5 + $0x18] sm:$0xff]  ;;  %v213_v8 = vld [vmem:[#allocation5 + $0x48] sm:$0xff]  ;;  %v215_v9 = vmax.f32 %v211_v6, 0.0 }
  0x35   :  { %v216_v5 = vmax.f32 %v212_v4, 0.0  ;;  %v445_v10 = vmax.f32 %v441_v7, 0.0  ;;  %v217_v11 = vmax.f32 %v213_v8, 0.0  ;;  %v754_v12 = vld [vmem:[#allocation5 + $0x28] sm:$0xff]  ;;  %v753_v13 = vld [vmem:[#allocation5 + $0x20] sm:$0xff]  ;;  %v442_v14 = vld [vmem:[#allocation5 + $0x50] sm:$0xff] }
  0x36   :  { %222 = vrot.lane.b32.xlu0 %v214_v2, %s3058_s10  ;;  %452 = vrot.lane.b32.xlu1 %v444_v3, %s3058_s10  ;;  %v758_v15 = vmax.f32 %v754_v12, 0.0  ;;  %v757_v16 = vmax.f32 %v753_v13, 0.0  ;;  %v446_v17 = vmax.f32 %v442_v14, 0.0  ;;  %v443_v18 = vld [vmem:[#allocation5 + $0x58] sm:$0xff]  ;;  %v1028_v19 = vld [vmem:[#allocation5 + $0x30] sm:$0xff]  ;;  %v755_v20 = vld [vmem:[#allocation5 + $0x60] sm:$0xff] }
  0x37   :  { %226 = vrot.lane.b32.xlu2 %v216_v5, %s3058_s10  ;;  %v447_v21 = vmax.f32 %v443_v18, 0.0  ;;  %v1032_v22 = vmax.f32 %v1028_v19, 0.0  ;;  %v759_v23 = vmax.f32 %v755_v20, 0.0  ;;  %v756_v24 = vld [vmem:[#allocation5 + $0x68] sm:$0xff]  ;;  %v1029_v25 = vld [vmem:[#allocation5 + $0x38] sm:$0xff]  ;;  %203 = vst.msk [vmem:[#allocation2] sm:$0xff] %vm202_vm0, %v4434_v30 }
  0x38   :  { %v760_v26 = vmax.f32 %v756_v24, 0.0  ;;  %v1033_v27 = vmax.f32 %v1029_v25, 0.0  ;;  %v1031_v28 = vld [vmem:[#allocation5 + $0x78] sm:$0xff]  ;;  %204 = vst.msk [vmem:[#allocation2 + $0x8] sm:$0xff] %vm202_vm0, %v4434_v30  ;;  %vm205_vm1 = vcmask 140288   ;;  %v1030_v31 = vld [vmem:[#allocation5 + $0x70] sm:$0xff] }
  0x39   :  { %v1035_v29 = vmax.f32 %v1031_v28, 0.0  ;;  %207 = vst.msk [vmem:[#allocation2 + $0x18] sm:$0xff] %vm202_vm0, %v4434_v30  ;;  %v1034_v32 = vmax.f32 %v1030_v31, 0.0  ;;  %vm234_vm2 = vcmask 138248   ;;  %s2493_s23 = sld [smem:[#allocation9 + $0x4]]  ;;  %s3060_s4 = smov 127  }
  0x3a   :  { %208 = vst.msk [vmem:[#allocation2 + $0x20] sm:$0xff] %vm202_vm0, %v4434_v30  ;;  %s2496_s24 = sld [smem:[#allocation9 + $0x10]]  ;;  %s3061_s17 = smov 126   ;;  %vm669_vm3 = vcmask 130048   ;;  %vm1331_vm4 = vcmask 1040384   ;;  %vm1315_vm5 = vcmask 123904  }
  0x3b   :  { %1310 = vst [vmem:[#allocation3] sm:$0xff] %v4434_v30  ;;  %s2497_s0 = sld [smem:[#allocation9 + $0x14]]  ;;  %vm1356_vm6 = vcmask 1047617   ;;  %vm1358_vm7 = vcmask 64513   ;;  %vm1364_vm8 = vcmask 1040448   ;;  %vm1366_vm9 = vcmask 57344  }
  0x3c   :  { %1312 = vst [vmem:[#allocation3 + $0x10] sm:$0xff] %v4434_v30  ;;  %s2499_s27 = sld [smem:[#allocation9 + $0x1c]]  ;;  %vm1360_vm10 = vcmask 1047616   ;;  %vm1362_vm11 = vcmask 64512   ;;  %vm1488_vm12 = vcmask 1046528   ;;  %vm1625_vm13 = vcmask 1045504  }
  0x3d   :  { %1314 = vst [vmem:[#allocation3 + $0x20] sm:$0x3] %v4434_v30  ;;  %s2495_s28 = sld [smem:[#allocation9 + $0xc]]  ;;  %vm1418_vm14 = vcmask 982016   ;;  %vm1453_vm15 = vcmask 916480   ;;  %vm2371_vm0 = vcmask 261120  }
  0x3e   :  { %224 = vrot.lane.b32.xlu0 %v215_v9, %s3058_s10  ;;  %454 = vrot.lane.b32.xlu1 %v445_v10, %s3058_s10  ;;  %1317 = vst [vmem:[#allocation3 + $0x30] sm:$0xff] %v4434_v30  ;;  %s2494_s29 = sld [smem:[#allocation9 + $0x8]] }
  0x3f   :  { %228 = vrot.lane.b32.xlu2 %v217_v11, %s3058_s10  ;;  %1319 = vst [vmem:[#allocation3 + $0x40] sm:$0xff] %v4434_v30  ;;  %v3216_v36 = vstv %s2493_s23  ;;  %s2500_s30 = sld [smem:[#allocation9 + $0x20]] }
  0x40   :  { %1321 = vst [vmem:[#allocation3 + $0x50] sm:$0x3] %v4434_v30  ;;  %s239_s2 = sld [smem:[#allocation9]]  ;;  %v3223_v42 = vstv %s2496_s24 }
  0x41   :  { %206 = vst.msk [vmem:[#allocation2 + $0x10] sm:$0x3] %vm205_vm1, %v4434_v30  ;;  %s2498_s1 = sld [smem:[#allocation9 + $0x18]]  ;;  %v3225_v43 = vstv %s2497_s0 }
  0x42   :  { %209 = vst.msk [vmem:[#allocation2 + $0x28] sm:$0x3] %vm205_vm1, %v4434_v30  ;;  %v3236_v47 = vstv %s2499_s27  ;;  %s3238_s12 = sld [smem:[#allocation9 + $0x5]] }
  0x43   :  { %v3234_v46 = vstv %s2495_s28  ;;  %4462 = vst [vmem:[#allocation33_spill] sm:$0xff] %v3236_v47  ;;  %s3247_s13 = sld [smem:[#allocation9 + $0x15]] }
  0x44   :  { %v3243_v49 = vstv %s2494_s29  ;;  %s3255_s14 = sld [smem:[#allocation9 + $0x1d]] }
  0x45   :  { %v3253_v55 = vstv %s2500_s30  ;;  %s2501_s15 = sld [smem:[#allocation9 + $0x1]] }
  0x46   :  { %767 = vrot.lane.b32.xlu1 %v758_v15, %s3058_s10  ;;  %765 = vrot.lane.b32.xlu0 %v757_v16, %s3058_s10  ;;  %4464 = vst [vmem:[#allocation35_spill] sm:$0xff] %v3253_v55  ;;  %v3261_v59 = vstv %s239_s2  ;;  %s3268_s16 = sld [smem:[#allocation9 + $0x21]] }
  0x47   :  { %456 = vrot.lane.b32.xlu2 %v446_v17, %s3058_s10  ;;  %4465 = vst [vmem:[#allocation36_spill] sm:$0xff] %v3261_v59  ;;  %v3263_v60 = vstv %s2498_s1  ;;  %s3279_s3 = sld [smem:[#allocation9 + $0xd]] }
  0x48   :  { %s3288_s18 = sld [smem:[#allocation9 + $0x19]]  ;;  %v3309_v14 = vstv %s3238_s12 }
  0x49   :  { %v3312_v15 = vstv %s3247_s13  ;;  %s2503_s19 = sld [smem:[#allocation9 + $0x9]]  ;;  %s3063_s13 = smov 112  }
  0x4a   :  { %v3320_v17 = vstv %s3255_s14  ;;  %s2526_s5 = sld [smem:[#allocation9 + $0x22]]  ;;  %s3065_s14 = smov 104  }
  0x4b   :  { %v3304_v12 = vstv %s2501_s15  ;;  %s2505_s6 = sld [smem:[#allocation9 + $0x11]]  ;;  %s3066_s15 = smov 96  }
  0x4c   :  { %v3324_v18 = vstv %s3268_s16  ;;  %s3420_s7 = sld [smem:[#allocation9 + $0x12]]  ;;  %s3067_s16 = smov 80  }
  0x4d   :  { %v3338_v24 = vstv %s3279_s3  ;;  %s3423_s20 = sld [smem:[#allocation9 + $0x6]]  ;;  %s3068_s3 = smov 88  }
  0x4e   :  { %458 = vrot.lane.b32.xlu0 %v447_v21, %s3058_s10  ;;  %1040 = vrot.lane.b32.xlu1 %v1032_v22, %s3058_s10  ;;  %s3428_s21 = sld [smem:[#allocation9 + $0xa]] }
  0x4f   :  { %769 = vrot.lane.b32.xlu2 %v759_v23, %s3058_s10  ;;  %s3431_s8 = sld [smem:[#allocation9 + $0x16]] }
  0x50   :  { %s3438_s9 = sld [smem:[#allocation9 + $0x1e]] }
  0x51   :  { %s2518_s22 = sld [smem:[#allocation9 + $0x2]] }
  0x52   :  { %s2524_s23 = sld [smem:[#allocation9 + $0x1a]] }
  0x53   :  { %s2532_s24 = sld [smem:[#allocation9 + $0x7]] }
  0x54   :  { %s2531_s0 = sld [smem:[#allocation9 + $0x3]] }
  0x55   :  { %s2534_s27 = sld [smem:[#allocation9 + $0xf]] }
  0x56   :  { %771 = vrot.lane.b32.xlu0 %v760_v26, %s3058_s10  ;;  %1042 = vrot.lane.b32.xlu1 %v1033_v27, %s3058_s10  ;;  %v3348_v27 = vstv %s3288_s18  ;;  %s2537_s28 = sld [smem:[#allocation9 + $0x1b]]  ;;  %s3070_s18 = smov [#allocation24]  }
  0x57   :  { %1044 = vrot.lane.b32.xlu2 %v1034_v32, %s3058_s10  ;;  %s2533_s29 = sld [smem:[#allocation9 + $0xb]] }
  0x58   :  { %s2538_s30 = sld [smem:[#allocation9 + $0x1f]] }
  0x59   :  { %s2535_s2 = sld [smem:[#allocation9 + $0x13]] }
  0x5a   :  { %s2536_s1 = sld [smem:[#allocation9 + $0x17]] }
  0x5b   :  { %s2539_s12 = sld [smem:[#allocation9 + $0x23]] }
  0x5e   :  { %1046 = vrot.lane.b32.xlu0 %v1035_v29, %s3058_s10  ;;  %s2521_s10 = sld [smem:[#allocation9 + $0xe]] }
  0x91   :  { %v227_v33 = vpop.permute.xlu2 %226 }
  0x92   :  { %237 = vst.msk [vmem:[#allocation2 + $0x19] sm:$0xff] %vm234_vm2, %v227_v33 }
  0x99   :  { %v229_v34 = vpop.permute.xlu2 %228  ;;  %v308_v41 = vld [vmem:[#allocation2 + $0x19] sm:$0xff] }
  0x9a   :  { %238 = vst.msk [vmem:[#allocation2 + $0x21] sm:$0xff] %vm234_vm2, %v229_v34  ;;  %v3229_v44 = vmul.f32 %v3223_v42, %v308_v41  ;;  %v3232_v45 = vmul.f32 %v3225_v43, %v308_v41  ;;  %v3241_v48 = vmul.f32 %v3234_v46, %v308_v41  ;;  %v3331_v20 = vld [vmem:[#allocation2 + $0x18] sm:$0xff] }
  0x9c   :  { %4463 = vst [vmem:[#allocation34_spill] sm:$0xff] %v3241_v48 }
  0xa1   :  { %v457_v21 = vpop.permute.xlu2 %456  ;;  %v3333_v22 = vld [vmem:[#allocation2 + $0x20] sm:$0xff] }
  0xa2   :  { %v3335_v23 = vld [vmem:[#allocation2 + $0x1a] sm:$0xff]  ;;  %v375_v41 = vld [vmem:[#allocation2 + $0x22] sm:$0xff] }
  0xa3   :  { %4466 = vst [vmem:[#allocation37_spill] sm:$0xff] %v3335_v23  ;;  %v3415_v48 = vmul.f32 %v3263_v60, %v375_v41 }
  0xa4   :  { %466 = vst.msk [vmem:[#allocation2 + $0x19] sm:$0xff] %vm234_vm2, %v457_v21 }
  0xa5   :  { %4474 = vst [vmem:[#allocation45_spill] sm:$0xff] %v3415_v48 }
  0xa8   :  { %v223_v35 = vpop.permute.xlu0 %222  ;;  %v453_v37 = vpop.permute.xlu1 %452 }
  0xa9   :  { %235 = vst.msk [vmem:[#allocation2 + $0x1] sm:$0xff] %vm234_vm2, %v223_v35  ;;  %v509_v35 = vstv %s2503_s19  ;;  %s2472_s19 = sshll.u32 %s3070_s18, 4  ;;  %s2473_s19 = int_to_ptr.vmem [resolvable:$true] %s2472_s19 }
  0xb0   :  { %v225_v38 = vpop.permute.xlu0 %224  ;;  %v3218_v39 = vld [vmem:[#allocation2] sm:$0xff]  ;;  %v455_v51 = vpop.permute.xlu1 %454 }
  0xb1   :  { %236 = vst.msk [vmem:[#allocation2 + $0x9] sm:$0xff] %vm234_vm2, %v225_v38  ;;  %v255_v40 = vmul.f32 %v3216_v36, %v3218_v39  ;;  %v3245_v50 = vld [vmem:[#allocation2 + $0x1] sm:$0xff]  ;;  %v281_v61 = vmul.f32 %v3243_v49, %v3218_v39 }
  0xb2   :  { %v321_v13 = vmul.f32 %v3223_v42, %v3245_v50  ;;  %v347_v34 = vmul.f32 %v3225_v43, %v3245_v50 }
  0xb3   :  { %263 = vrot.lane.b32.xlu1 %v255_v40, %s3060_s4  ;;  %v309_v40 = vld [vmem:[#allocation2 + $0x21] sm:$0xff] }
  0xb4   :  { %v3398_v21 = vmul.f32 %v3223_v42, %v309_v40 }
  0xb6   :  { %4469 = vst [vmem:[#allocation40_spill] sm:$0xff] %v3398_v21 }
  0xb8   :  { %v3249_v52 = vld [vmem:[#allocation2 + $0x2] sm:$0xff]  ;;  %v373_v58 = vld [vmem:[#allocation2 + $0xa] sm:$0xff]  ;;  %v766_v3 = vpop.permute.xlu0 %765  ;;  %v768_v6 = vpop.permute.xlu1 %767 }
  0xb9   :  { %v241_v53 = vld [vmem:[#allocation2 + $0x8] sm:$0xff]  ;;  %v387_v56 = vmul.f32 %v3236_v47, %v3249_v52  ;;  %v3282_v0 = vmul.f32 %v3236_v47, %v373_v58  ;;  %v3285_v1 = vmul.f32 %v3253_v55, %v373_v58  ;;  %v3291_v2 = vmul.f32 %v3263_v60, %v373_v58 }
  0xba   :  { %v3251_v54 = vld [vmem:[#allocation2 + $0x9] sm:$0xff]  ;;  %v256_v57 = vmul.f32 %v3216_v36, %v241_v53  ;;  %464 = vst.msk [vmem:[#allocation2 + $0x1] sm:$0xff] %vm234_vm2, %v453_v37  ;;  %v3271_v62 = vmul.f32 %v3261_v59, %v241_v53  ;;  %v282_v8 = vmul.f32 %v3243_v49, %v241_v53  ;;  %v413_v33 = vmul.f32 %v3253_v55, %v3249_v52 }
  0xbb   :  { %465 = vst.msk [vmem:[#allocation2 + $0x9] sm:$0xff] %vm234_vm2, %v455_v51  ;;  %v3275_v63 = vmul.f32 %v3234_v46, %v3251_v54  ;;  %395 = vrot.lane.b32.xlu2 %v387_v56, %s3060_s4  ;;  %289 = vrot.lane.b32.xlu1 %v281_v61, %s3061_s17  ;;  %v322_v7 = vmul.f32 %v3223_v42, %v3251_v54 }
  0xbc   :  { %265 = vrot.lane.b32.xlu0 %v256_v57, %s3060_s4  ;;  %v257_v58 = vmul.f32 %v3216_v36, %v3331_v20 }
  0xc0   :  { %v459_v38 = vpop.permute.xlu0 %458  ;;  %v1041_v51 = vpop.permute.xlu1 %1040 }
  0xc1   :  { %v3293_v4 = vld [vmem:[#allocation2] sm:$0xff]  ;;  %467 = vst.msk [vmem:[#allocation2 + $0x21] sm:$0xff] %vm234_vm2, %v459_v38 }
  0xc2   :  { %v3295_v5 = vld [vmem:[#allocation2 + $0x1] sm:$0xff]  ;;  %v602_v9 = vld [vmem:[#allocation2 + $0xa] sm:$0xff]  ;;  %v484_v32 = vmul.f32 %v3309_v14, %v3293_v4  ;;  %v510_v61 = vmul.f32 %v509_v35, %v3293_v4 }
  0xc3   :  { %v3300_v10 = vld [vmem:[#allocation2 + $0x8] sm:$0xff]  ;;  %331 = vrot.lane.b32.xlu2 %v322_v7, %s3060_s4  ;;  %329 = vrot.lane.b32.xlu1 %v321_v13, %s3060_s4  ;;  %v3345_v26 = vmul.f32 %v3320_v17, %v602_v9  ;;  %v3356_v29 = vmul.f32 %v3324_v18, %v602_v9  ;;  %v3359_v31 = vmul.f32 %v3348_v27, %v602_v9  ;;  %v537_v7 = vld [vmem:[#allocation2 + $0x19] sm:$0xff] }
  0xc4   :  { %v3302_v11 = vld [vmem:[#allocation2 + $0x2] sm:$0xff]  ;;  %291 = vrot.lane.b32.xlu0 %v282_v8, %s3061_s17  ;;  %v3342_v25 = vmul.f32 %v3304_v12, %v3300_v10  ;;  %v3387_v8 = vstv %s2526_s5  ;;  %v3391_v9 = vld [vmem:[#allocation2 + $0x18] sm:$0xff] }
  0xc5   :  { %777 = vst.msk [vmem:[#allocation2 + $0x1] sm:$0xff] %vm234_vm2, %v766_v3  ;;  %v3315_v16 = vld [vmem:[#allocation2 + $0x9] sm:$0xff] }
  0xc6   :  { %778 = vst.msk [vmem:[#allocation2 + $0x9] sm:$0xff] %vm234_vm2, %v768_v6  ;;  %v3328_v19 = vmul.f32 %v3312_v15, %v3315_v16  ;;  %v3353_v28 = vmul.f32 %v3338_v24, %v3315_v16  ;;  %v348_v6 = vmul.f32 %v3225_v43, %v3251_v54 }
  0xc7   :  { %4467 = vst [vmem:[#allocation38_spill] sm:$0xff] %v3359_v31  ;;  %v549_v31 = vstv %s2505_s6 }
  0xc8   :  { %v538_v54 = vld [vmem:[#allocation2 + $0x21] sm:$0xff]  ;;  %v772_v38 = vpop.permute.xlu0 %771  ;;  %v1043_v42 = vpop.permute.xlu1 %1042  ;;  %v3444_v48 = vmul.f32 %v549_v31, %v537_v7 }
  0xc9   :  { %v604_v30 = vld [vmem:[#allocation2 + $0x22] sm:$0xff] }
  0xcb   :  { %492 = vrot.lane.b32.xlu2 %v484_v32, %s3060_s4  ;;  %355 = vrot.lane.b32.xlu1 %v347_v34, %s3061_s17  ;;  %v472_v32 = vld [vmem:[#allocation2 + $0x20] sm:$0xff]  ;;  %v770_v34 = vpop.permute.xlu2 %769 }
  0xcc   :  { %421 = vrot.lane.b32.xlu0 %v413_v33, %s3061_s17  ;;  %v3370_v37 = vld [vmem:[#allocation2 + $0x1] sm:$0xff] }
  0xcd   :  { %v3372_v53 = vld [vmem:[#allocation2] sm:$0xff]  ;;  %v3375_v56 = vld [vmem:[#allocation2 + $0x8] sm:$0xff] }
  0xce   :  { %v3377_v57 = vld [vmem:[#allocation2 + $0x2] sm:$0xff]  ;;  %v3383_v3 = vld [vmem:[#allocation2 + $0xa] sm:$0xff]  ;;  %v603_v33 = vld [vmem:[#allocation2 + $0x1a] sm:$0xff] }
  0xcf   :  { %4468 = vst [vmem:[#allocation39_spill] sm:$0xff] %v3377_v57  ;;  %v3395_v13 = vmul.f32 %v3387_v8, %v3383_v3 }
  0xd0   :  { %1052 = vst.msk [vmem:[#allocation2 + $0x1] sm:$0xff] %vm234_vm2, %v1041_v51  ;;  %v3402_v51 = vmul.f32 %v3225_v43, %v309_v40  ;;  %v3418_v43 = vld [vmem:[#allocation2 + $0x9] sm:$0xff] }
  0xd1   :  { %779 = vst.msk [vmem:[#allocation2 + $0x19] sm:$0xff] %vm234_vm2, %v770_v34  ;;  %v576_v34 = vmul.f32 %v3312_v15, %v3295_v5 }
  0xd2   :  { %4470 = vst [vmem:[#allocation41_spill] sm:$0xff] %v3402_v51  ;;  %v3461_v51 = vmul.f32 %v3324_v18, %v603_v33 }
  0xd3   :  { %518 = vrot.lane.b32.xlu2 %v510_v61, %s3061_s17  ;;  %357 = vrot.lane.b32.xlu1 %v348_v6, %s3061_s17  ;;  %v3408_v61 = vmul.f32 %v3253_v55, %v375_v41  ;;  %v3412_v6 = vmul.f32 %v3234_v46, %v309_v40  ;;  %780 = vst.msk [vmem:[#allocation2 + $0x21] sm:$0xff] %vm234_vm2, %v772_v38 }
  0xd4   :  { %267 = vrot.lane.b32.xlu0 %v257_v58, %s3060_s4  ;;  %v3405_v58 = vmul.f32 %v3236_v47, %v375_v41  ;;  %4475 = vst [vmem:[#allocation46_spill] sm:$0xff] %v3418_v43  ;;  %v550_v40 = vmul.f32 %v549_v31, %v3295_v5  ;;  %v511_v41 = vmul.f32 %v509_v35, %v3300_v10 }
  0xd5   :  { %4472 = vst [vmem:[#allocation43_spill] sm:$0xff] %v3408_v61  ;;  %v3434_v38 = vmul.f32 %v509_v35, %v3391_v9  ;;  %v3451_v61 = vmul.f32 %v3309_v14, %v472_v32  ;;  %v3467_v55 = vmul.f32 %v3320_v17, %v604_v30 }
  0xd6   :  { %4471 = vst [vmem:[#allocation42_spill] sm:$0xff] %v3405_v58  ;;  %v3453_v58 = vmul.f32 %v509_v35, %v472_v32  ;;  %v3470_v35 = vmul.f32 %v3324_v18, %v604_v30 }
  0xd7   :  { %4473 = vst [vmem:[#allocation44_spill] sm:$0xff] %v3412_v6  ;;  %v3447_v6 = vmul.f32 %v3312_v15, %v537_v7 }
  0xd8   :  { %1053 = vst.msk [vmem:[#allocation2 + $0x9] sm:$0xff] %vm234_vm2, %v1043_v42  ;;  %v3442_v42 = vmul.f32 %v3304_v12, %v3391_v9 }
  0xd9   :  { %4477 = vst [vmem:[#allocation48_spill] sm:$0xff] %v3447_v6 }
  0xda   :  { %4476 = vst [vmem:[#allocation47_spill] sm:$0xff] %v3442_v42  ;;  %v3464_v42 = vmul.f32 %v3312_v15, %v538_v54  ;;  %v850_v15 = vld [vmem:[#allocation2 + $0x19] sm:$0xff] }
  0xdb   :  { %558 = vrot.lane.b32.xlu2 %v550_v40, %s3060_s4  ;;  %520 = vrot.lane.b32.xlu1 %v511_v41, %s3061_s17  ;;  %4478 = vst [vmem:[#allocation49_spill] sm:$0xff] %v3451_v61  ;;  %v3458_v40 = vmul.f32 %v549_v31, %v538_v54  ;;  %v3473_v41 = vmul.f32 %v3304_v12, %v472_v32  ;;  %v3534_v61 = vstv %s2524_s23 }
  0xdc   :  { %584 = vrot.lane.b32.xlu0 %v576_v34, %s3061_s17  ;;  %4479 = vst [vmem:[#allocation50_spill] sm:$0xff] %v3453_v58  ;;  %v3456_v34 = vmul.f32 %v3320_v17, %v603_v33  ;;  %v616_v32 = vmul.f32 %v3320_v17, %v3302_v11  ;;  %v3506_v17 = vstv %s3438_s9  ;;  %v3532_v58 = vstv %s2521_s10 }
  0xdd   :  { %4481 = vst [vmem:[#allocation52_spill] sm:$0xff] %v3458_v40  ;;  %v3476_v40 = vmul.f32 %v3338_v24, %v537_v7  ;;  %v485_v7 = vmul.f32 %v3309_v14, %v3300_v10 }
  0xde   :  { %4480 = vst [vmem:[#allocation51_spill] sm:$0xff] %v3456_v34  ;;  %v3519_v34 = vstv %s2518_s22 }
  0xdf   :  { %4482 = vst [vmem:[#allocation53_spill] sm:$0xff] %v3461_v51  ;;  %v3479_v51 = vmul.f32 %v3348_v27, %v603_v33  ;;  %v3493_v33 = vstv %s3420_s7  ;;  %s2474_s7 = sshll.u32 %s4433_s11, 4  ;;  %s2475_s7 = int_to_ptr.hbm [resolvable:$true] %s2474_s7 }
  0xe0   :  { %4483 = vst [vmem:[#allocation54_spill] sm:$0xff] %v3464_v42  ;;  %v3482_v42 = vmul.f32 %v3338_v24, %v538_v54  ;;  %v796_v54 = vstv %s3423_s20 }
  0xe1   :  { %4484 = vst [vmem:[#allocation55_spill] sm:$0xff] %v3467_v55  ;;  %v3485_v55 = vmul.f32 %v3348_v27, %v604_v30  ;;  %v3501_v30 = vmul.f32 %v3493_v33, %v850_v15  ;;  %v797_v47 = vmul.f32 %v796_v54, %v3372_v53 }
  0xe2   :  { %4485 = vst [vmem:[#allocation56_spill] sm:$0xff] %v3470_v35  ;;  %v785_v35 = vld [vmem:[#allocation2 + $0x20] sm:$0xff] }
  0xe3   :  { %4486 = vst [vmem:[#allocation57_spill] sm:$0xff] %v3473_v41  ;;  %v551_v41 = vmul.f32 %v549_v31, %v3315_v16  ;;  %494 = vrot.lane.b32.xlu2 %v485_v7, %s3060_s4  ;;  %v3508_v10 = vmul.f32 %v796_v54, %v785_v35  ;;  %v3540_v6 = vmul.f32 %v3519_v34, %v785_v35 }
  0xe4   :  { %4487 = vst [vmem:[#allocation58_spill] sm:$0xff] %v3476_v40  ;;  %v3498_v40 = vstv %s3431_s8  ;;  %624 = vrot.lane.b32.xlu0 %v616_v32, %s3060_s4  ;;  %v863_v32 = vmul.f32 %v3493_v33, %v3370_v37 }
  0xe5   :  { %4488 = vst [vmem:[#allocation59_spill] sm:$0xff] %v3479_v51  ;;  %v916_v51 = vld [vmem:[#allocation2 + $0x1a] sm:$0xff]  ;;  %v3511_v16 = vmul.f32 %v3498_v40, %v850_v15  ;;  %560 = vrot.lane.b32.xlu1 %v551_v41, %s3060_s4  ;;  %v642_v41 = vmul.f32 %v3324_v18, %v3302_v11  ;;  %v1045_v18 = vpop.permute.xlu2 %1044 }
  0xe6   :  { %4489 = vst [vmem:[#allocation60_spill] sm:$0xff] %v3482_v42  ;;  %v822_v42 = vstv %s3428_s21  ;;  %v3517_v21 = vmul.f32 %v3506_v17, %v916_v51  ;;  %v3528_v23 = vmul.f32 %v3387_v8, %v916_v51 }
  0xe7   :  { %4490 = vst [vmem:[#allocation61_spill] sm:$0xff] %v3485_v55  ;;  %v3513_v31 = vmul.f32 %v822_v42, %v785_v35  ;;  %v784_v55 = vld [vmem:[#allocation2 + $0x18] sm:$0xff]  ;;  %v798_v35 = vmul.f32 %v796_v54, %v3375_v56 }
  0xe8   :  { %4491 = vst [vmem:[#allocation62_spill] sm:$0xff] %v3517_v21  ;;  %v3524_v7 = vmul.f32 %v3519_v34, %v784_v55  ;;  %v3537_v21 = vmul.f32 %v3532_v58, %v850_v15  ;;  %v824_v15 = vmul.f32 %v822_v42, %v3375_v56 }
  0xe9   :  { %4493 = vst [vmem:[#allocation64_spill] sm:$0xff] %v3528_v23  ;;  %v486_v23 = vmul.f32 %v3309_v14, %v3391_v9  ;;  %v929_v14 = vmul.f32 %v3506_v17, %v3377_v57  ;;  %v1047_v9 = vpop.permute.xlu0 %1046 }
  0xea   :  { %4492 = vst [vmem:[#allocation63_spill] sm:$0xff] %v3524_v7  ;;  %v3543_v7 = vmul.f32 %v3534_v61, %v916_v51  ;;  %v851_v51 = vld [vmem:[#allocation2 + $0x21] sm:$0xff] }
  0xeb   :  { %4494 = vst [vmem:[#allocation65_spill] sm:$0xff] %v3534_v61  ;;  %650 = vrot.lane.b32.xlu2 %v642_v41, %s3061_s17  ;;  %v823_v41 = vmul.f32 %v822_v42, %v3372_v53 }
  0xec   :  { %4495 = vst [vmem:[#allocation66_spill] sm:$0xff] %v3537_v21  ;;  %871 = vrot.lane.b32.xlu0 %v863_v32, %s3060_s4  ;;  %v917_v32 = vld [vmem:[#allocation2 + $0x22] sm:$0xff] }
  0xed   :  { %4496 = vst [vmem:[#allocation67_spill] sm:$0xff] %v3540_v6  ;;  %805 = vrot.lane.b32.xlu1 %v797_v47, %s3060_s4  ;;  %v955_v47 = vmul.f32 %v3387_v8, %v3377_v57 }
  0xee   :  { %4497 = vst [vmem:[#allocation68_spill] sm:$0xff] %v3543_v7 }
  0xef   :  { %1054 = vst.msk [vmem:[#allocation2 + $0x19] sm:$0xff] %vm234_vm2, %v1045_v18  ;;  %v3566_v18 = vmul.f32 %v3493_v33, %v851_v51 }
  0xf0   :  { %1055 = vst.msk [vmem:[#allocation2 + $0x21] sm:$0xff] %vm234_vm2, %v1047_v9  ;;  %v889_v9 = vmul.f32 %v3498_v40, %v3370_v37 }
  0xf1   :  { %4498 = vst [vmem:[#allocation69_spill] sm:$0xff] %v3566_v18  ;;  %v864_v18 = vmul.f32 %v3493_v33, %v3418_v43 }
  0xf3   :  { %496 = vrot.lane.b32.xlu2 %v486_v23, %s3060_s4  ;;  %v825_v23 = vmul.f32 %v822_v42, %v784_v55  ;;  %v799_v42 = vmul.f32 %v796_v54, %v784_v55  ;;  %v3600_v54 = vstv %s2531_s0 }
  0xf4   :  { %833 = vrot.lane.b32.xlu0 %v824_v15, %s3061_s17  ;;  %v3569_v15 = vmul.f32 %v3498_v40, %v851_v51  ;;  %4506 = vst [vmem:[#allocation77_spill] sm:$0xff] %v3600_v54 }
  0xf5   :  { %807 = vrot.lane.b32.xlu1 %v798_v35, %s3060_s4  ;;  %v3572_v35 = vmul.f32 %v3387_v8, %v917_v32 }
  0xf6   :  { %4499 = vst [vmem:[#allocation70_spill] sm:$0xff] %v3569_v15  ;;  %v3588_v8 = vld [vmem:[#allocation2 + $0x19] sm:$0xff] }
  0xf7   :  { %4500 = vst [vmem:[#allocation71_spill] sm:$0xff] %v3572_v35  ;;  %v3590_v6 = vld [vmem:[#allocation2 + $0x20] sm:$0xff]  ;;  %v3598_v55 = vld [vmem:[#allocation2 + $0x18] sm:$0xff] }
  0xf8   :  { %v3592_v7 = vld [vmem:[#allocation2 + $0x1a] sm:$0xff]  ;;  %v3641_v33 = vld [vmem:[#allocation2 + $0x22] sm:$0xff] }
  0xf9   :  { %4504 = vst [vmem:[#allocation75_spill] sm:$0xff] %v3592_v7 }
  0xfa   :  { %4516 = vst [vmem:[#allocation87_spill] sm:$0xff] %v3641_v33 }
  0xfb   :  { %831 = vrot.lane.b32.xlu2 %v823_v41, %s3061_s17  ;;  %v3578_v41 = vmul.f32 %v3532_v58, %v851_v51  ;;  %v3594_v51 = vld [vmem:[#allocation2] sm:$0xff] }
  0xfc   :  { %963 = vrot.lane.b32.xlu0 %v955_v47, %s3061_s17  ;;  %v3575_v47 = vmul.f32 %v3506_v17, %v917_v32  ;;  %4505 = vst [vmem:[#allocation76_spill] sm:$0xff] %v3594_v51 }
  0xfd   :  { %937 = vrot.lane.b32.xlu1 %v929_v14, %s3060_s4  ;;  %4502 = vst [vmem:[#allocation73_spill] sm:$0xff] %v3578_v41  ;;  %v3581_v14 = vmul.f32 %v3534_v61, %v917_v32  ;;  %v3596_v32 = vstv %s2532_s24  ;;  %v4521_v61 = vmov 0.0  }
  0xfe   :  { %4501 = vst [vmem:[#allocation72_spill] sm:$0xff] %v3575_v47  ;;  %v3618_v47 = vmul.f32 %v3600_v54, %v3590_v6  ;;  %v1072_v15 = vmul.f32 %v3596_v32, %v3594_v51 }
  0xff   :  { %4503 = vst [vmem:[#allocation74_spill] sm:$0xff] %v3581_v14  ;;  %v3610_v14 = vmul.f32 %v3600_v54, %v3598_v55  ;;  %v3639_v54 = vld [vmem:[#allocation2 + $0x21] sm:$0xff] }
 0x100   :  { %4512 = vst [vmem:[#allocation83_spill] sm:$0xff] %v3618_v47  ;;  %v3633_v47 = vstv %s2533_s29 }
 0x101   :  { %4510 = vst [vmem:[#allocation81_spill] sm:$0xff] %v3610_v14 }
 0x102   :  { %4515 = vst [vmem:[#allocation86_spill] sm:$0xff] %v3639_v54 }
 0x103   :  { %897 = vrot.lane.b32.xlu2 %v889_v9, %s3061_s17  ;;  %v3604_v9 = vld [vmem:[#allocation2 + $0x8] sm:$0xff]  ;;  %1311 = vst.msk [vmem:[#allocation3 + $0x8] sm:$0xff] %vm669_vm3, %v4521_v61 }
 0x104   :  { %835 = vrot.lane.b32.xlu0 %v825_v23, %s3061_s17  ;;  %v3602_v23 = vstv %s2534_s27  ;;  %4508 = vst [vmem:[#allocation79_spill] sm:$0xff] %v3604_v9  ;;  %v1073_v14 = vmul.f32 %v3596_v32, %v3604_v9 }
 0x105   :  { %809 = vrot.lane.b32.xlu1 %v799_v42, %s3060_s4  ;;  %4507 = vst [vmem:[#allocation78_spill] sm:$0xff] %v3602_v23  ;;  %v3606_v42 = vstv %s2537_s28  ;;  %v3614_v41 = vmul.f32 %v3602_v23, %v3588_v8 }
 0x106   :  { %4509 = vst [vmem:[#allocation80_spill] sm:$0xff] %v3606_v42  ;;  %v3622_v35 = vmul.f32 %v3606_v42, %v3592_v7  ;;  %v3653_v21 = vmul.f32 %v3606_v42, %v3641_v33  ;;  %v3681_v33 = vld [vmem:[#allocation2 + $0x9] sm:$0xff]  ;;  %v1074_v42 = vmul.f32 %v3596_v32, %v3598_v55 }
 0x107   :  { %4511 = vst [vmem:[#allocation82_spill] sm:$0xff] %v3614_v41  ;;  %v3637_v41 = vstv %s2538_s30 }
 0x108   :  { %4513 = vst [vmem:[#allocation84_spill] sm:$0xff] %v3622_v35  ;;  %v3635_v35 = vld [vmem:[#allocation2 + $0x2] sm:$0xff] }
 0x109   :  { %4514 = vst [vmem:[#allocation85_spill] sm:$0xff] %v3635_v35  ;;  %v1204_v7 = vmul.f32 %v3637_v41, %v3635_v35 }
 0x10a   :  { %4518 = vst [vmem:[#allocation89_spill] sm:$0xff] %v3653_v21 }
 0x10b   :  { %873 = vrot.lane.b32.xlu2 %v864_v18, %s3060_s4  ;;  %v890_v18 = vmul.f32 %v3498_v40, %v3418_v43  ;;  %v3662_v40 = vld [vmem:[#allocation2 + $0x1] sm:$0xff]  ;;  %v3664_v43 = vstv %s2535_s2  ;;  %4520 = vst [vmem:[#allocation91_spill] sm:$0xff] %v3681_v33 }
 0x10c   :  { %1080 = vrot.lane.b32.xlu0 %v1072_v15, %s3060_s4  ;;  %v1098_v15 = vmul.f32 %v3633_v47, %v3594_v51  ;;  %4519 = vst [vmem:[#allocation90_spill] sm:$0xff] %v3662_v40  ;;  %v1138_v21 = vmul.f32 %v3664_v43, %v3662_v40 }
 0x10d   :  { %1082 = vrot.lane.b32.xlu1 %v1073_v14, %s3060_s4  ;;  %v3649_v14 = vmul.f32 %v3602_v23, %v3639_v54  ;;  %v3668_v54 = vstv %s2539_s12  ;;  %v1139_v23 = vmul.f32 %v3664_v43, %v3681_v33  ;;  %1313 = vst.msk [vmem:[#allocation3 + $0x18] sm:$0xff] %vm669_vm3, %v4521_v61 }
 0x10e   :  { %1318 = vst.msk [vmem:[#allocation3 + $0x38] sm:$0xff] %vm669_vm3, %v4521_v61 }
 0x10f   :  { %4517 = vst [vmem:[#allocation88_spill] sm:$0xff] %v3649_v14  ;;  %v3666_v14 = vstv %s2536_s1 }
 0x110   :  { %v1165_v57 = vmul.f32 %v3666_v14, %v3681_v33  ;;  %1320 = vst.msk [vmem:[#allocation3 + $0x48] sm:$0xff] %vm669_vm3, %v4521_v61  ;;  %v1100_v61 = vmul.f32 %v3633_v47, %v3598_v55  ;;  %v667_v55 = vld [vmem:[#allocation10 + $0x10] sm:$0xff] }
 0x113   :  { %899 = vrot.lane.b32.xlu2 %v890_v18, %s3061_s17  ;;  %v1230_v18 = vmul.f32 %v3668_v54, %v3635_v35 }
 0x114   :  { %1106 = vrot.lane.b32.xlu0 %v1098_v15, %s3061_s17  ;;  %v1164_v15 = vmul.f32 %v3666_v14, %v3662_v40  ;;  %v1099_v40 = vmul.f32 %v3633_v47, %v3604_v9  ;;  %v540_v9 = vmul.f32 %v3338_v24, %v3295_v5 }
 0x115   :  { %1212 = vrot.lane.b32.xlu1 %v1204_v7, %s3060_s4  ;;  %v3660_v51 = vpop.permute.xlu2 %395 }
 0x11b   :  { %1172 = vrot.lane.b32.xlu2 %v1164_v15, %s3061_s17  ;;  %v437_v15 = vld [vmem:[#allocation10] sm:$0xff] }
 0x11c   :  { %1146 = vrot.lane.b32.xlu0 %v1138_v21, %s3060_s4  ;;  %v438_v21 = vld [vmem:[#allocation10 + $0x8] sm:$0xff] }
 0x11d   :  { %1238 = vrot.lane.b32.xlu1 %v1230_v18, %s3061_s17  ;;  %v3679_v7 = vpop.permute.xlu2 %331  ;;  %737 = vmatpush.msra.mxu1 %v438_v21 }
 0x11f   :  { %738 = vmatpush.msra.mxu1 %v437_v15 }
 0x123   :  { %1108 = vrot.lane.b32.xlu2 %v1099_v40, %s3061_s17  ;;  %v245_v40 = vmul.f32 %v3261_v59, %v3218_v39 }
 0x124   :  { %1148 = vrot.lane.b32.xlu0 %v1139_v23, %s3060_s4  ;;  %v474_v23 = vmul.f32 %v3304_v12, %v3293_v4 }
 0x125   :  { %1084 = vrot.lane.b32.xlu1 %v1074_v42, %s3060_s4  ;;  %v493_v18 = vpop.permute.xlu2 %492  ;;  %v264_v35 = vpop.permute.xlu1 %263  ;;  %v930_v42 = vmul.f32 %v3506_v17, %v3383_v3 }
 0x126   :  { %v504_v21 = vadd.f32 %v493_v18, %v474_v23  ;;  %v275_v4 = vadd.f32 %v264_v35, %v245_v40  ;;  %v668_v23 = vld [vmem:[#allocation10 + $0x18] sm:$0xff] }
 0x127   :  { %696 = vmatpush.msra.mxu0 %v668_v23 }
 0x129   :  { %697 = vmatpush.msra.mxu0 %v667_v55 }
 0x12b   :  { %1174 = vrot.lane.b32.xlu2 %v1165_v57, %s3061_s17  ;;  %v283_v57 = vmul.f32 %v3243_v49, %v3331_v20 }
 0x12c   :  { %586 = vrot.lane.b32.xlu0 %v3328_v19, %s3061_s17  ;;  %v311_v19 = vmul.f32 %v3234_v46, %v3245_v50 }
 0x12d   :  { %939 = vrot.lane.b32.xlu1 %v930_v42, %s3060_s4  ;;  %v519_v17 = vpop.permute.xlu2 %518  ;;  %v290_v33 = vpop.permute.xlu1 %289 }
 0x12e   :  { %v266_v12 = vpop.permute.xlu0 %265  ;;  %v530_v15 = vadd.f32 %v519_v17, %v504_v21  ;;  %v301_v39 = vadd.f32 %v290_v33, %v275_v4 }
 0x12f   :  { %v276_v35 = vadd.f32 %v266_v12, %v3271_v62 }
 0x130   :  { %v544_v59 = vadd.f32 %v540_v9, %v530_v15  ;;  %v315_v18 = vadd.f32 %v311_v19, %v301_v39  ;;  %v3725_v9 = vld [vmem:[#allocation2 + $0xa] sm:$0xff] }
 0x131   :  { %v1205_v42 = vmul.f32 %v3637_v41, %v3725_v9 }
 0x133   :  { %1110 = vrot.lane.b32.xlu2 %v1100_v61, %s3061_s17 }
 0x134   :  { %293 = vrot.lane.b32.xlu0 %v283_v57, %s3061_s17 }
 0x135   :  { %522 = vrot.lane.b32.xlu1 %v3434_v38, %s3061_s17  ;;  %v559_v24 = vpop.permute.xlu2 %558  ;;  %v330_v50 = vpop.permute.xlu1 %329 }
 0x136   :  { %v292_v5 = vpop.permute.xlu0 %291  ;;  %v341_v62 = vadd.f32 %v330_v50, %v315_v18  ;;  %v981_v50 = vld [vmem:[#allocation10 + $0x28] sm:$0xff] }
 0x137   :  { %v302_v46 = vadd.f32 %v292_v5, %v276_v35  ;;  %1008 = vmatpush.msra.mxu2 %v981_v50 }
 0x139   :  { %v316_v33 = vadd.f32 %v3275_v63, %v302_v46  ;;  %v377_v63 = vmul.f32 %v3263_v60, %v3249_v52 }
 0x13b   :  { %875 = vrot.lane.b32.xlu2 %v3501_v30, %s3060_s4  ;;  %v342_v15 = vadd.f32 %v3679_v7, %v316_v33 }
 0x13c   :  { %965 = vrot.lane.b32.xlu0 %v3395_v13, %s3061_s17 }
 0x13d   :  { %1214 = vrot.lane.b32.xlu1 %v1205_v42, %s3060_s4  ;;  %v495_v40 = vpop.permute.xlu2 %494  ;;  %v356_v21 = vpop.permute.xlu1 %355  ;;  %v853_v42 = vmul.f32 %v3532_v58, %v3370_v37  ;;  %v788_v37 = vmul.f32 %v3519_v34, %v3375_v56  ;;  %v4527_v56 = vld [vmem:[#allocation62_spill] sm:$0xff] }
 0x13e   :  { %v422_v38 = vpop.permute.xlu0 %421  ;;  %v367_v4 = vadd.f32 %v356_v21, %v341_v62  ;;  %v505_v7 = vadd.f32 %v495_v40, %v3342_v25 }
 0x140   :  { %v381_v12 = vadd.f32 %v377_v63, %v367_v4  ;;  %v4522_v4 = vld [vmem:[#allocation39_spill] sm:$0xff] }
 0x142   :  { %v407_v17 = vadd.f32 %v3660_v51, %v381_v12  ;;  %v1140_v51 = vmul.f32 %v3664_v43, %v3588_v8  ;;  %v4523_v12 = vld [vmem:[#allocation65_spill] sm:$0xff] }
 0x143   :  { %397 = vrot.lane.b32.xlu2 %v3282_v0, %s3060_s4  ;;  %v1231_v0 = vmul.f32 %v3668_v54, %v3725_v9 }
 0x144   :  { %626 = vrot.lane.b32.xlu0 %v3345_v26, %s3060_s4  ;;  %v433_v39 = vadd.f32 %v422_v38, %v407_v17 }
 0x145   :  { %811 = vrot.lane.b32.xlu1 %v3508_v10, %s3060_s4  ;;  %v651_v30 = vpop.permute.xlu2 %650  ;;  %v358_v52 = vpop.permute.xlu1 %357  ;;  %v570_v10 = vadd.f32 %v559_v24, %v544_v59  ;;  %v980_v59 = vld [vmem:[#allocation10 + $0x20] sm:$0xff] }
 0x146   :  { %v3744_v13 = vpop.permute.xlu0 %267  ;;  %v368_v19 = vadd.f32 %v358_v52, %v342_v15  ;;  %2514 = vmatmul.msk.f32.vlgmr.msra.gmra.mxu1 %vm669_vm3, %v433_v39  ;;  %1009 = vmatpush.msra.mxu2 %v980_v59  ;;  %v4525_v52 = vld [vmem:[#allocation48_spill] sm:$0xff] }
 0x148   :  { %v3751_v26 = vadd.f32 %v3291_v2, %v368_v19  ;;  %v606_v2 = vmul.f32 %v3348_v27, %v3302_v11 }
 0x14b   :  { %901 = vrot.lane.b32.xlu2 %v3511_v16, %s3061_s17 }
 0x14c   :  { %1150 = vrot.lane.b32.xlu0 %v1140_v51, %s3060_s4 }
 0x14d   :  { %1240 = vrot.lane.b32.xlu1 %v1231_v0, %s3061_s17  ;;  %v3760_v61 = vpop.permute.xlu2 %496  ;;  %v521_v35 = vpop.permute.xlu1 %520 }
 0x14e   :  { %v585_v57 = vpop.permute.xlu0 %584  ;;  %v531_v5 = vadd.f32 %v521_v35, %v505_v7  ;;  %v284_v35 = vmul.f32 %v3243_v49, %v3333_v22 }
 0x14f   :  { %v596_v18 = vadd.f32 %v585_v57, %v570_v10 }
 0x150   :  { %v3765_v33 = vadd.f32 %v3353_v28, %v531_v5  ;;  %v1075_v28 = vmul.f32 %v3596_v32, %v3590_v6  ;;  %v258_v32 = vmul.f32 %v3216_v36, %v3333_v22  ;;  %v1101_v5 = vmul.f32 %v3633_v47, %v3590_v6  ;;  %v4530_v6 = vld [vmem:[#allocation75_spill] sm:$0xff] }
 0x151   :  { %v610_v46 = vadd.f32 %v606_v2, %v596_v18  ;;  %v1206_v47 = vmul.f32 %v3637_v41, %v4530_v6 }
 0x153   :  { %333 = vrot.lane.b32.xlu2 %v3229_v44, %s3060_s4 }
 0x154   :  { %423 = vrot.lane.b32.xlu0 %v3285_v1, %s3061_s17  ;;  %v787_v1 = vmul.f32 %v3519_v34, %v3372_v53 }
 0x155   :  { %562 = vrot.lane.b32.xlu1 %v3444_v48, %s3060_s4  ;;  %v832_v11 = vpop.permute.xlu2 %831 }
 0x156   :  { %v625_v25 = vpop.permute.xlu0 %624 }
 0x157   :  { %v636_v27 = vadd.f32 %v625_v25, %v610_v46  ;;  %v3773_v16 = vpop.permute.xlu1 %560  ;;  %v4528_v46 = vld [vmem:[#allocation50_spill] sm:$0xff]  ;;  %v1256_v25 = vld [vmem:[#allocation10 + $0x38] sm:$0xff] }
 0x158   :  { %1283 = vmatpush.msra.mxu3 %v1256_v25 }
 0x159   :  { %v662_v24 = vadd.f32 %v651_v30, %v636_v27  ;;  %v4524_v30 = vld [vmem:[#allocation46_spill] sm:$0xff] }
 0x15a   :  { %v854_v15 = vmul.f32 %v3532_v58, %v4524_v30  ;;  %v920_v58 = vmul.f32 %v4523_v12, %v3383_v3  ;;  %v1255_v27 = vld [vmem:[#allocation10 + $0x30] sm:$0xff] }
 0x15b   :  { %2510 = vmatmul.msk.f32.vlgmr.msra.gmra.mxu0 %vm669_vm3, %v662_v24  ;;  %652 = vrot.lane.b32.xlu2 %v3356_v29, %s3061_s17 }
 0x15c   :  { %837 = vrot.lane.b32.xlu0 %v3513_v31, %s3061_s17  ;;  %v1166_v31 = vmul.f32 %v3666_v14, %v3588_v8  ;;  %v919_v8 = vmul.f32 %v4523_v12, %v4522_v4  ;;  %1284 = vmatpush.msra.mxu3 %v1255_v27  ;;  %v4540_v4 = vld [vmem:[#allocation33_spill] sm:$0xff] }
 0x15d   :  { %1086 = vrot.lane.b32.xlu1 %v1075_v28, %s3060_s4  ;;  %v898_v48 = vpop.permute.xlu2 %897  ;;  %v4531_v28 = vld [vmem:[#allocation64_spill] sm:$0xff] }
 0x15e   :  { %v872_v44 = vpop.permute.xlu0 %871 }
 0x15f   :  { %v806_v23 = vpop.permute.xlu1 %805 }
 0x160   :  { %v817_v55 = vadd.f32 %v806_v23, %v787_v1  ;;  %v4533_v1 = vld [vmem:[#allocation69_spill] sm:$0xff] }
 0x162   :  { %v843_v62 = vadd.f32 %v832_v11, %v817_v55  ;;  %v4529_v11 = vld [vmem:[#allocation63_spill] sm:$0xff] }
 0x163   :  { %1176 = vrot.lane.b32.xlu2 %v1166_v31, %s3061_s17 }
 0x164   :  { %v857_v29 = vadd.f32 %v853_v42, %v843_v62  ;;  %269 = vrot.lane.b32.xlu0 %v258_v32, %s3060_s4  ;;  %v4534_v42 = vld [vmem:[#allocation79_spill] sm:$0xff]  ;;  %v4535_v62 = vld [vmem:[#allocation77_spill] sm:$0xff] }
 0x165   :  { %359 = vrot.lane.b32.xlu1 %v3232_v45, %s3061_s17  ;;  %v874_v38 = vpop.permute.xlu2 %873  ;;  %v4526_v45 = vld [vmem:[#allocation49_spill] sm:$0xff]  ;;  %v1063_v32 = vmul.f32 %v4535_v62, %v4534_v42 }
 0x166   :  { %v834_v53 = vpop.permute.xlu0 %833  ;;  %v883_v40 = vadd.f32 %v872_v44, %v857_v29  ;;  %v4532_v44 = vld [vmem:[#allocation66_spill] sm:$0xff] }
 0x167   :  { %v808_v21 = vpop.permute.xlu1 %807 }
 0x168   :  { %v818_v63 = vadd.f32 %v808_v21, %v788_v37  ;;  %v909_v36 = vadd.f32 %v898_v48, %v883_v40  ;;  %v4537_v37 = vld [vmem:[#allocation78_spill] sm:$0xff]  ;;  %v4538_v21 = vld [vmem:[#allocation76_spill] sm:$0xff] }
 0x16a   :  { %v844_v17 = vadd.f32 %v834_v53, %v818_v63  ;;  %v923_v39 = vadd.f32 %v919_v8, %v909_v36  ;;  %v1062_v63 = vmul.f32 %v4535_v62, %v4538_v21  ;;  %v4539_v36 = vld [vmem:[#allocation37_spill] sm:$0xff]  ;;  %v4541_v8 = vld [vmem:[#allocation51_spill] sm:$0xff]  ;;  %v4554_v21 = vld [vmem:[#allocation54_spill] sm:$0xff] }
 0x16b   :  { %498 = vrot.lane.b32.xlu2 %v4526_v45, %s3060_s4  ;;  %v389_v12 = vmul.f32 %v4540_v4, %v4539_v36 }
 0x16c   :  { %588 = vrot.lane.b32.xlu0 %v4525_v52, %s3061_s17  ;;  %v858_v19 = vadd.f32 %v854_v15, %v844_v17  ;;  %v4542_v15 = vld [vmem:[#allocation70_spill] sm:$0xff] }
 0x16d   :  { %941 = vrot.lane.b32.xlu1 %v4527_v56, %s3060_s4  ;;  %v900_v51 = vpop.permute.xlu2 %899  ;;  %v4543_v56 = vld [vmem:[#allocation90_spill] sm:$0xff] }
 0x16e   :  { %v964_v34 = vpop.permute.xlu0 %963  ;;  %v884_v0 = vadd.f32 %v874_v38, %v858_v19  ;;  %v4536_v38 = vld [vmem:[#allocation91_spill] sm:$0xff] }
 0x16f   :  { %v938_v10 = vpop.permute.xlu1 %937  ;;  %v1129_v40 = vmul.f32 %v4537_v37, %v4536_v38  ;;  %v4552_v38 = vld [vmem:[#allocation41_spill] sm:$0xff] }
 0x170   :  { %v910_v7 = vadd.f32 %v900_v51, %v884_v0  ;;  %v949_v57 = vadd.f32 %v938_v10, %v923_v39  ;;  %v1232_v0 = vmul.f32 %v3668_v54, %v4530_v6  ;;  %v4544_v10 = vld [vmem:[#allocation86_spill] sm:$0xff]  ;;  %v4550_v6 = vld [vmem:[#allocation53_spill] sm:$0xff] }
 0x172   :  { %v975_v18 = vadd.f32 %v964_v34, %v949_v57  ;;  %v3811_v2 = vadd.f32 %v920_v58, %v910_v7  ;;  %v1128_v34 = vmul.f32 %v4537_v37, %v4543_v56  ;;  %v1141_v7 = vmul.f32 %v3664_v43, %v4544_v10  ;;  %v4545_v57 = vld [vmem:[#allocation40_spill] sm:$0xff]  ;;  %v4553_v37 = vld [vmem:[#allocation82_spill] sm:$0xff] }
 0x173   :  { %1112 = vrot.lane.b32.xlu2 %v1101_v5, %s3061_s17  ;;  %v4549_v43 = vld [vmem:[#allocation52_spill] sm:$0xff] }
 0x174   :  { %2527 = vmatmul.msk.f32.vlgmr.msra.gmra.mxu2 %vm669_vm3, %v975_v18  ;;  %295 = vrot.lane.b32.xlu0 %v284_v35, %s3061_s17 }
 0x175   :  { %524 = vrot.lane.b32.xlu1 %v4528_v46, %s3061_s17  ;;  %v1173_v3 = vpop.permute.xlu2 %1172 }
 0x176   :  { %v836_v50 = vpop.permute.xlu0 %835 }
 0x177   :  { %v810_v59 = vpop.permute.xlu1 %809 }
 0x178   :  { %v819_v49 = vadd.f32 %v810_v59, %v4529_v11  ;;  %v4547_v59 = vld [vmem:[#allocation80_spill] sm:$0xff] }
 0x17a   :  { %v845_v24 = vadd.f32 %v836_v50, %v819_v49  ;;  %v4546_v50 = vld [vmem:[#allocation85_spill] sm:$0xff]  ;;  %v4548_v49 = vld [vmem:[#allocation35_spill] sm:$0xff] }
 0x17b   :  { %877 = vrot.lane.b32.xlu2 %v4533_v1, %s3060_s4  ;;  %v1194_v25 = vmul.f32 %v4547_v59, %v4546_v50  ;;  %v415_v27 = vmul.f32 %v4548_v49, %v4539_v36  ;;  %v4566_v49 = vld [vmem:[#allocation56_spill] sm:$0xff] }
 0x17c   :  { %967 = vrot.lane.b32.xlu0 %v4531_v28, %s3061_s17  ;;  %v859_v48 = vadd.f32 %v4532_v44, %v845_v24 }
 0x17d   :  { %1216 = vrot.lane.b32.xlu1 %v1206_v47, %s3060_s4  ;;  %v1109_v55 = vpop.permute.xlu2 %1108 }
 0x17e   :  { %v1081_v23 = vpop.permute.xlu0 %1080 }
 0x17f   :  { %v1083_v31 = vpop.permute.xlu1 %1082  ;;  %v1092_v30 = vadd.f32 %v1081_v23, %v1062_v63 }
 0x180   :  { %v1093_v29 = vadd.f32 %v1083_v31, %v1063_v32  ;;  %v1195_v32 = vmul.f32 %v4547_v59, %v3725_v9 }
 0x182   :  { %v1119_v53 = vadd.f32 %v1109_v55, %v1093_v29  ;;  %v4551_v55 = vld [vmem:[#allocation81_spill] sm:$0xff]  ;;  %v1167_v29 = vmul.f32 %v3666_v14, %v4544_v10 }
 0x183   :  { %399 = vrot.lane.b32.xlu2 %v389_v12, %s3060_s4 }
 0x184   :  { %628 = vrot.lane.b32.xlu0 %v4541_v8, %s3060_s4  ;;  %v1133_v17 = vadd.f32 %v1129_v40, %v1119_v53  ;;  %v4555_v8 = vld [vmem:[#allocation38_spill] sm:$0xff] }
 0x185   :  { %903 = vrot.lane.b32.xlu1 %v4542_v15, %s3061_s17  ;;  %v1175_v52 = vpop.permute.xlu2 %1174  ;;  %v4557_v15 = vld [vmem:[#allocation87_spill] sm:$0xff] }
 0x186   :  { %v1107_v39 = vpop.permute.xlu0 %1106 }
 0x187   :  { %v1118_v45 = vadd.f32 %v1107_v39, %v1092_v30  ;;  %v1213_v19 = vpop.permute.xlu1 %1212  ;;  %v1207_v39 = vmul.f32 %v3637_v41, %v4557_v15  ;;  %v4561_v41 = vld [vmem:[#allocation34_spill] sm:$0xff] }
 0x189   :  { %v1132_v51 = vadd.f32 %v1128_v34, %v1118_v45  ;;  %v4560_v45 = vld [vmem:[#allocation47_spill] sm:$0xff] }
 0x18b   :  { %1152 = vrot.lane.b32.xlu2 %v1141_v7, %s3060_s4 }
 0x18c   :  { %1242 = vrot.lane.b32.xlu0 %v1232_v0, %s3061_s17 }
 0x18d   :  { %335 = vrot.lane.b32.xlu1 %v4545_v57, %s3060_s4  ;;  %v1111_v18 = vpop.permute.xlu2 %1110  ;;  %v4562_v57 = vld [vmem:[#allocation68_spill] sm:$0xff] }
 0x18e   :  { %v1147_v58 = vpop.permute.xlu0 %1146 }
 0x18f   :  { %v1158_v35 = vadd.f32 %v1147_v58, %v1132_v51  ;;  %v1239_v5 = vpop.permute.xlu1 %1238 }
 0x191   :  { %v1184_v46 = vadd.f32 %v1173_v3, %v1158_v35  ;;  %v1233_v35 = vmul.f32 %v3668_v54, %v4557_v15  ;;  %v4567_v54 = vld [vmem:[#allocation43_spill] sm:$0xff]  ;;  %v4572_v15 = vld [vmem:[#allocation73_spill] sm:$0xff] }
 0x193   :  { %v1198_v11 = vadd.f32 %v1194_v25, %v1184_v46  ;;  %425 = vrot.lane.b32.xlu2 %v415_v27, %s3061_s17  ;;  %v4565_v46 = vld [vmem:[#allocation42_spill] sm:$0xff] }
 0x194   :  { %564 = vrot.lane.b32.xlu0 %v4549_v43, %s3060_s4 }
 0x195   :  { %v1224_v24 = vadd.f32 %v1213_v19, %v1198_v11  ;;  %654 = vrot.lane.b32.xlu1 %v4550_v6, %s3061_s17  ;;  %v876_v28 = vpop.permute.xlu2 %875  ;;  %v506_v19 = vadd.f32 %v3760_v61, %v4560_v45  ;;  %v4568_v6 = vld [vmem:[#allocation67_spill] sm:$0xff] }
 0x196   :  { %v1149_v47 = vpop.permute.xlu0 %1148  ;;  %v885_v1 = vadd.f32 %v876_v28, %v859_v48  ;;  %v571_v48 = vadd.f32 %v3773_v16, %v3765_v33  ;;  %v4559_v16 = vld [vmem:[#allocation72_spill] sm:$0xff] }
 0x197   :  { %v1250_v44 = vadd.f32 %v1239_v5, %v1224_v24  ;;  %v1159_v3 = vadd.f32 %v1149_v47, %v1133_v17  ;;  %v1085_v23 = vpop.permute.xlu1 %1084  ;;  %v4556_v17 = vld [vmem:[#allocation36_spill] sm:$0xff]  ;;  %v4564_v5 = vld [vmem:[#allocation55_spill] sm:$0xff] }
 0x198   :  { %v1094_v42 = vadd.f32 %v1085_v23, %v4551_v55  ;;  %v247_v30 = vmul.f32 %v4556_v17, %v3331_v20 }
 0x199   :  { %v1185_v62 = vadd.f32 %v1175_v52, %v1159_v3  ;;  %2540 = vmatmul.msk.f32.vlgmr.msra.gmra.mxu3 %vm669_vm3, %v1250_v44  ;;  %v4558_v52 = vld [vmem:[#allocation71_spill] sm:$0xff] }
 0x19a   :  { %v1120_v31 = vadd.f32 %v1111_v18, %v1094_v42  ;;  %v277_v33 = vadd.f32 %v3744_v13, %v247_v30  ;;  %v4563_v13 = vld [vmem:[#allocation58_spill] sm:$0xff] }
 0x19b   :  { %v1199_v53 = vadd.f32 %v1195_v32, %v1185_v62  ;;  %1178 = vrot.lane.b32.xlu2 %v1167_v29, %s3061_s17  ;;  %v4569_v32 = vld [vmem:[#allocation84_spill] sm:$0xff] }
 0x19c   :  { %361 = vrot.lane.b32.xlu0 %v4552_v38, %s3061_s17  ;;  %v1134_v40 = vadd.f32 %v4553_v37, %v1120_v31 }
 0x19d   :  { %590 = vrot.lane.b32.xlu1 %v4554_v21, %s3061_s17  ;;  %v398_v9 = vpop.permute.xlu2 %397  ;;  %v4570_v21 = vld [vmem:[#allocation57_spill] sm:$0xff] }
 0x19e   :  { %v587_v63 = vpop.permute.xlu0 %586  ;;  %v408_v29 = vadd.f32 %v398_v9, %v3751_v26 }
 0x19f   :  { %v597_v4 = vadd.f32 %v587_v63, %v571_v48  ;;  %v940_v12 = vpop.permute.xlu1 %939 }
 0x1a0   :  { %v950_v61 = vadd.f32 %v940_v12, %v3811_v2 }
 0x1a1   :  { %v611_v14 = vadd.f32 %v4555_v8, %v597_v4 }
 0x1a3   :  { %943 = vrot.lane.b32.xlu2 %v4559_v16, %s3060_s4 }
 0x1a4   :  { %969 = vrot.lane.b32.xlu0 %v4558_v52, %s3061_s17 }
 0x1a5   :  { %1218 = vrot.lane.b32.xlu1 %v1207_v39, %s3060_s4  ;;  %v902_v34 = vpop.permute.xlu2 %901 }
 0x1a6   :  { %v294_v56 = vpop.permute.xlu0 %293  ;;  %v911_v20 = vadd.f32 %v902_v34, %v885_v1  ;;  %v379_v34 = vmul.f32 %v3263_v60, %v4539_v36  ;;  %v4576_v60 = vld [vmem:[#allocation60_spill] sm:$0xff] }
 0x1a7   :  { %v303_v51 = vadd.f32 %v294_v56, %v277_v33  ;;  %v523_v0 = vpop.permute.xlu1 %522  ;;  %v4573_v33 = vld [vmem:[#allocation88_spill] sm:$0xff] }
 0x1a8   :  { %v532_v10 = vadd.f32 %v523_v0, %v506_v19  ;;  %v3890_v58 = vadd.f32 %v4562_v57, %v911_v20 }
 0x1a9   :  { %v317_v7 = vadd.f32 %v4561_v41, %v303_v51 }
 0x1aa   :  { %v546_v18 = vadd.f32 %v4563_v13, %v532_v10  ;;  %v4574_v13 = vld [vmem:[#allocation59_spill] sm:$0xff] }
 0x1ab   :  { %401 = vrot.lane.b32.xlu2 %v4565_v46, %s3060_s4 }
 0x1ac   :  { %630 = vrot.lane.b32.xlu0 %v4564_v5, %s3060_s4  ;;  %v248_v5 = vmul.f32 %v4556_v17, %v3333_v22  ;;  %s3062_s4 = smov 120  }
 0x1ad   :  { %1244 = vrot.lane.b32.xlu1 %v1233_v35, %s3061_s17  ;;  %v334_v59 = vpop.permute.xlu2 %333 }
 0x1ae   :  { %v966_v50 = vpop.permute.xlu0 %965  ;;  %v343_v26 = vadd.f32 %v334_v59, %v317_v7 }
 0x1af   :  { %v976_v25 = vadd.f32 %v966_v50, %v950_v61  ;;  %v1215_v11 = vpop.permute.xlu1 %1214 }
 0x1b0   :  { %v1225_v44 = vadd.f32 %v1215_v11, %v1199_v53  ;;  %v4575_v11 = vld [vmem:[#allocation44_spill] sm:$0xff] }
 0x1b1   :  { %2528 = vmatmul.msk.f32.gmra.mxu2 %vm669_vm3, %v976_v25 }
 0x1b3   :  { %427 = vrot.lane.b32.xlu2 %v4567_v54, %s3061_s17 }
 0x1b4   :  { %656 = vrot.lane.b32.xlu0 %v4566_v49, %s3061_s17  ;;  %s3069_s17 = smov 72  }
 0x1b5   :  { %v653_v43 = vpop.permute.xlu2 %652 }
 0x1b6   :  { %v627_v27 = vpop.permute.xlu0 %626 }
 0x1b7   :  { %v637_v2 = vadd.f32 %v627_v27, %v611_v14  ;;  %v812_v24 = vpop.permute.xlu1 %811  ;;  %v4571_v14 = vld [vmem:[#allocation83_spill] sm:$0xff] }
 0x1b8   :  { %v820_v47 = vadd.f32 %v812_v24, %v4568_v6 }
 0x1b9   :  { %v663_v28 = vadd.f32 %v653_v43, %v637_v2 }
 0x1bb   :  { %2511 = vmatmul.msk.f32.gmra.mxu0 %vm669_vm3, %v663_v28 }
 0x1bd   :  { %v1177_v1 = vpop.permute.xlu2 %1176 }
 0x1be   :  { %v1151_v3 = vpop.permute.xlu0 %1150 }
 0x1bf   :  { %v1160_v23 = vadd.f32 %v1151_v3, %v1134_v40  ;;  %v1241_v55 = vpop.permute.xlu1 %1240 }
 0x1c0   :  { %v1251_v42 = vadd.f32 %v1241_v55, %v1225_v44 }
 0x1c1   :  { %v1186_v62 = vadd.f32 %v1177_v1, %v1160_v23  ;;  %v4577_v23 = vld [vmem:[#allocation89_spill] sm:$0xff] }
 0x1c2   :  { %2541 = vmatmul.msk.f32.gmra.mxu3 %vm669_vm3, %v1251_v42 }
 0x1c3   :  { %v1200_v31 = vadd.f32 %v4569_v32, %v1186_v62 }
 0x1c5   :  { %v499_v37 = vpop.permute.xlu2 %498 }
 0x1c6   :  { %v424_v38 = vpop.permute.xlu0 %423  ;;  %v507_v63 = vadd.f32 %v499_v37, %v4570_v21 }
 0x1c7   :  { %v434_v48 = vadd.f32 %v424_v38, %v408_v29  ;;  %v563_v4 = vpop.permute.xlu1 %562 }
 0x1c8   :  { %v572_v20 = vadd.f32 %v563_v4, %v546_v18 }
 0x1c9   :  { %2515 = vmatmul.msk.f32.gmra.mxu1 %vm669_vm3, %v434_v48 }
 0x1cd   :  { %v1113_v40 = vpop.permute.xlu2 %1112 }
 0x1ce   :  { %v838_v53 = vpop.permute.xlu0 %837 }
 0x1cf   :  { %v846_v12 = vadd.f32 %v838_v53, %v820_v47  ;;  %v1087_v8 = vpop.permute.xlu1 %1086 }
 0x1d0   :  { %v1095_v30 = vadd.f32 %v1087_v8, %v4571_v14 }
 0x1d1   :  { %v860_v39 = vadd.f32 %v4572_v15, %v846_v12  ;;  %v4579_v15 = vld [vmem:[#allocation45_spill] sm:$0xff] }
 0x1d2   :  { %v1121_v52 = vadd.f32 %v1113_v40, %v1095_v30 }
 0x1d4   :  { %v1135_v16 = vadd.f32 %v4573_v33, %v1121_v52  ;;  %v4580_v33 = vld [vmem:[#allocation61_spill] sm:$0xff] }
 0x1d5   :  { %v878_v45 = vpop.permute.xlu2 %877 }
 0x1d6   :  { %v270_v9 = vpop.permute.xlu0 %269  ;;  %v886_v47 = vadd.f32 %v878_v45, %v860_v39 }
 0x1d7   :  { %v360_v19 = vpop.permute.xlu1 %359  ;;  %v278_v61 = vadd.f32 %v270_v9, %v248_v5 }
 0x1d8   :  { %v369_v56 = vadd.f32 %v360_v19, %v343_v26  ;;  %v699_v19 = vpop.f32.mrf.mxu0 }
 0x1da   :  { %v383_v51 = vadd.f32 %v379_v34, %v369_v56  ;;  %v740_v34 = vpop.f32.mrf.mxu1 }
 0x1dd   :  { %v400_v41 = vpop.permute.xlu2 %399 }
 0x1de   :  { %v589_v0 = vpop.permute.xlu0 %588  ;;  %v409_v54 = vadd.f32 %v400_v41, %v383_v51 }
 0x1df   :  { %v598_v10 = vadd.f32 %v589_v0, %v572_v20  ;;  %v942_v57 = vpop.permute.xlu1 %941 }
 0x1e0   :  { %v951_v18 = vadd.f32 %v942_v57, %v3890_v58  ;;  %v4578_v58 = vld [vmem:[#allocation74_spill] sm:$0xff]  ;;  %v3934_v57 = vld [vmem:[#allocation12] ss:$0 sm:$0xff] }
 0x1e1   :  { %v612_v35 = vadd.f32 %v4574_v13, %v598_v10  ;;  %v741_v10 = vadd.f32 %v740_v34, %v699_v19 }
 0x1e5   :  { %v1153_v50 = vpop.permute.xlu2 %1152 }
 0x1e6   :  { %v296_v7 = vpop.permute.xlu0 %295  ;;  %v1161_v22 = vadd.f32 %v1153_v50, %v1135_v16 }
 0x1e7   :  { %v304_v46 = vadd.f32 %v296_v7, %v278_v61  ;;  %v525_v59 = vpop.permute.xlu1 %524 }
 0x1e8   :  { %v533_v25 = vadd.f32 %v525_v59, %v507_v63 }
 0x1e9   :  { %v318_v49 = vadd.f32 %v4575_v11, %v304_v46 }
 0x1ea   :  { %v547_v36 = vadd.f32 %v4576_v60, %v533_v25 }
 0x1ed   :  { %v426_v2 = vpop.permute.xlu2 %425 }
 0x1ee   :  { %v968_v27 = vpop.permute.xlu0 %967  ;;  %v435_v6 = vadd.f32 %v426_v2, %v409_v54 }
 0x1ef   :  { %v977_v43 = vadd.f32 %v968_v27, %v951_v18  ;;  %v1217_v24 = vpop.permute.xlu1 %1216 }
 0x1f0   :  { %2516 = vmatmul.msk.f32.gmra.mxu1 %vm669_vm3, %v435_v6  ;;  %v1226_v62 = vadd.f32 %v1217_v24, %v1200_v31 }
 0x1f1   :  { %2529 = vmatmul.msk.f32.gmra.mxu2 %vm669_vm3, %v977_v43 }
 0x1f5   :  { %v1179_v28 = vpop.permute.xlu2 %1178 }
 0x1f6   :  { %v629_v17 = vpop.permute.xlu0 %628  ;;  %v1187_v44 = vadd.f32 %v1179_v28, %v1161_v22 }
 0x1f7   :  { %v904_v3 = vpop.permute.xlu1 %903  ;;  %v638_v21 = vadd.f32 %v629_v17, %v612_v35  ;;  %v1011_v20 = vpop.f32.mrf.mxu2 }
 0x1f8   :  { %v912_v1 = vadd.f32 %v904_v3, %v886_v47  ;;  %v1201_v55 = vadd.f32 %v4577_v23, %v1187_v44  ;;  %v1023_v41 = vadd.f32 %v1011_v20, %v741_v10  ;;  %v2752_v23 = vld [vmem:[#allocation3] sm:$0xff] }
 0x1f9   :  { %1316 = vst.msk [vmem:[#allocation3 + $0x28] sm:$0x3] %vm1315_vm5, %v2752_v23 }
 0x1fa   :  { %v926_v42 = vadd.f32 %v4578_v58, %v912_v1  ;;  %1322 = vst.msk [vmem:[#allocation3 + $0x58] sm:$0x3] %vm1315_vm5, %v2752_v23 }
 0x1fd   :  { %v944_v38 = vpop.permute.xlu2 %943 }
 0x1fe   :  { %v1243_v32 = vpop.permute.xlu0 %1242  ;;  %v952_v9 = vadd.f32 %v944_v38, %v926_v42 }
 0x1ff   :  { %v1252_v29 = vadd.f32 %v1243_v32, %v1226_v62  ;;  %v336_v37 = vpop.permute.xlu1 %335 }
 0x200   :  { %v344_v12 = vadd.f32 %v336_v37, %v318_v49 }
 0x201   :  { %2542 = vmatmul.msk.f32.gmra.mxu3 %vm669_vm3, %v1252_v29 }
 0x205   :  { %v402_v53 = vpop.permute.xlu2 %401 }
 0x206   :  { %v565_v48 = vpop.permute.xlu0 %564 }
 0x207   :  { %v655_v63 = vpop.permute.xlu1 %654  ;;  %v573_v8 = vadd.f32 %v565_v48, %v547_v36 }
 0x208   :  { %v664_v4 = vadd.f32 %v655_v63, %v638_v21 }
 0x20a   :  { %2512 = vmatmul.msk.f32.gmra.mxu0 %vm669_vm3, %v664_v4 }
 0x20d   :  { %v428_v26 = vpop.permute.xlu2 %427 }
 0x20e   :  { %v362_v40 = vpop.permute.xlu0 %361 }
 0x20f   :  { %v370_v14 = vadd.f32 %v362_v40, %v344_v12  ;;  %v591_v30 = vpop.permute.xlu1 %590 }
 0x210   :  { %v599_v39 = vadd.f32 %v591_v30, %v573_v8 }
 0x211   :  { %v384_v31 = vadd.f32 %v4579_v15, %v370_v14 }
 0x212   :  { %v613_v16 = vadd.f32 %v4580_v33, %v599_v39  ;;  %v3966_v33 = vld [vmem:[#allocation13 + $0x3] ss:$0 sm:$0xff] }
 0x213   :  { %v410_v52 = vadd.f32 %v402_v53, %v384_v31 }
 0x215   :  { %v436_v45 = vadd.f32 %v428_v26, %v410_v52 }
 0x216   :  { %v970_v56 = vpop.permute.xlu0 %969 }
 0x217   :  { %v978_v51 = vadd.f32 %v970_v56, %v952_v9  ;;  %2517 = vmatmul.msk.f32.gmra.mxu1 %vm669_vm3, %v436_v45  ;;  %v1219_v0 = vpop.permute.xlu1 %1218 }
 0x218   :  { %v1227_v61 = vadd.f32 %v1219_v0, %v1201_v55 }
 0x219   :  { %2530 = vmatmul.msk.f32.gmra.mxu2 %vm669_vm3, %v978_v51 }
 0x21c   :  { %v1286_v13 = vpop.f32.mrf.mxu3 }
 0x21d   :  { %v1298_v35 = vadd.f32 %v1286_v13, %v1023_v41 }
 0x21e   :  { %v631_v5 = vpop.permute.xlu0 %630 }
 0x21f   :  { %v1306_v7 = vadd.f32 %v3934_v57, %v1298_v35  ;;  %v1245_v46 = vpop.permute.xlu1 %1244  ;;  %v639_v11 = vadd.f32 %v631_v5, %v613_v16  ;;  %v3968_v16 = vld [vmem:[#allocation13 + $0x6] ss:$0 sm:$0xff] }
 0x220   :  { %v1253_v50 = vadd.f32 %v1245_v46, %v1227_v61 }
 0x221   :  { %v1323_v59 = vmax.f32 %v1306_v7, 0.0 }
 0x222   :  { %2543 = vmatmul.msk.f32.gmra.mxu3 %vm669_vm3, %v1253_v50 }
 0x223   :  { %v1332_v25 = vrot.slane %v1323_v59, 7 }
 0x225   :  { %1338 = vrot.lane.b32.xlu1 %v1332_v25, %s3047_s26 }
 0x226   :  { %v657_v49 = vpop.permute.xlu0 %656 }
 0x227   :  { %v665_v60 = vadd.f32 %v657_v49, %v639_v11 }
 0x229   :  { %2513 = vmatmul.msk.f32.gmra.mxu0 %vm669_vm3, %v665_v60 }
 0x234   :  { %v1014_v27 = vpop.f32.mrf.mxu2 }
 0x238   :  { %v702_v36 = vpop.f32.mrf.mxu0 }
 0x245   :  { %v1289_v2 = vpop.f32.mrf.mxu3 }
 0x246   :  { %v743_v18 = vpop.f32.mrf.mxu1 }
 0x247   :  { %v744_v54 = vadd.f32 %v743_v18, %v702_v36 }
 0x249   :  { %v1024_v43 = vadd.f32 %v1014_v27, %v744_v54 }
 0x24b   :  { %v1299_v24 = vadd.f32 %v1289_v2, %v1024_v43 }
 0x24d   :  { %v1307_v6 = vadd.f32 %v3934_v57, %v1299_v24 }
 0x24f   :  { %v1324_v22 = vmax.f32 %v1307_v6, 0.0 }
 0x251   :  { %v1333_v17 = vrot.slane %v1324_v22, 7 }
 0x253   :  { %1342 = vrot.lane.b32.xlu2 %v1333_v17, %s3047_s26  ;;  %v1334_v47 = vsel %vm1331_vm4, %v1332_v25, %v1333_v17 }
 0x254   :  { %1340 = vrot.lane.b32.xlu1 %v1334_v47, %s3047_s26 }
 0x26d   :  { %v746_v28 = vpop.f32.mrf.mxu1 }
 0x274   :  { %v1017_v1 = vpop.f32.mrf.mxu2 }
 0x284   :  { %v1292_v58 = vpop.f32.mrf.mxu3 }
 0x287   :  { %v705_v44 = vpop.f32.mrf.mxu0 }
 0x288   :  { %v747_v3 = vadd.f32 %v746_v28, %v705_v44 }
 0x28a   :  { %v1025_v55 = vadd.f32 %v1017_v1, %v747_v3 }
 0x28c   :  { %v1300_v42 = vadd.f32 %v1292_v58, %v1025_v55 }
 0x28e   :  { %v1308_v62 = vadd.f32 %v3934_v57, %v1300_v42 }
 0x290   :  { %v1325_v32 = vmax.f32 %v1308_v62, 0.0 }
 0x292   :  { %v1335_v29 = vrot.slane %v1325_v32, 7 }
 0x294   :  { %1344 = vrot.lane.b32.xlu0 %v1335_v29, %s3047_s26  ;;  %v749_v48 = vpop.f32.mrf.mxu1 }
 0x297   :  { %v1339_v38 = vpop.permute.xlu1 %1338 }
 0x298   :  { %1357 = vst.msk [vmem:[#allocation3] sm:$0xfe] %vm1356_vm6, %v1339_v38 }
 0x299   :  { %1359 = vst.msk [vmem:[#allocation3 + $0x8] sm:$0xfe] %vm1358_vm7, %v1339_v38 }
 0x29c   :  { %v1020_v4 = vpop.f32.mrf.mxu2 }
 0x29f   :  { %v3950_v37 = vld [vmem:[#allocation3] sm:$0xff] }
 0x2a0   :  { %1402 = vrot.lane.b32.xlu1 %v3950_v37, %s3062_s4  ;;  %v1389_v39 = vld [vmem:[#allocation3 + $0x8] sm:$0xff]  ;;  %v1471_v26 = vld [vmem:[#allocation3] sm:$0xfe] }
 0x2a1   :  { %v3970_v45 = vld [vmem:[#allocation3] sm:$0xfc]  ;;  %v1476_v56 = vmul.f32 %v3966_v33, %v1471_v26  ;;  %v1508_v2 = vld [vmem:[#allocation3 + $0x8] sm:$0xfe]  ;;  %v1521_v42 = vrot.slane %v1471_v26, 1 }
 0x2a2   :  { %v1613_v20 = vmul.f32 %v3968_v16, %v3970_v45  ;;  %v1524_v24 = vrot.slane %v1508_v2, 1  ;;  %v1645_v28 = vld [vmem:[#allocation3 + $0x8] sm:$0xfc]  ;;  %v1658_v32 = vrot.slane %v3970_v45, 2 }
 0x2a3   :  { %v1489_v35 = vrot.slane %v1476_v56, 1  ;;  %v1661_v1 = vrot.slane %v1645_v28, 2 }
 0x2a4   :  { %v1626_v7 = vrot.slane %v1613_v20, 2 }
 0x2a5   :  { %v1295_v12 = vpop.f32.mrf.mxu3 }
 0x2a6   :  { %v708_v21 = vpop.f32.mrf.mxu0 }
 0x2a7   :  { %v750_v63 = vadd.f32 %v749_v48, %v708_v21 }
 0x2a9   :  { %v1026_v53 = vadd.f32 %v1020_v4, %v750_v63 }
 0x2ab   :  { %v1301_v40 = vadd.f32 %v1295_v12, %v1026_v53 }
 0x2ad   :  { %v1343_v8 = vpop.permute.xlu2 %1342  ;;  %v1309_v14 = vadd.f32 %v3934_v57, %v1301_v40 }
 0x2ae   :  { %1365 = vst.msk [vmem:[#allocation3 + $0x20] sm:$0x1] %vm1364_vm8, %v1343_v8 }
 0x2af   :  { %1367 = vst.msk [vmem:[#allocation3 + $0x28] sm:$0x1] %vm1366_vm9, %v1343_v8  ;;  %v1326_v30 = vmax.f32 %v1309_v14, 0.0 }
 0x2b1   :  { %v1336_v15 = vrot.slane %v1326_v30, 7 }
 0x2b3   :  { %1348 = vrot.lane.b32.xlu0 %v1336_v15, %s3047_s26  ;;  %v1337_v31 = vsel %vm1331_vm4, %v1335_v29, %v1336_v15 }
 0x2b4   :  { %1346 = vrot.lane.b32.xlu2 %v1337_v31, %s3047_s26 }
 0x2b5   :  { %v1472_v9 = vld [vmem:[#allocation3 + $0x20] sm:$0x1] }
 0x2b6   :  { %v1609_v19 = vld [vmem:[#allocation3 + $0x20] sm:$0x3]  ;;  %v1478_v51 = vmul.f32 %v3966_v33, %v1472_v9  ;;  %v1509_v13 = vld [vmem:[#allocation3 + $0x28] sm:$0x1]  ;;  %v1527_v49 = vrot.slane %v1472_v9, 1 }
 0x2b7   :  { %v1615_v10 = vmul.f32 %v3968_v16, %v1609_v19  ;;  %v1529_v11 = vrot.slane %v1509_v13, 1  ;;  %v1646_v22 = vld [vmem:[#allocation3 + $0x28] sm:$0x3]  ;;  %v1664_v3 = vrot.slane %v1609_v19, 2  ;;  %v4079_v13 = vld [vmem:[#allocation13 + $0x1] ss:$0 sm:$0xff] }
 0x2b8   :  { %v1492_v61 = vrot.slane %v1478_v51, 1  ;;  %v1666_v44 = vrot.slane %v1646_v22, 2 }
 0x2b9   :  { %v1629_v50 = vrot.slane %v1615_v10, 2 }
 0x2bb   :  { %1439 = vrot.lane.b32.xlu0 %v1389_v39, %s3063_s13 }
 0x2bc   :  { %1404 = vrot.lane.b32.xlu2 %v1389_v39, %s3062_s4 }
 0x2c4   :  { %1437 = vrot.lane.b32.xlu2 %v3950_v37, %s3063_s13 }
 0x2c6   :  { %v1341_v52 = vpop.permute.xlu1 %1340 }
 0x2c7   :  { %1361 = vst.msk [vmem:[#allocation3 + $0x10] sm:$0xff] %vm1360_vm10, %v1341_v52 }
 0x2c8   :  { %1363 = vst.msk [vmem:[#allocation3 + $0x18] sm:$0xff] %vm1362_vm11, %v1341_v52 }
 0x2ce   :  { %v3973_v34 = vld [vmem:[#allocation3 + $0x10] sm:$0xff] }
 0x2cf   :  { %v1390_v0 = vld [vmem:[#allocation3 + $0x18] sm:$0xff]  ;;  %1441 = vrot.lane.b32.xlu0 %v3973_v34, %s3063_s13  ;;  %1406 = vrot.lane.b32.xlu1 %v3973_v34, %s3062_s4  ;;  %v1477_v41 = vmul.f32 %v3966_v33, %v3973_v34  ;;  %v1614_v57 = vmul.f32 %v3968_v16, %v3973_v34  ;;  %v1522_v46 = vrot.slane %v3973_v34, 1  ;;  %v1659_v47 = vrot.slane %v3973_v34, 2 }
 0x2d0   :  { %1408 = vrot.lane.b32.xlu2 %v1390_v0, %s3062_s4  ;;  %v1525_v5 = vrot.slane %v1390_v0, 1  ;;  %v1662_v17 = vrot.slane %v1390_v0, 2 }
 0x2d1   :  { %v1490_v59 = vrot.slane %v1477_v41, 1  ;;  %v1627_v25 = vrot.slane %v1614_v57, 2  ;;  %v1528_v43 = vsel %vm1488_vm12, %v1522_v46, %v1527_v49  ;;  %v1665_v55 = vsel %vm1625_vm13, %v1659_v47, %v1664_v3 }
 0x2d2   :  { %v1530_v27 = vsel %vm1488_vm12, %v1525_v5, %v1529_v11  ;;  %v1526_v6 = vsel %vm1488_vm12, %v1524_v24, %v1525_v5  ;;  %v1667_v23 = vsel %vm1625_vm13, %v1662_v17, %v1666_v44  ;;  %v1663_v58 = vsel %vm1625_vm13, %v1661_v1, %v1662_v17 }
 0x2d3   :  { %v3990_v60 = vsel %vm1488_vm12, %v1490_v59, %v1492_v61  ;;  %v3993_v36 = vsel %vm1625_vm13, %v1627_v25, %v1629_v50  ;;  %v3996_v18 = vsel %vm1488_vm12, %v1489_v35, %v1490_v59  ;;  %v3999_v54 = vsel %vm1625_vm13, %v1626_v7, %v1627_v25  ;;  %v4087_v7 = vld [vmem:[#allocation13] ss:$0 sm:$0xff]  ;;  %v1759_v50 = vld [vmem:[#allocation15 + $0x78] sm:$0xff]  ;;  %v4094_v25 = vld [vmem:[#allocation13 + $0x2] ss:$0 sm:$0xff] }
 0x2d4   :  { %v1523_v62 = vsel %vm1488_vm12, %v1521_v42, %v1522_v46  ;;  %v1660_v29 = vsel %vm1625_vm13, %v1658_v32, %v1659_v47  ;;  %2562 = vmatpush.msrb.mxu3 %v1759_v50  ;;  %1764 = vmatpush.msrb.mxu0 %v1759_v50  ;;  %v1758_v47 = vld [vmem:[#allocation15 + $0x70] sm:$0xff]  ;;  %v1757_v42 = vld [vmem:[#allocation15 + $0x68] sm:$0xff] }
 0x2d6   :  { %2563 = vmatpush.msrb.mxu3 %v1758_v47  ;;  %1765 = vmatpush.msrb.mxu0 %v1758_v47  ;;  %v4159_v47 = vld [vmem:[#allocation13 + $0x5] ss:$0 sm:$0xff] }
 0x2d7   :  { %1547 = vrot.lane.b32.xlu0 %v1530_v27, %s3062_s4  ;;  %1443 = vrot.lane.b32.xlu1 %v1390_v0, %s3063_s13 }
 0x2d8   :  { %1545 = vrot.lane.b32.xlu2 %v1528_v43, %s3062_s4  ;;  %2564 = vmatpush.msrb.mxu3 %v1757_v42 }
 0x2d9   :  { %1766 = vmatpush.msrb.mxu0 %v1757_v42 }
 0x2df   :  { %1581 = vrot.lane.b32.xlu1 %v1530_v27, %s3063_s13  ;;  %1579 = vrot.lane.b32.xlu0 %v1528_v43, %s3063_s13  ;;  %v1380_v43 = vmul.f32 %v4087_v7, %v3950_v37 }
 0x2e0   :  { %1577 = vrot.lane.b32.xlu2 %v1526_v6, %s3063_s13 }
 0x2e7   :  { %1684 = vrot.lane.b32.xlu1 %v1667_v23, %s3062_s4  ;;  %1682 = vrot.lane.b32.xlu0 %v1665_v55, %s3062_s4 }
 0x2e8   :  { %1714 = vrot.lane.b32.xlu2 %v1663_v58, %s3063_s13 }
 0x2ef   :  { %1718 = vrot.lane.b32.xlu1 %v1667_v23, %s3063_s13  ;;  %1716 = vrot.lane.b32.xlu0 %v1665_v55, %s3063_s13 }
 0x2f7   :  { %1543 = vrot.lane.b32.xlu1 %v1526_v6, %s3062_s4  ;;  %1541 = vrot.lane.b32.xlu0 %v1523_v62, %s3062_s4 }
 0x2ff   :  { %1575 = vrot.lane.b32.xlu1 %v1523_v62, %s3063_s13  ;;  %1678 = vrot.lane.b32.xlu0 %v1660_v29, %s3062_s4  ;;  %v1756_v62 = vld [vmem:[#allocation15 + $0x60] sm:$0xff] }
 0x300   :  { %2565 = vmatpush.msrb.mxu3 %v1756_v62  ;;  %1767 = vmatpush.msrb.mxu0 %v1756_v62 }
 0x306   :  { %v1345_v38 = vpop.permute.xlu0 %1344 }
 0x307   :  { %1680 = vrot.lane.b32.xlu1 %v1663_v58, %s3062_s4  ;;  %1368 = vst.msk [vmem:[#allocation3 + $0x30] sm:$0xfe] %vm1356_vm6, %v1345_v38 }
 0x308   :  { %1369 = vst.msk [vmem:[#allocation3 + $0x38] sm:$0xfe] %vm1358_vm7, %v1345_v38 }
 0x30e   :  { %v1347_v48 = vpop.permute.xlu2 %1346  ;;  %v1473_v63 = vld [vmem:[#allocation3 + $0x30] sm:$0xfe] }
 0x30f   :  { %1370 = vst.msk [vmem:[#allocation3 + $0x40] sm:$0xff] %vm1360_vm10, %v1347_v48  ;;  %1712 = vrot.lane.b32.xlu1 %v1660_v29, %s3063_s13  ;;  %v1391_v21 = vld [vmem:[#allocation3 + $0x38] sm:$0xff]  ;;  %v1610_v4 = vld [vmem:[#allocation3 + $0x30] sm:$0xfc]  ;;  %v1479_v40 = vmul.f32 %v3966_v33, %v1473_v63  ;;  %v1531_v45 = vrot.slane %v1473_v63, 1 }
 0x310   :  { %1371 = vst.msk [vmem:[#allocation3 + $0x48] sm:$0xff] %vm1362_vm11, %v1347_v48  ;;  %1412 = vrot.lane.b32.xlu2 %v1391_v21, %s3062_s4  ;;  %1447 = vrot.lane.b32.xlu0 %v1391_v21, %s3063_s13  ;;  %v4034_v53 = vld [vmem:[#allocation3 + $0x30] sm:$0xff]  ;;  %v1616_v14 = vmul.f32 %v3968_v16, %v1610_v4  ;;  %v1668_v41 = vrot.slane %v1610_v4, 2  ;;  %v1647_v61 = vld [vmem:[#allocation3 + $0x38] sm:$0xfc] }
 0x311   :  { %v1494_v31 = vrot.slane %v1479_v40, 1  ;;  %v1510_v11 = vld [vmem:[#allocation3 + $0x38] sm:$0xfe]  ;;  %v1671_v49 = vrot.slane %v1647_v61, 2  ;;  %v1755_v48 = vld [vmem:[#allocation15 + $0x58] sm:$0xff]  ;;  %v1754_v40 = vld [vmem:[#allocation15 + $0x50] sm:$0xff] }
 0x312   :  { %v1631_v26 = vrot.slane %v1616_v14, 2  ;;  %v1403_v57 = vpop.permute.xlu1 %1402  ;;  %v1534_v44 = vrot.slane %v1510_v11, 1  ;;  %2566 = vmatpush.msrb.mxu3 %v1755_v48  ;;  %v1753_v14 = vld [vmem:[#allocation15 + $0x48] sm:$0xff]  ;;  %1768 = vmatpush.msrb.mxu0 %v1755_v48  ;;  %v1746_v61 = vld [vmem:[#allocation15 + $0x10] sm:$0xff] }
 0x314   :  { %2567 = vmatpush.msrb.mxu3 %v1754_v40  ;;  %1769 = vmatpush.msrb.mxu0 %v1754_v40 }
 0x316   :  { %v4036_v12 = vld [vmem:[#allocation3 + $0x40] sm:$0xff]  ;;  %v1405_v20 = vpop.permute.xlu2 %1404  ;;  %2568 = vmatpush.msrb.mxu3 %v1753_v14  ;;  %1770 = vmatpush.msrb.mxu0 %v1753_v14 }
 0x317   :  { %1410 = vrot.lane.b32.xlu1 %v4034_v53, %s3062_s4  ;;  %v4041_v8 = vld [vmem:[#allocation3 + $0x48] sm:$0xff]  ;;  %v4046_v30 = vmul.f32 %v3966_v33, %v4036_v12  ;;  %v4054_v15 = vmul.f32 %v3968_v16, %v4036_v12  ;;  %v1532_v39 = vrot.slane %v4036_v12, 1  ;;  %v1669_v0 = vrot.slane %v4036_v12, 2 }
 0x318   :  { %1445 = vrot.lane.b32.xlu2 %v4034_v53, %s3063_s13  ;;  %1416 = vrot.lane.b32.xlu0 %v4041_v8, %s3062_s4  ;;  %v1419_v35 = vsel %vm1418_vm14, %v1403_v57, %v1405_v20  ;;  %v1672_v46 = vrot.slane %v4041_v8, 2  ;;  %v1535_v27 = vrot.slane %v4041_v8, 1  ;;  %v1748_v20 = vld [vmem:[#allocation15 + $0x20] sm:$0xff] }
 0x319   :  { %v1495_v52 = vrot.slane %v4046_v30, 1  ;;  %v1632_v9 = vrot.slane %v4054_v15, 2  ;;  %v1533_v51 = vsel %vm1488_vm12, %v1531_v45, %v1532_v39  ;;  %v1670_v5 = vsel %vm1625_vm13, %v1668_v41, %v1669_v0  ;;  %v1751_v15 = vld [vmem:[#allocation15 + $0x38] sm:$0xff]  ;;  %v1749_v45 = vld [vmem:[#allocation15 + $0x28] sm:$0xff] }
 0x31a   :  { %v1427_v59 = vmul.f32 %v4079_v13, %v1419_v35  ;;  %v4102_v6 = vsel %vm1625_vm13, %v1671_v49, %v1672_v46  ;;  %v1536_v32 = vsel %vm1488_vm12, %v1534_v44, %v1535_v27  ;;  %v1747_v35 = vld [vmem:[#allocation15 + $0x18] sm:$0xff] }
 0x31b   :  { %v4062_v19 = vsel %vm1488_vm12, %v1494_v31, %v1495_v52  ;;  %v4067_v56 = vsel %vm1625_vm13, %v1631_v26, %v1632_v9  ;;  %v1752_v31 = vld [vmem:[#allocation15 + $0x40] sm:$0xff] }
 0x31c   :  { %v1431_v23 = vadd.f32 %v1427_v59, %v1380_v43  ;;  %2569 = vmatpush.msrb.mxu3 %v1752_v31  ;;  %1771 = vmatpush.msrb.mxu0 %v1752_v31  ;;  %v1744_v59 = vld [vmem:[#allocation15] sm:$0xff] }
 0x31e   :  { %v1438_v2 = vpop.permute.xlu2 %1437  ;;  %2570 = vmatpush.msrb.mxu3 %v1751_v15  ;;  %1772 = vmatpush.msrb.mxu0 %v1751_v15 }
 0x31f   :  { %1549 = vrot.lane.b32.xlu1 %v1533_v51, %s3062_s4 }
 0x320   :  { %1414 = vrot.lane.b32.xlu2 %v4036_v12, %s3062_s4  ;;  %1451 = vrot.lane.b32.xlu0 %v4041_v8, %s3063_s13 }
 0x325   :  { %v1349_v10 = vpop.permute.xlu0 %1348 }
 0x326   :  { %1372 = vst.msk [vmem:[#allocation3 + $0x50] sm:$0x1] %vm1364_vm8, %v1349_v10 }
 0x327   :  { %1373 = vst.msk [vmem:[#allocation3 + $0x58] sm:$0x1] %vm1366_vm9, %v1349_v10  ;;  %1583 = vrot.lane.b32.xlu1 %v1533_v51, %s3063_s13 }
 0x328   :  { %1449 = vrot.lane.b32.xlu2 %v4036_v12, %s3063_s13  ;;  %1686 = vrot.lane.b32.xlu0 %v1670_v5, %s3062_s4 }
 0x32d   :  { %v1440_v24 = vpop.permute.xlu0 %1439  ;;  %v1474_v22 = vld [vmem:[#allocation3 + $0x50] sm:$0x1] }
 0x32e   :  { %v4104_v17 = vld [vmem:[#allocation3 + $0x50] sm:$0x3]  ;;  %v1454_v28 = vsel %vm1453_vm15, %v1438_v2, %v1440_v24  ;;  %v1511_v3 = vld [vmem:[#allocation3 + $0x58] sm:$0x1]  ;;  %v1481_v1 = vmul.f32 %v3966_v33, %v1474_v22 }
 0x32f   :  { %v1618_v37 = vmul.f32 %v3968_v16, %v4104_v17  ;;  %v1462_v55 = vmul.f32 %v4094_v25, %v1454_v28  ;;  %1688 = vrot.lane.b32.xlu1 %v4102_v6, %s3062_s4  ;;  %v1539_v58 = vrot.slane %v1511_v3, 1  ;;  %v1648_v30 = vld [vmem:[#allocation3 + $0x58] sm:$0x3]  ;;  %v1674_v26 = vrot.slane %v4104_v17, 2 }
 0x330   :  { %v1497_v29 = vrot.slane %v1481_v1, 1  ;;  %1551 = vrot.lane.b32.xlu2 %v1536_v32, %s3062_s4 }
 0x331   :  { %v1634_v38 = vrot.slane %v1618_v37, 2  ;;  %v1466_v33 = vadd.f32 %v1462_v55, %v1431_v23  ;;  %v1540_v16 = vsel %vm1488_vm12, %v1535_v27, %v1539_v58  ;;  %v1675_v57 = vsel %vm1625_vm13, %v1669_v0, %v1674_v26 }
 0x332   :  { %1555 = vrot.lane.b32.xlu0 %v1540_v16, %s3062_s4  ;;  %v4120_v21 = vsel %vm1488_vm12, %v1495_v52, %v1497_v29  ;;  %v1537_v52 = vrot.slane %v1474_v22, 1  ;;  %v1381_v0 = vmul.f32 %v4087_v7, %v3973_v34  ;;  %v4155_v22 = vld [vmem:[#allocation13 + $0x4] ss:$0 sm:$0xff] }
 0x333   :  { %v4125_v63 = vsel %vm1625_vm13, %v1632_v9, %v1634_v38  ;;  %v4128_v4 = vadd.f32 %v3996_v18, %v1466_v33  ;;  %v1676_v18 = vrot.slane %v1648_v30, 2  ;;  %v1750_v9 = vld [vmem:[#allocation15 + $0x30] sm:$0xff]  ;;  %v4171_v33 = vld [vmem:[#allocation13 + $0x8] ss:$0 sm:$0xff] }
 0x334   :  { %2571 = vmatpush.msrb.mxu3 %v1750_v9  ;;  %1773 = vmatpush.msrb.mxu0 %v1750_v9  ;;  %v1538_v10 = vsel %vm1488_vm12, %v1532_v39, %v1537_v52  ;;  %v1745_v39 = vld [vmem:[#allocation15 + $0x8] sm:$0xff] }
 0x335   :  { %v1677_v51 = vsel %vm1625_vm13, %v1672_v46, %v1676_v18 }
 0x336   :  { %2572 = vmatpush.msrb.mxu3 %v1749_v45  ;;  %1774 = vmatpush.msrb.mxu0 %v1749_v45 }
 0x337   :  { %1720 = vrot.lane.b32.xlu1 %v1670_v5, %s3063_s13  ;;  %v1409_v5 = vpop.permute.xlu2 %1408 }
 0x338   :  { %1585 = vrot.lane.b32.xlu2 %v1536_v32, %s3063_s13  ;;  %2573 = vmatpush.msrb.mxu3 %v1748_v20  ;;  %v4167_v32 = vld [vmem:[#allocation13 + $0x7] ss:$0 sm:$0xff] }
 0x339   :  { %1775 = vmatpush.msrb.mxu0 %v1748_v20 }
 0x33a   :  { %1589 = vrot.lane.b32.xlu0 %v1540_v16, %s3063_s13  ;;  %2574 = vmatpush.msrb.mxu3 %v1747_v35 }
 0x33b   :  { %1776 = vmatpush.msrb.mxu0 %v1747_v35 }
 0x33c   :  { %2575 = vmatpush.msrb.mxu3 %v1746_v61 }
 0x33d   :  { %1777 = vmatpush.msrb.mxu0 %v1746_v61 }
 0x33e   :  { %2576 = vmatpush.msrb.mxu3 %v1745_v39 }
 0x33f   :  { %1692 = vrot.lane.b32.xlu1 %v1677_v51, %s3062_s4  ;;  %1778 = vmatpush.msrb.mxu0 %v1745_v39  ;;  %v1546_v24 = vpop.permute.xlu2 %1545 }
 0x340   :  { %1553 = vrot.lane.b32.xlu2 %v1538_v10, %s3062_s4  ;;  %2577 = vmatpush.msrb.mxu3 %v1744_v59 }
 0x341   :  { %v1442_v41 = vpop.permute.xlu0 %1441  ;;  %v1407_v8 = vpop.permute.xlu1 %1406  ;;  %1779 = vmatpush.msrb.mxu0 %v1744_v59 }
 0x342   :  { %1690 = vrot.lane.b32.xlu0 %v1675_v57, %s3062_s4  ;;  %v1420_v46 = vsel %vm1418_vm14, %v1407_v8, %v1409_v5 }
 0x343   :  { %v1428_v50 = vmul.f32 %v4079_v13, %v1420_v46 }
 0x345   :  { %v1432_v43 = vadd.f32 %v1428_v50, %v1381_v0 }
 0x347   :  { %v1578_v42 = vpop.permute.xlu2 %1577 }
 0x348   :  { %1722 = vrot.lane.b32.xlu2 %v4102_v6, %s3063_s13 }
 0x349   :  { %v1548_v11 = vpop.permute.xlu0 %1547  ;;  %v1444_v49 = vpop.permute.xlu1 %1443 }
 0x34a   :  { %1726 = vrot.lane.b32.xlu0 %v1677_v51, %s3063_s13  ;;  %v1455_v27 = vsel %vm1453_vm15, %v1442_v41, %v1444_v49  ;;  %v1558_v34 = vsel %vm1418_vm14, %v1546_v24, %v1548_v11  ;;  %v1382_v24 = vmul.f32 %v4087_v7, %v4034_v53 }
 0x34b   :  { %v1463_v2 = vmul.f32 %v4094_v25, %v1455_v27  ;;  %v1566_v28 = vmul.f32 %v4155_v22, %v1558_v34 }
 0x34d   :  { %v1467_v17 = vadd.f32 %v1463_v2, %v1432_v43 }
 0x34f   :  { %v1504_v6 = vadd.f32 %v3990_v60, %v1467_v17  ;;  %v1715_v14 = vpop.permute.xlu2 %1714 }
 0x350   :  { %1587 = vrot.lane.b32.xlu2 %v1538_v10, %s3063_s13 }
 0x351   :  { %v1580_v44 = vpop.permute.xlu0 %1579  ;;  %v1582_v3 = vpop.permute.xlu1 %1581  ;;  %v1570_v37 = vadd.f32 %v1566_v28, %v1504_v6 }
 0x352   :  { %v1592_v1 = vsel %vm1453_vm15, %v1580_v44, %v1582_v3 }
 0x353   :  { %v1600_v23 = vmul.f32 %v4159_v47, %v1592_v1 }
 0x355   :  { %v1604_v55 = vadd.f32 %v1600_v23, %v1570_v37 }
 0x357   :  { %v1641_v58 = vadd.f32 %v3993_v36, %v1604_v55 }
 0x358   :  { %1724 = vrot.lane.b32.xlu2 %v1675_v57, %s3063_s13 }
 0x359   :  { %v1683_v60 = vpop.permute.xlu0 %1682  ;;  %v1685_v62 = vpop.permute.xlu1 %1684 }
 0x35a   :  { %v1695_v29 = vsel %vm1418_vm14, %v1683_v60, %v1685_v62 }
 0x35b   :  { %v1703_v38 = vmul.f32 %v4167_v32, %v1695_v29 }
 0x35d   :  { %v1707_v30 = vadd.f32 %v1703_v38, %v1641_v58  ;;  %v1383_v58 = vmul.f32 %v4087_v7, %v4036_v12 }
 0x361   :  { %v1717_v16 = vpop.permute.xlu0 %1716  ;;  %v1719_v48 = vpop.permute.xlu1 %1718 }
 0x362   :  { %v1729_v40 = vsel %vm1453_vm15, %v1717_v16, %v1719_v48 }
 0x363   :  { %v1737_v36 = vmul.f32 %v4171_v33, %v1729_v40 }
 0x365   :  { %v1741_v31 = vadd.f32 %v1737_v36, %v1707_v30 }
 0x367   :  { %1783 = vmatmul.f32.vlgmr.msrb.gmra.mxu3 %v1741_v31 }
 0x369   :  { %v1542_v15 = vpop.permute.xlu0 %1541  ;;  %v1544_v18 = vpop.permute.xlu1 %1543 }
 0x36a   :  { %v1413_v52 = vpop.permute.xlu2 %1412  ;;  %v1557_v26 = vsel %vm1418_vm14, %v1542_v15, %v1544_v18 }
 0x36b   :  { %v1565_v9 = vmul.f32 %v4155_v22, %v1557_v26 }
 0x36d   :  { %v1569_v20 = vadd.f32 %v1565_v9, %v4128_v4 }
 0x371   :  { %v1576_v45 = vpop.permute.xlu1 %1575  ;;  %v1679_v5 = vpop.permute.xlu0 %1678 }
 0x372   :  { %v1591_v51 = vsel %vm1453_vm15, %v1576_v45, %v1578_v42  ;;  %v1446_v10 = vpop.permute.xlu2 %1445 }
 0x373   :  { %v1599_v41 = vmul.f32 %v4159_v47, %v1591_v51 }
 0x375   :  { %v1603_v57 = vadd.f32 %v1599_v41, %v1569_v20 }
 0x377   :  { %v1640_v8 = vadd.f32 %v3999_v54, %v1603_v57 }
 0x379   :  { %v1681_v35 = vpop.permute.xlu1 %1680 }
 0x37a   :  { %v1415_v61 = vpop.permute.xlu2 %1414  ;;  %v1694_v46 = vsel %vm1418_vm14, %v1679_v5, %v1681_v35 }
 0x37b   :  { %v1702_v39 = vmul.f32 %v4167_v32, %v1694_v46 }
 0x37d   :  { %v1706_v0 = vadd.f32 %v1702_v39, %v1640_v8 }
 0x381   :  { %v1713_v50 = vpop.permute.xlu1 %1712 }
 0x382   :  { %v1728_v59 = vsel %vm1453_vm15, %v1713_v50, %v1715_v14  ;;  %v1450_v11 = vpop.permute.xlu2 %1449  ;;  %v1448_v49 = vpop.permute.xlu0 %1447 }
 0x383   :  { %v1736_v4 = vmul.f32 %v4171_v33, %v1728_v59  ;;  %v1456_v54 = vsel %vm1453_vm15, %v1446_v10, %v1448_v49 }
 0x384   :  { %v1464_v28 = vmul.f32 %v4094_v25, %v1456_v54 }
 0x385   :  { %v1740_v27 = vadd.f32 %v1736_v4, %v1706_v0 }
 0x387   :  { %1780 = vmatmul.f32.vlgmr.msrb.gmra.mxu0 %v1740_v27 }
 0x389   :  { %v1411_v43 = vpop.permute.xlu1 %1410 }
 0x38a   :  { %v1421_v2 = vsel %vm1418_vm14, %v1411_v43, %v1413_v52  ;;  %v1552_v17 = vpop.permute.xlu2 %1551  ;;  %v1417_v34 = vpop.permute.xlu0 %1416 }
 0x38b   :  { %v1429_v6 = vmul.f32 %v4079_v13, %v1421_v2  ;;  %v1422_v3 = vsel %vm1418_vm14, %v1415_v61, %v1417_v34 }
 0x38c   :  { %v1430_v37 = vmul.f32 %v4079_v13, %v1422_v3 }
 0x38d   :  { %v1433_v44 = vadd.f32 %v1429_v6, %v1382_v24  ;;  %v3064_v6 = vmov -inf  }
 0x38e   :  { %v1434_v29 = vadd.f32 %v1430_v37, %v1383_v58  ;;  %1797 = vst [vmem:[#allocation4 + $0x20] sm:$0x3] %v3064_v6 }
 0x38f   :  { %v1468_v1 = vadd.f32 %v1464_v28, %v1433_v44  ;;  %1798 = vst.msk [vmem:[#allocation4 + $0x28] sm:$0x3] %vm1315_vm5, %v3064_v6 }
 0x390   :  { %1793 = vst [vmem:[#allocation4] sm:$0xff] %v3064_v6 }
 0x391   :  { %v1505_v23 = vadd.f32 %v4062_v19, %v1468_v1  ;;  %v1550_v55 = vpop.permute.xlu1 %1549  ;;  %1794 = vst.msk [vmem:[#allocation4 + $0x8] sm:$0xff] %vm669_vm3, %v3064_v6 }
 0x392   :  { %v1586_v42 = vpop.permute.xlu2 %1585  ;;  %v1452_v53 = vpop.permute.xlu0 %1451  ;;  %v1559_v62 = vsel %vm1418_vm14, %v1550_v55, %v1552_v17  ;;  %1795 = vst [vmem:[#allocation4 + $0x10] sm:$0xff] %v3064_v6 }
 0x393   :  { %v1457_v60 = vsel %vm1453_vm15, %v1450_v11, %v1452_v53  ;;  %v1567_v48 = vmul.f32 %v4155_v22, %v1559_v62  ;;  %1796 = vst.msk [vmem:[#allocation4 + $0x18] sm:$0xff] %vm669_vm3, %v3064_v6 }
 0x394   :  { %v1465_v38 = vmul.f32 %v4094_v25, %v1457_v60  ;;  %1799 = vst [vmem:[#allocation4 + $0x30] sm:$0xff] %v3064_v6 }
 0x395   :  { %v1571_v14 = vadd.f32 %v1567_v48, %v1505_v23  ;;  %1800 = vst.msk [vmem:[#allocation4 + $0x38] sm:$0xff] %vm669_vm3, %v3064_v6 }
 0x396   :  { %v1469_v16 = vadd.f32 %v1465_v38, %v1434_v29  ;;  %1801 = vst [vmem:[#allocation4 + $0x40] sm:$0xff] %v3064_v6 }
 0x397   :  { %1802 = vst.msk [vmem:[#allocation4 + $0x48] sm:$0xff] %vm669_vm3, %v3064_v6 }
 0x398   :  { %v1506_v13 = vadd.f32 %v4120_v21, %v1469_v16  ;;  %1803 = vst [vmem:[#allocation4 + $0x50] sm:$0x3] %v3064_v6 }
 0x399   :  { %v1584_v40 = vpop.permute.xlu1 %1583  ;;  %1804 = vst.msk [vmem:[#allocation4 + $0x58] sm:$0x3] %vm1315_vm5, %v3064_v6 }
 0x39a   :  { %v1593_v19 = vsel %vm1453_vm15, %v1584_v40, %v1586_v42  ;;  %v1554_v30 = vpop.permute.xlu2 %1553  ;;  %v1687_v7 = vpop.permute.xlu0 %1686 }
 0x39b   :  { %v1601_v12 = vmul.f32 %v4159_v47, %v1593_v19 }
 0x39d   :  { %v1605_v36 = vadd.f32 %v1601_v12, %v1571_v14 }
 0x39f   :  { %v1642_v31 = vadd.f32 %v4067_v56, %v1605_v36 }
 0x3a1   :  { %v1689_v15 = vpop.permute.xlu1 %1688 }
 0x3a2   :  { %v1723_v18 = vpop.permute.xlu2 %1722  ;;  %v1696_v25 = vsel %vm1418_vm14, %v1687_v7, %v1689_v15 }
 0x3a3   :  { %v1704_v26 = vmul.f32 %v4167_v32, %v1696_v25 }
 0x3a4   :  { %v1556_v52 = vpop.permute.xlu0 %1555 }
 0x3a5   :  { %v1560_v9 = vsel %vm1418_vm14, %v1554_v30, %v1556_v52  ;;  %v1708_v10 = vadd.f32 %v1704_v26, %v1642_v31 }
 0x3a6   :  { %v1568_v45 = vmul.f32 %v4155_v22, %v1560_v9 }
 0x3a8   :  { %v1572_v35 = vadd.f32 %v1568_v45, %v1506_v13 }
 0x3a9   :  { %v1721_v21 = vpop.permute.xlu1 %1720 }
 0x3aa   :  { %v1730_v51 = vsel %vm1453_vm15, %v1721_v21, %v1723_v18  ;;  %v1588_v41 = vpop.permute.xlu2 %1587 }
 0x3ab   :  { %v1738_v20 = vmul.f32 %v4171_v33, %v1730_v51 }
 0x3ac   :  { %v1590_v57 = vpop.permute.xlu0 %1589 }
 0x3ad   :  { %v1594_v56 = vsel %vm1453_vm15, %v1588_v41, %v1590_v57  ;;  %v1742_v8 = vadd.f32 %v1738_v20, %v1708_v10 }
 0x3ae   :  { %v1602_v5 = vmul.f32 %v4159_v47, %v1594_v56  ;;  %v2750_v47 = vld [vmem:[#allocation16] ss:$0 sm:$0xff] }
 0x3af   :  { %1786 = vmatmul.f32.gmra.mxu3 %v1742_v8 }
 0x3b0   :  { %v1606_v61 = vadd.f32 %v1602_v5, %v1572_v35 }
 0x3b1   :  { %v1693_v50 = vpop.permute.xlu1 %1692 }
 0x3b2   :  { %v1643_v46 = vadd.f32 %v4125_v63, %v1606_v61  ;;  %v1725_v0 = vpop.permute.xlu2 %1724 }
 0x3b4   :  { %v1691_v39 = vpop.permute.xlu0 %1690 }
 0x3b5   :  { %v1697_v22 = vsel %vm1418_vm14, %v1691_v39, %v1693_v50 }
 0x3b6   :  { %v1705_v59 = vmul.f32 %v4167_v32, %v1697_v22 }
 0x3b8   :  { %v1709_v27 = vadd.f32 %v1705_v59, %v1643_v46 }
 0x3bc   :  { %v1727_v11 = vpop.permute.xlu0 %1726 }
 0x3bd   :  { %v1731_v49 = vsel %vm1453_vm15, %v1725_v0, %v1727_v11 }
 0x3be   :  { %v1739_v4 = vmul.f32 %v4171_v33, %v1731_v49 }
 0x3c0   :  { %v1743_v43 = vadd.f32 %v1739_v4, %v1709_v27 }
 0x3c2   :  { %1789 = vmatmul.f32.gmra.mxu3 %v1743_v43 }
 0x3ea   :  { %v1784_v54 = vpop.f32.mrf.mxu3 }
 0x3eb   :  { %v1785_v2 = vadd.f32 %v2750_v47, %v1784_v54 }
 0x3ed   :  { %v1810_v24 = vrot.slane %v1785_v2, 7 }
 0x3ef   :  { %1819 = vrot.lane.b32.xlu2 %v1810_v24, %s3047_s26 }
 0x404   :  { %v1781_v63 = vpop.f32.mrf.mxu0 }
 0x405   :  { %v1782_v17 = vadd.f32 %v2750_v47, %v1781_v63 }
 0x407   :  { %v1809_v34 = vrot.slane %v1782_v17, 7 }
 0x409   :  { %v1811_v32 = vsel %vm1331_vm4, %v1809_v34, %v1810_v24 }
 0x40a   :  { %1817 = vrot.lane.b32.xlu1 %v1811_v32, %s3047_s26 }
 0x432   :  { %v1787_v33 = vpop.f32.mrf.mxu3 }
 0x433   :  { %v1788_v28 = vadd.f32 %v2750_v47, %v1787_v33 }
 0x435   :  { %v1812_v44 = vrot.slane %v1788_v28, 7 }
 0x437   :  { %1821 = vrot.lane.b32.xlu0 %v1812_v44, %s3047_s26 }
 0x43f   :  { %1815 = vrot.lane.b32.xlu0 %v1809_v34, %s3047_s26 }
 0x445   :  { %v1790_v3 = vpop.f32.mrf.mxu3 }
 0x446   :  { %v1791_v1 = vadd.f32 %v2750_v47, %v1790_v3 }
 0x448   :  { %v1813_v37 = vrot.slane %v1791_v1, 7 }
 0x449   :  { %v1820_v23 = vpop.permute.xlu2 %1819 }
 0x44a   :  { %1837 = vst.msk [vmem:[#allocation4 + $0x20] sm:$0x1] %vm1364_vm8, %v1820_v23  ;;  %1825 = vrot.lane.b32.xlu2 %v1813_v37, %s3047_s26  ;;  %v1814_v55 = vsel %vm1331_vm4, %v1812_v44, %v1813_v37 }
 0x44b   :  { %1838 = vst.msk [vmem:[#allocation4 + $0x28] sm:$0x1] %vm1366_vm9, %v1820_v23  ;;  %1823 = vrot.lane.b32.xlu1 %v1814_v55, %s3047_s26 }
 0x451   :  { %v1918_v42 = vld [vmem:[#allocation4 + $0x20] sm:$0x1] }
 0x452   :  { %v1944_v53 = vld [vmem:[#allocation4 + $0x28] sm:$0x1]  ;;  %v1928_v38 = vrot.slane %v1918_v42, 1  ;;  %v2018_v13 = vld [vmem:[#allocation4 + $0x20] sm:$0x3] }
 0x453   :  { %v1954_v40 = vrot.slane %v1944_v53, 1  ;;  %v2044_v19 = vld [vmem:[#allocation4 + $0x28] sm:$0x3]  ;;  %v2028_v31 = vrot.slane %v2018_v13, 2 }
 0x454   :  { %v2054_v15 = vrot.slane %v2044_v19, 2 }
 0x47c   :  { %v1818_v58 = vpop.permute.xlu1 %1817 }
 0x47d   :  { %1835 = vst.msk [vmem:[#allocation4 + $0x10] sm:$0xff] %vm1360_vm10, %v1818_v58 }
 0x47e   :  { %1836 = vst.msk [vmem:[#allocation4 + $0x18] sm:$0xff] %vm1362_vm11, %v1818_v58 }
 0x484   :  { %v4235_v60 = vld [vmem:[#allocation4 + $0x10] sm:$0xff] }
 0x485   :  { %v4237_v62 = vld [vmem:[#allocation4 + $0x18] sm:$0xff]  ;;  %v1926_v29 = vrot.slane %v4235_v60, 1  ;;  %v2026_v30 = vrot.slane %v4235_v60, 2 }
 0x486   :  { %v2625_v16 = vpack.i.bf16 %v4237_v62, %v4235_v60  ;;  %v1952_v48 = vrot.slane %v4237_v62, 1  ;;  %v2052_v12 = vrot.slane %v4237_v62, 2  ;;  %v2131_v62 = vld [vmem:[#allocation18 + $0x70] sm:$0xff] }
 0x487   :  { %v4244_v14 = vsel %vm1488_vm12, %v1926_v29, %v1928_v38  ;;  %v4255_v18 = vsel %vm1625_vm13, %v2026_v30, %v2028_v31 }
 0x488   :  { %2626 = vrot.lane.b32.xlu1 %v2625_v16, %s3062_s4  ;;  %v1955_v7 = vsel %vm1488_vm12, %v1952_v48, %v1954_v40  ;;  %v2055_v25 = vsel %vm1625_vm13, %v2052_v12, %v2054_v15 }
 0x489   :  { %v2635_v36 = vpack.i.bf16 %v1955_v7, %v4244_v14  ;;  %v2645_v52 = vpack.i.bf16 %v2055_v25, %v4255_v18 }
 0x48b   :  { %2636 = vrot.lane.b32.xlu0 %v2635_v36, %s3062_s4 }
 0x490   :  { %2646 = vrot.lane.b32.xlu1 %v2645_v52, %s3062_s4 }
 0x493   :  { %2651 = vrot.lane.b32.xlu0 %v2645_v52, %s3063_s13 }
 0x4a4   :  { %v1826_v26 = vpop.permute.xlu2 %1825 }
 0x4a5   :  { %1843 = vst.msk [vmem:[#allocation4 + $0x50] sm:$0x1] %vm1364_vm8, %v1826_v26 }
 0x4a6   :  { %1844 = vst.msk [vmem:[#allocation4 + $0x58] sm:$0x1] %vm1366_vm9, %v1826_v26 }
 0x4a9   :  { %v1822_v9 = vpop.permute.xlu0 %1821 }
 0x4aa   :  { %1839 = vst.msk [vmem:[#allocation4 + $0x30] sm:$0xfe] %vm1356_vm6, %v1822_v9 }
 0x4ab   :  { %1840 = vst.msk [vmem:[#allocation4 + $0x38] sm:$0xfe] %vm1358_vm7, %v1822_v9  ;;  %v2145_v9 = vld [vmem:[#allocation21 + $0x18] sm:$0xff] }
 0x4ac   :  { %v1920_v39 = vld [vmem:[#allocation4 + $0x50] sm:$0x1]  ;;  %2172 = vmatpush.msrb.mxu1 %v2145_v9  ;;  %v2231_v9 = vld [vmem:[#allocation5 + $0x68] sm:$0xff] }
 0x4ad   :  { %v1946_v50 = vld [vmem:[#allocation4 + $0x58] sm:$0x1]  ;;  %v1933_v49 = vrot.slane %v1920_v39, 1  ;;  %v2233_v39 = vld [vmem:[#allocation21 + $0x20] sm:$0xff] }
 0x4ae   :  { %v1959_v4 = vrot.slane %v1946_v50, 1  ;;  %v2126_v50 = vld [vmem:[#allocation18 + $0x48] sm:$0xff] }
 0x4b1   :  { %v1816_v21 = vpop.permute.xlu0 %1815  ;;  %v4267_v45 = vld [vmem:[#allocation4 + $0x30] sm:$0xff] }
 0x4b2   :  { %1833 = vst.msk [vmem:[#allocation4] sm:$0xfe] %vm1356_vm6, %v1816_v21  ;;  %v1851_v51 = vld [vmem:[#allocation4 + $0x38] sm:$0xff]  ;;  %v1919_v27 = vld [vmem:[#allocation4 + $0x30] sm:$0xfe] }
 0x4b3   :  { %1834 = vst.msk [vmem:[#allocation4 + $0x8] sm:$0xfe] %vm1358_vm7, %v1816_v21  ;;  %v2655_v20 = vpack.i.bf16 %v1851_v51, %v4267_v45  ;;  %v1945_v43 = vld [vmem:[#allocation4 + $0x38] sm:$0xfe]  ;;  %v1930_v63 = vrot.slane %v1919_v27, 1  ;;  %v2132_v51 = vld [vmem:[#allocation18 + $0x78] sm:$0xff] }
 0x4b4   :  { %v1956_v17 = vrot.slane %v1945_v43, 1  ;;  %v2019_v6 = vld [vmem:[#allocation4 + $0x30] sm:$0xfc]  ;;  %v2045_v33 = vld [vmem:[#allocation4 + $0x38] sm:$0xfc]  ;;  %v2134_v27 = vld [vmem:[#allocation5 + $0x8] sm:$0xff] }
 0x4b5   :  { %2656 = vrot.lane.b32.xlu1 %v2655_v20, %s3062_s4  ;;  %2661 = vrot.lane.b32.xlu0 %v2655_v20, %s3063_s13  ;;  %v2030_v37 = vrot.slane %v2019_v6, 2  ;;  %v2056_v23 = vrot.slane %v2045_v33, 2  ;;  %v2144_v21 = vld [vmem:[#allocation21 + $0x10] sm:$0xff]  ;;  %v2119_v6 = vld [vmem:[#allocation18 + $0x10] sm:$0xff]  ;;  %v2118_v33 = vld [vmem:[#allocation18 + $0x8] sm:$0xff] }
 0x4b6   :  { %2173 = vmatpush.msrb.mxu1 %v2144_v21  ;;  %v2129_v20 = vld [vmem:[#allocation18 + $0x60] sm:$0xff] }
 0x4b7   :  { %v2285_v43 = vld [vmem:[#allocation21 + $0x30] sm:$0xff] }
 0x4b8   :  { %2578 = vmatpush.msra.mxu1 %v2132_v51  ;;  %v2282_v21 = vld [vmem:[#allocation5 + $0x70] sm:$0xff] }
 0x4b9   :  { %v4274_v10 = vld [vmem:[#allocation4] sm:$0xff] }
 0x4ba   :  { %v1849_v41 = vld [vmem:[#allocation4 + $0x8] sm:$0xff]  ;;  %v1917_v35 = vld [vmem:[#allocation4] sm:$0xfe]  ;;  %2579 = vmatpush.msra.mxu1 %v2131_v62 }
 0x4bb   :  { %v4277_v57 = vpack.i.bf16 %v1849_v41, %v4274_v10  ;;  %v1943_v5 = vld [vmem:[#allocation4 + $0x8] sm:$0xfe]  ;;  %v1925_v22 = vrot.slane %v1917_v35, 1  ;;  %v2140_v41 = vld [vmem:[#allocation5 + $0x18] sm:$0xff] }
 0x4bc   :  { %v1951_v59 = vrot.slane %v1943_v5, 1  ;;  %v2043_v38 = vld [vmem:[#allocation4 + $0x8] sm:$0xfc] }
 0x4bd   :  { %2621 = vrot.lane.b32.xlu2 %v4277_v57, %s3062_s4  ;;  %v1824_v56 = vpop.permute.xlu1 %1823  ;;  %v4291_v47 = vsel %vm1488_vm12, %v1925_v22, %v1926_v29  ;;  %v2017_v29 = vld [vmem:[#allocation4] sm:$0xfc]  ;;  %v2051_v13 = vrot.slane %v2043_v38, 2  ;;  %v2234_v5 = vld [vmem:[#allocation21 + $0x28] sm:$0xff] }
 0x4be   :  { %1841 = vst.msk [vmem:[#allocation4 + $0x40] sm:$0xff] %vm1360_vm10, %v1824_v56  ;;  %v1953_v54 = vsel %vm1488_vm12, %v1951_v59, %v1952_v48  ;;  %v2046_v48 = vld [vmem:[#allocation4 + $0x58] sm:$0x3]  ;;  %v2025_v40 = vrot.slane %v2017_v29, 2  ;;  %v2137_v35 = vld [vmem:[#allocation21] sm:$0xff]  ;;  %2261 = vmatpush.msra.mxu3 %v2234_v5 }
 0x4bf   :  { %1842 = vst.msk [vmem:[#allocation4 + $0x48] sm:$0xff] %vm1362_vm11, %v1824_v56  ;;  %v2690_v34 = vpack.i.bf16 %v1953_v54, %v4291_v47  ;;  %v2059_v7 = vrot.slane %v2046_v48, 2  ;;  %v2053_v25 = vsel %vm1625_vm13, %v2051_v13, %v2052_v12  ;;  %v2130_v12 = vld [vmem:[#allocation18 + $0x68] sm:$0xff]  ;;  %v2128_v56 = vld [vmem:[#allocation18 + $0x58] sm:$0xff]  ;;  %v2125_v59 = vld [vmem:[#allocation18 + $0x40] sm:$0xff] }
 0x4c0   :  { %v4327_v15 = vsel %vm1625_vm13, %v2025_v40, %v2026_v30  ;;  %v2139_v30 = vld [vmem:[#allocation5 + $0x10] sm:$0xff]  ;;  %2580 = vmatpush.msra.mxu1 %v2130_v12  ;;  %2262 = vmatpush.msra.mxu3 %v2233_v39  ;;  %v2228_v22 = vld [vmem:[#allocation5 + $0x20] sm:$0xff] }
 0x4c1   :  { %v2735_v26 = vpack.i.bf16 %v2053_v25, %v4327_v15  ;;  %2544 = vmatmul.msk.f32.vlgmr.msrb.gmra.mxu1 %vm669_vm3, %v2139_v30  ;;  %2552 = vmatmul.msk.f32.vlgmr.msra.gmra.mxu3 %vm669_vm3, %v2228_v22  ;;  %v2122_v54 = vld [vmem:[#allocation18 + $0x28] sm:$0xff] }
 0x4c2   :  { %2581 = vmatpush.msra.mxu1 %v2129_v20  ;;  %v2230_v29 = vld [vmem:[#allocation5 + $0x60] sm:$0xff] }
 0x4c4   :  { %2582 = vmatpush.msra.mxu1 %v2128_v56 }
 0x4c5   :  { %2631 = vrot.lane.b32.xlu2 %v2625_v16, %s3063_s13  ;;  %v4284_v8 = vld [vmem:[#allocation4 + $0x40] sm:$0xff]  ;;  %v2020_v16 = vld [vmem:[#allocation4 + $0x50] sm:$0x3] }
 0x4c6   :  { %v1852_v61 = vld [vmem:[#allocation4 + $0x48] sm:$0xff]  ;;  %v1931_v0 = vrot.slane %v4284_v8, 1  ;;  %v2031_v3 = vrot.slane %v4284_v8, 2  ;;  %v2033_v19 = vrot.slane %v2020_v16, 2 }
 0x4c7   :  { %v2670_v46 = vpack.i.bf16 %v1852_v61, %v4284_v8  ;;  %v1957_v11 = vrot.slane %v1852_v61, 1  ;;  %v2057_v1 = vrot.slane %v1852_v61, 2  ;;  %v2133_v61 = vld [vmem:[#allocation5] sm:$0xff] }
 0x4c8   :  { %v4295_v2 = vsel %vm1488_vm12, %v1931_v0, %v1933_v49  ;;  %v4302_v28 = vsel %vm1488_vm12, %v1930_v63, %v1931_v0  ;;  %v4310_v58 = vsel %vm1625_vm13, %v2030_v37, %v2031_v3  ;;  %v2141_v0 = vld [vmem:[#allocation5 + $0x50] sm:$0xff]  ;;  %v2286_v49 = vld [vmem:[#allocation21 + $0x38] sm:$0xff] }
 0x4c9   :  { %2671 = vrot.lane.b32.xlu0 %v2670_v46, %s3063_s13  ;;  %2666 = vrot.lane.b32.xlu1 %v2670_v46, %s3062_s4  ;;  %v1960_v24 = vsel %vm1488_vm12, %v1957_v11, %v1959_v4  ;;  %v1958_v44 = vsel %vm1488_vm12, %v1956_v17, %v1957_v11  ;;  %v2058_v42 = vsel %vm1625_vm13, %v2056_v23, %v2057_v1  ;;  %v2127_v46 = vld [vmem:[#allocation18 + $0x50] sm:$0xff]  ;;  %v2124_v11 = vld [vmem:[#allocation18 + $0x38] sm:$0xff]  ;;  %v2121_v17 = vld [vmem:[#allocation18 + $0x20] sm:$0xff] }
 0x4ca   :  { %v2700_v32 = vpack.i.bf16 %v1960_v24, %v4295_v2  ;;  %v2675_v55 = vpack.i.bf16 %v1958_v44, %v4302_v28  ;;  %v2695_v53 = vpack.i.bf16 %v2058_v42, %v4310_v58  ;;  %v2060_v31 = vsel %vm1625_vm13, %v2057_v1, %v2059_v7  ;;  %2545 = vmatmul.msk.f32.gmra.mxu1 %vm669_vm3, %v2140_v41  ;;  %v2123_v4 = vld [vmem:[#allocation18 + $0x30] sm:$0xff]  ;;  %v2280_v63 = vld [vmem:[#allocation5 + $0x30] sm:$0xff]  ;;  %v2281_v44 = vld [vmem:[#allocation5 + $0x38] sm:$0xff] }
 0x4cb   :  { %2583 = vmatpush.msra.mxu1 %v2127_v46  ;;  %2313 = vmatpush.msra.mxu0 %v2286_v49  ;;  %v2229_v24 = vld [vmem:[#allocation5 + $0x28] sm:$0xff]  ;;  %v2135_v42 = vld [vmem:[#allocation5 + $0x40] sm:$0xff] }
 0x4cc   :  { %2553 = vmatmul.msk.f32.gmra.mxu3 %vm669_vm3, %v2229_v24 }
 0x4cd   :  { %2641 = vrot.lane.b32.xlu2 %v2635_v36, %s3063_s13  ;;  %v4321_v36 = vsel %vm1625_vm13, %v2031_v3, %v2033_v19  ;;  %2584 = vmatpush.msra.mxu1 %v2126_v50  ;;  %v2117_v3 = vld [vmem:[#allocation18] sm:$0xff] }
 0x4ce   :  { %v2725_v52 = vpack.i.bf16 %v2060_v31, %v4321_v36  ;;  %2314 = vmatpush.msra.mxu0 %v2285_v43  ;;  %v2136_v31 = vld [vmem:[#allocation5 + $0x48] sm:$0xff] }
 0x4cf   :  { %2585 = vmatpush.msra.mxu1 %v2125_v59  ;;  %2556 = vmatmul.msk.f32.vlgmr.msra.gmra.mxu0 %vm669_vm3, %v2280_v63 }
 0x4d0   :  { %2332 = vmatpush.msrb.mxu0 %v2132_v51 }
 0x4d1   :  { %2691 = vrot.lane.b32.xlu1 %v2690_v34, %s3062_s4  ;;  %2701 = vrot.lane.b32.xlu0 %v2700_v32, %s3062_s4 }
 0x4d2   :  { %2546 = vmatmul.msk.f32.gmra.mxu1 %vm669_vm3, %v2141_v0  ;;  %2333 = vmatpush.msrb.mxu0 %v2131_v62 }
 0x4d3   :  { %2586 = vmatpush.msra.mxu1 %v2124_v11 }
 0x4d4   :  { %2334 = vmatpush.msrb.mxu0 %v2130_v12  ;;  %2554 = vmatmul.msk.f32.gmra.mxu3 %vm669_vm3, %v2230_v29 }
 0x4d5   :  { %2676 = vrot.lane.b32.xlu2 %v2675_v55, %s3062_s4  ;;  %2587 = vmatpush.msra.mxu1 %v2123_v4 }
 0x4d6   :  { %2335 = vmatpush.msrb.mxu0 %v2129_v20 }
 0x4d7   :  { %2588 = vmatpush.msra.mxu1 %v2122_v54  ;;  %2557 = vmatmul.msk.f32.gmra.mxu0 %vm669_vm3, %v2281_v44 }
 0x4d8   :  { %2336 = vmatpush.msrb.mxu0 %v2128_v56 }
 0x4d9   :  { %2696 = vrot.lane.b32.xlu1 %v2695_v53, %s3062_s4  ;;  %2711 = vrot.lane.b32.xlu0 %v2700_v32, %s3063_s13  ;;  %v2120_v32 = vld [vmem:[#allocation18 + $0x18] sm:$0xff] }
 0x4da   :  { %2589 = vmatpush.msra.mxu1 %v2121_v17  ;;  %2337 = vmatpush.msrb.mxu0 %v2127_v46 }
 0x4dc   :  { %2590 = vmatpush.msra.mxu1 %v2120_v32  ;;  %2338 = vmatpush.msrb.mxu0 %v2126_v50  ;;  %v2283_v50 = vld [vmem:[#allocation5 + $0x78] sm:$0xff] }
 0x4dd   :  { %2681 = vrot.lane.b32.xlu2 %v2675_v55, %s3063_s13  ;;  %2555 = vmatmul.msk.f32.gmra.mxu3 %vm669_vm3, %v2231_v9 }
 0x4de   :  { %2591 = vmatpush.msra.mxu1 %v2119_v6  ;;  %2339 = vmatpush.msrb.mxu0 %v2125_v59 }
 0x4df   :  { %2558 = vmatmul.msk.f32.gmra.mxu0 %vm669_vm3, %v2282_v21 }
 0x4e0   :  { %2592 = vmatpush.msra.mxu1 %v2118_v33  ;;  %2340 = vmatpush.msrb.mxu0 %v2124_v11 }
 0x4e1   :  { %2706 = vrot.lane.b32.xlu1 %v2695_v53, %s3063_s13  ;;  %2716 = vrot.lane.b32.xlu0 %v2690_v34, %s3063_s13  ;;  %v2142_v34 = vld [vmem:[#allocation5 + $0x58] sm:$0xff] }
 0x4e2   :  { %2547 = vmatmul.msk.f32.gmra.mxu1 %vm669_vm3, %v2142_v34  ;;  %2341 = vmatpush.msrb.mxu0 %v2123_v4 }
 0x4e3   :  { %2593 = vmatpush.msra.mxu1 %v2117_v3 }
 0x4e4   :  { %2342 = vmatpush.msrb.mxu0 %v2122_v54 }
 0x4e5   :  { %2686 = vrot.lane.b32.xlu2 %v4277_v57, %s3063_s13  ;;  %v2138_v57 = vld [vmem:[#allocation21 + $0x8] sm:$0xff] }
 0x4e6   :  { %2213 = vmatpush.msrb.mxu2 %v2138_v57  ;;  %2343 = vmatpush.msrb.mxu0 %v2121_v17 }
 0x4e7   :  { %2559 = vmatmul.msk.f32.gmra.mxu0 %vm669_vm3, %v2283_v50 }
 0x4e8   :  { %2214 = vmatpush.msrb.mxu2 %v2137_v35  ;;  %2344 = vmatpush.msrb.mxu0 %v2120_v32 }
 0x4e9   :  { %2726 = vrot.lane.b32.xlu1 %v2725_v52, %s3063_s13  ;;  %2736 = vrot.lane.b32.xlu0 %v2735_v26, %s3063_s13 }
 0x4ea   :  { %2548 = vmatmul.msk.f32.vlgmr.msrb.gmra.mxu2 %vm669_vm3, %v2133_v61  ;;  %2345 = vmatpush.msrb.mxu0 %v2119_v6 }
 0x4ec   :  { %2346 = vmatpush.msrb.mxu0 %v2118_v33 }
 0x4ed   :  { %2721 = vrot.lane.b32.xlu2 %v2725_v52, %s3062_s4 }
 0x4ee   :  { %2347 = vmatpush.msrb.mxu0 %v2117_v3 }
 0x4f2   :  { %2549 = vmatmul.msk.f32.gmra.mxu2 %vm669_vm3, %v2134_v27 }
 0x4f5   :  { %2731 = vrot.lane.b32.xlu2 %v2735_v26, %s3062_s4 }
 0x4fa   :  { %v2627_v1 = vpop.permute.xlu1 %2626  ;;  %2550 = vmatmul.msk.f32.gmra.mxu2 %vm669_vm3, %v2135_v42 }
 0x4fb   :  { %v2629_v23 = vunpack.i.h.bf16 %v2627_v1  ;;  %v2628_v55 = vunpack.i.l.bf16 %v2627_v1 }
 0x4fd   :  { %v1878_v53 = vsel %vm1418_vm14, %v2628_v55, %v2629_v23  ;;  %v2637_v38 = vpop.permute.xlu0 %2636 }
 0x4fe   :  { %v1886_v13 = vmax.f32 %v4235_v60, %v1878_v53  ;;  %v2639_v25 = vunpack.i.h.bf16 %v2637_v38  ;;  %v2638_v52 = vunpack.i.l.bf16 %v2637_v38 }
 0x500   :  { %v1978_v60 = vsel %vm1418_vm14, %v2638_v52, %v2639_v25 }
 0x502   :  { %2551 = vmatmul.msk.f32.gmra.mxu2 %vm669_vm3, %v2136_v31  ;;  %v2647_v30 = vpop.permute.xlu1 %2646 }
 0x503   :  { %v2649_v57 = vunpack.i.h.bf16 %v2647_v30  ;;  %v2648_v56 = vunpack.i.l.bf16 %v2647_v30 }
 0x505   :  { %v2652_v20 = vpop.permute.xlu0 %2651  ;;  %v2078_v39 = vsel %vm1418_vm14, %v2648_v56, %v2649_v57 }
 0x506   :  { %v2654_v5 = vunpack.i.h.bf16 %v2652_v20  ;;  %v2653_v61 = vunpack.i.l.bf16 %v2652_v20 }
 0x508   :  { %v2106_v0 = vsel %vm1453_vm15, %v2653_v61, %v2654_v5 }
 0x517   :  { %v4350_v37 = vpop.permute.xlu2 %2621 }
 0x518   :  { %v2624_v3 = vunpack.i.h.bf16 %v4350_v37  ;;  %v2623_v1 = vunpack.i.l.bf16 %v4350_v37 }
 0x51f   :  { %v2632_v16 = vpop.permute.xlu2 %2631 }
 0x520   :  { %v2634_v48 = vunpack.i.h.bf16 %v2632_v16  ;;  %v2633_v40 = vunpack.i.l.bf16 %v2632_v16 }
 0x522   :  { %v1906_v19 = vsel %vm1453_vm15, %v2633_v40, %v2634_v48 }
 0x523   :  { %v1914_v7 = vmax.f32 %v1886_v13, %v1906_v19  ;;  %v1877_v13 = vsel %vm1418_vm14, %v2623_v1, %v2624_v3 }
 0x524   :  { %v1885_v21 = vmax.f32 %v4274_v10, %v1877_v13 }
 0x525   :  { %v1940_v26 = vmax.f32 %v1914_v7, %v4244_v14 }
 0x527   :  { %v2642_v51 = vpop.permute.xlu2 %2641  ;;  %v1986_v41 = vmax.f32 %v1940_v26, %v1978_v60  ;;  %v2662_v49 = vpop.permute.xlu0 %2661 }
 0x528   :  { %v2644_v62 = vunpack.i.h.bf16 %v2642_v51  ;;  %v2643_v12 = vunpack.i.l.bf16 %v2642_v51  ;;  %v2657_v4 = vpop.permute.xlu1 %2656  ;;  %v2664_v17 = vunpack.i.h.bf16 %v2662_v49  ;;  %v2663_v34 = vunpack.i.l.bf16 %v2662_v49 }
 0x529   :  { %v2659_v43 = vunpack.i.h.bf16 %v2657_v4  ;;  %v2658_v54 = vunpack.i.l.bf16 %v2657_v4 }
 0x52a   :  { %v2006_v14 = vsel %vm1453_vm15, %v2643_v12, %v2644_v62  ;;  %v1907_v29 = vsel %vm1453_vm15, %v2663_v34, %v2664_v17 }
 0x52b   :  { %v2014_v35 = vmax.f32 %v1986_v41, %v2006_v14 }
 0x52d   :  { %v2040_v46 = vmax.f32 %v2014_v35, %v4255_v18  ;;  %v1879_v18 = vsel %vm1418_vm14, %v2658_v54, %v2659_v43 }
 0x52e   :  { %v1887_v6 = vmax.f32 %v4267_v45, %v1879_v18 }
 0x52f   :  { %v2677_v22 = vpop.permute.xlu2 %2676  ;;  %v2086_v59 = vmax.f32 %v2040_v46, %v2078_v39 }
 0x530   :  { %v2679_v23 = vunpack.i.h.bf16 %v2677_v22  ;;  %v2678_v55 = vunpack.i.l.bf16 %v2677_v22  ;;  %v1915_v38 = vmax.f32 %v1887_v6, %v1907_v29 }
 0x531   :  { %v2114_v11 = vmax.f32 %v2086_v59, %v2106_v0 }
 0x532   :  { %v1979_v45 = vsel %vm1418_vm14, %v2678_v55, %v2679_v23  ;;  %v1941_v37 = vmax.f32 %v1915_v38, %v4302_v28 }
 0x533   :  { %2351 = vmatmul.f32.vlgmr.msra.gmra.mxu1 %v2114_v11 }
 0x534   :  { %v1987_v30 = vmax.f32 %v1941_v37, %v1979_v45 }
 0x537   :  { %v2682_v27 = vpop.permute.xlu2 %2681 }
 0x538   :  { %v2684_v19 = vunpack.i.h.bf16 %v2682_v27  ;;  %v2683_v7 = vunpack.i.l.bf16 %v2682_v27 }
 0x53a   :  { %v2007_v62 = vsel %vm1453_vm15, %v2683_v7, %v2684_v19 }
 0x53b   :  { %v2672_v24 = vpop.permute.xlu0 %2671  ;;  %v2667_v63 = vpop.permute.xlu1 %2666  ;;  %v2015_v46 = vmax.f32 %v1987_v30, %v2007_v62 }
 0x53c   :  { %v2669_v33 = vunpack.i.h.bf16 %v2667_v63  ;;  %v2668_v44 = vunpack.i.l.bf16 %v2667_v63  ;;  %v2674_v31 = vunpack.i.h.bf16 %v2672_v24  ;;  %v2673_v25 = vunpack.i.l.bf16 %v2672_v24 }
 0x53d   :  { %v2041_v27 = vmax.f32 %v2015_v46, %v4310_v58 }
 0x53e   :  { %v1880_v16 = vsel %vm1418_vm14, %v2668_v44, %v2669_v33  ;;  %v1908_v12 = vsel %vm1453_vm15, %v2673_v25, %v2674_v31 }
 0x53f   :  { %v2687_v32 = vpop.permute.xlu2 %2686  ;;  %v1888_v52 = vmax.f32 %v4284_v8, %v1880_v16 }
 0x540   :  { %v2689_v48 = vunpack.i.h.bf16 %v2687_v32  ;;  %v2688_v40 = vunpack.i.l.bf16 %v2687_v32 }
 0x541   :  { %v1916_v57 = vmax.f32 %v1888_v52, %v1908_v12 }
 0x542   :  { %v1905_v26 = vsel %vm1453_vm15, %v2688_v40, %v2689_v48 }
 0x543   :  { %v2702_v42 = vpop.permute.xlu0 %2701  ;;  %v2692_v53 = vpop.permute.xlu1 %2691  ;;  %v1913_v56 = vmax.f32 %v1885_v21, %v1905_v26  ;;  %v1942_v39 = vmax.f32 %v1916_v57, %v4295_v2 }
 0x544   :  { %v2704_v20 = vunpack.i.h.bf16 %v2702_v42  ;;  %v2703_v41 = vunpack.i.l.bf16 %v2702_v42  ;;  %v2694_v14 = vunpack.i.h.bf16 %v2692_v53  ;;  %v2693_v28 = vunpack.i.l.bf16 %v2692_v53 }
 0x545   :  { %v1939_v50 = vmax.f32 %v1913_v56, %v4291_v47 }
 0x546   :  { %v1980_v10 = vsel %vm1418_vm14, %v2703_v41, %v2704_v20  ;;  %v1977_v22 = vsel %vm1418_vm14, %v2693_v28, %v2694_v14 }
 0x547   :  { %v2722_v9 = vpop.permute.xlu2 %2721  ;;  %v1988_v11 = vmax.f32 %v1942_v39, %v1980_v10  ;;  %v1985_v17 = vmax.f32 %v1939_v50, %v1977_v22 }
 0x548   :  { %v2724_v47 = vunpack.i.h.bf16 %v2722_v9  ;;  %v2723_v32 = vunpack.i.l.bf16 %v2722_v9  ;;  %v2264_v9 = vpop.f32.mrf.mxu3 }
 0x54a   :  { %v2080_v38 = vsel %vm1418_vm14, %v2723_v32, %v2724_v47  ;;  %v2369_v32 = vld [vmem:[#allocation19] sm:$0xff] }
 0x54b   :  { %v2712_v51 = vpop.permute.xlu0 %2711  ;;  %v2697_v60 = vpop.permute.xlu1 %2696 }
 0x54c   :  { %v2714_v35 = vunpack.i.h.bf16 %v2712_v51  ;;  %v2713_v8 = vunpack.i.l.bf16 %v2712_v51  ;;  %v2699_v5 = vunpack.i.h.bf16 %v2697_v60  ;;  %v2698_v61 = vunpack.i.l.bf16 %v2697_v60  ;;  %v2316_v21 = vpop.f32.mrf.mxu0 }
 0x54e   :  { %v2008_v59 = vsel %vm1453_vm15, %v2713_v8, %v2714_v35  ;;  %v2079_v0 = vsel %vm1418_vm14, %v2698_v61, %v2699_v5 }
 0x54f   :  { %v2732_v43 = vpop.permute.xlu2 %2731  ;;  %v2016_v2 = vmax.f32 %v1988_v11, %v2008_v59  ;;  %v2087_v34 = vmax.f32 %v2041_v27, %v2079_v0 }
 0x550   :  { %v2734_v44 = vunpack.i.h.bf16 %v2732_v43  ;;  %v2733_v3 = vunpack.i.l.bf16 %v2732_v43  ;;  %v2267_v60 = vpop.f32.mrf.mxu3 }
 0x551   :  { %v2042_v55 = vmax.f32 %v2016_v2, %v4321_v36  ;;  %v2175_v36 = vpop.f32.mrf.mxu1 }
 0x552   :  { %v2077_v42 = vsel %vm1418_vm14, %v2733_v3, %v2734_v44 }
 0x553   :  { %v2717_v49 = vpop.permute.xlu0 %2716  ;;  %v2707_v4 = vpop.permute.xlu1 %2706  ;;  %v2088_v19 = vmax.f32 %v2042_v55, %v2080_v38 }
 0x554   :  { %v2719_v54 = vunpack.i.h.bf16 %v2717_v49  ;;  %v2718_v24 = vunpack.i.l.bf16 %v2717_v49  ;;  %v2709_v63 = vunpack.i.h.bf16 %v2707_v4  ;;  %v2708_v18 = vunpack.i.l.bf16 %v2707_v4  ;;  %v2319_v62 = vpop.f32.mrf.mxu0  ;;  %v2751_v4 = vld [vmem:[#allocation22] ss:$0 sm:$0xff] }
 0x556   :  { %v2005_v6 = vsel %vm1453_vm15, %v2718_v24, %v2719_v54  ;;  %v2107_v33 = vsel %vm1453_vm15, %v2708_v18, %v2709_v63 }
 0x557   :  { %v2013_v1 = vmax.f32 %v1985_v17, %v2005_v6  ;;  %v2115_v23 = vmax.f32 %v2087_v34, %v2107_v33  ;;  %v2370_v6 = vld [vmem:[#allocation19 + $0x8] sm:$0xff] }
 0x558   :  { %v2270_v20 = vpop.f32.mrf.mxu3 }
 0x559   :  { %v2039_v58 = vmax.f32 %v2013_v1, %v4327_v15  ;;  %2354 = vmatmul.f32.gmra.mxu1 %v2115_v23  ;;  %v2178_v37 = vpop.f32.mrf.mxu1 }
 0x55b   :  { %v2737_v53 = vpop.permute.xlu0 %2736  ;;  %v2727_v29 = vpop.permute.xlu1 %2726  ;;  %v2085_v45 = vmax.f32 %v2039_v58, %v2077_v42 }
 0x55c   :  { %v2739_v16 = vunpack.i.h.bf16 %v2737_v53  ;;  %v2738_v48 = vunpack.i.l.bf16 %v2737_v53  ;;  %v2729_v40 = vunpack.i.h.bf16 %v2727_v29  ;;  %v2728_v13 = vunpack.i.l.bf16 %v2727_v29  ;;  %v2322_v57 = vpop.f32.mrf.mxu0 }
 0x55e   :  { %v2105_v7 = vsel %vm1453_vm15, %v2738_v48, %v2739_v16  ;;  %v2108_v31 = vsel %vm1453_vm15, %v2728_v13, %v2729_v40 }
 0x55f   :  { %v2113_v15 = vmax.f32 %v2085_v45, %v2105_v7  ;;  %v2116_v25 = vmax.f32 %v2088_v19, %v2108_v31 }
 0x560   :  { %v2273_v8 = vpop.f32.mrf.mxu3 }
 0x561   :  { %2348 = vmatmul.f32.vlgmr.msrb.gmra.mxu0 %v2113_v15  ;;  %2357 = vmatmul.f32.gmra.mxu1 %v2116_v25  ;;  %v2181_v26 = vpop.f32.mrf.mxu1 }
 0x564   :  { %v2325_v61 = vpop.f32.mrf.mxu0 }
 0x569   :  { %v2184_v51 = vpop.f32.mrf.mxu1 }
 0x56d   :  { %v2216_v52 = vpop.f32.mrf.mxu2 }
 0x56e   :  { %v2217_v46 = vadd.f32 %v2216_v52, %v2175_v36 }
 0x570   :  { %v2276_v22 = vadd.f32 %v2264_v9, %v2217_v46 }
 0x572   :  { %v2328_v24 = vadd.f32 %v2316_v21, %v2276_v22 }
 0x575   :  { %v2219_v30 = vpop.f32.mrf.mxu2 }
 0x576   :  { %v2220_v14 = vadd.f32 %v2219_v30, %v2178_v37 }
 0x578   :  { %v2277_v10 = vadd.f32 %v2267_v60, %v2220_v14 }
 0x57a   :  { %v2329_v59 = vadd.f32 %v2319_v62, %v2277_v10 }
 0x57d   :  { %v2222_v12 = vpop.f32.mrf.mxu2 }
 0x57e   :  { %v2223_v28 = vadd.f32 %v2222_v12, %v2181_v26 }
 0x580   :  { %v2278_v39 = vadd.f32 %v2270_v20, %v2223_v28 }
 0x582   :  { %v2330_v0 = vadd.f32 %v2322_v57, %v2278_v39 }
 0x585   :  { %v2225_v56 = vpop.f32.mrf.mxu2 }
 0x586   :  { %v2226_v35 = vadd.f32 %v2225_v56, %v2184_v51 }
 0x588   :  { %v2279_v50 = vadd.f32 %v2273_v8, %v2226_v35 }
 0x58a   :  { %v2331_v11 = vadd.f32 %v2325_v61, %v2279_v50 }
 0x5b0   :  { %v2352_v41 = vpop.f32.mrf.mxu1 }
 0x5b1   :  { %v2353_v63 = vadd.f32 %v2352_v41, %v2329_v59 }
 0x5b3   :  { %v2366_v34 = vadd.f32 %v2751_v4, %v2353_v63 }
 0x5d6   :  { %v2355_v5 = vpop.f32.mrf.mxu1 }
 0x5d7   :  { %v2356_v27 = vadd.f32 %v2355_v5, %v2330_v0 }
 0x5d9   :  { %v2367_v17 = vadd.f32 %v2751_v4, %v2356_v27 }
 0x5de   :  { %v2358_v49 = vpop.f32.mrf.mxu1  ;;  %v2349_v54 = vpop.f32.mrf.mxu0 }
 0x5df   :  { %v2359_v43 = vadd.f32 %v2358_v49, %v2331_v11  ;;  %v2350_v2 = vadd.f32 %v2349_v54, %v2328_v24 }
 0x5e1   :  { %v2368_v18 = vadd.f32 %v2751_v4, %v2359_v43  ;;  %v2365_v47 = vadd.f32 %v2751_v4, %v2350_v2 }
 0x5e3   :  { %2390 = vmatpush.msra.mxu2 %v2368_v18 }
 0x5e5   :  { %2391 = vmatpush.msra.mxu2 %v2367_v17 }
 0x5e7   :  { %2392 = vmatpush.msra.mxu2 %v2366_v34 }
 0x5e9   :  { %2393 = vmatpush.msra.mxu2 %v2365_v47 }
 0x5ea   :  { %2560 = vmatmul.msk.f32.vlgmr.msra.gmra.mxu2 %vm2371_vm0, %v2369_v32 }
 0x5f2   :  { %2561 = vmatmul.msk.f32.gmra.mxu2 %vm2371_vm0, %v2370_v6 }
 0x66d   :  { %v2395_v33 = vpop.f32.mrf.mxu2 }
 0x66e   :  { %2401 = vst.msk [vmem:[#allocation24] sm:$0xff] %vm1362_vm11, %v2395_v33  ;;  %2405 = vrot.lane.b32.xlu1 %v2395_v33, %s3062_s4  ;;  %2423 = vrot.lane.b32.xlu2 %v2395_v33, %s3065_s14 }
 0x66f   :  { %2414 = vrot.lane.b32.xlu0 %v2395_v33, %s3063_s13 }
 0x675   :  { %v2398_v44 = vpop.f32.mrf.mxu2 }
 0x676   :  { %2432 = vrot.lane.b32.xlu1 %v2395_v33, %s3066_s15  ;;  %2402 = vst.msk [vmem:[#allocation24 + $0x40] sm:$0xff] %vm1362_vm11, %v2398_v44  ;;  %2450 = vrot.lane.b32.xlu2 %v2395_v33, %s3067_s16 }
 0x677   :  { %2441 = vrot.lane.b32.xlu0 %v2395_v33, %s3068_s3 }
 0x67e   :  { %2416 = vrot.lane.b32.xlu1 %v2398_v44, %s3063_s13  ;;  %2407 = vrot.lane.b32.xlu2 %v2398_v44, %s3062_s4 }
 0x67f   :  { %2425 = vrot.lane.b32.xlu0 %v2398_v44, %s3065_s14 }
 0x686   :  { %2443 = vrot.lane.b32.xlu1 %v2398_v44, %s3068_s3  ;;  %2434 = vrot.lane.b32.xlu2 %v2398_v44, %s3066_s15 }
 0x687   :  { %2452 = vrot.lane.b32.xlu0 %v2398_v44, %s3067_s16 }
 0x68e   :  { %2459 = vrot.lane.b32.xlu1 %v2395_v33, %s3069_s17  ;;  %2461 = vrot.lane.b32.xlu2 %v2398_v44, %s3069_s17 }
 0x6c8   :  { %v2424_v3 = vpop.permute.xlu2 %2423 }
 0x6c9   :  { %2430 = vst.msk [vmem:[#allocation24 + $0x18] sm:$0xff] %vm1362_vm11, %v2424_v3 }
 0x6d0   :  { %v2451_v1 = vpop.permute.xlu2 %2450 }
 0x6d1   :  { %2457 = vst.msk [vmem:[#allocation24 + $0x30] sm:$0xff] %vm1362_vm11, %v2451_v1 }
 0x6d8   :  { %v2408_v23 = vpop.permute.xlu2 %2407 }
 0x6d9   :  { %2413 = vst.msk [vmem:[#allocation24 + $0x48] sm:$0xff] %vm1362_vm11, %v2408_v23 }
 0x6e0   :  { %v2406_v58 = vpop.permute.xlu1 %2405  ;;  %v2435_v55 = vpop.permute.xlu2 %2434 }
 0x6e1   :  { %2412 = vst.msk [vmem:[#allocation24 + $0x8] sm:$0xff] %vm1362_vm11, %v2406_v58  ;;  %v2415_v42 = vpop.permute.xlu0 %2414 }
 0x6e2   :  { %2440 = vst.msk [vmem:[#allocation24 + $0x60] sm:$0xff] %vm1362_vm11, %v2435_v55 }
 0x6e3   :  { %2421 = vst.msk [vmem:[#allocation24 + $0x10] sm:$0xff] %vm1362_vm11, %v2415_v42 }
 0x6e8   :  { %v2433_v53 = vpop.permute.xlu1 %2432  ;;  %v2462_v29 = vpop.permute.xlu2 %2461 }
 0x6e9   :  { %2439 = vst.msk [vmem:[#allocation24 + $0x20] sm:$0xff] %vm1362_vm11, %v2433_v53  ;;  %v2442_v38 = vpop.permute.xlu0 %2441 }
 0x6ea   :  { %2467 = vst.msk [vmem:[#allocation24 + $0x78] sm:$0xff] %vm1362_vm11, %v2462_v29 }
 0x6eb   :  { %2448 = vst.msk [vmem:[#allocation24 + $0x28] sm:$0xff] %vm1362_vm11, %v2442_v38 }
 0x6f0   :  { %v2417_v16 = vpop.permute.xlu1 %2416 }
 0x6f1   :  { %2422 = vst.msk [vmem:[#allocation24 + $0x50] sm:$0xff] %vm1362_vm11, %v2417_v16  ;;  %v2426_v48 = vpop.permute.xlu0 %2425 }
 0x6f2   :  { %2431 = vst.msk [vmem:[#allocation24 + $0x58] sm:$0xff] %vm1362_vm11, %v2426_v48 }
 0x6f8   :  { %v2444_v40 = vpop.permute.xlu1 %2443 }
 0x6f9   :  { %2449 = vst.msk [vmem:[#allocation24 + $0x68] sm:$0xff] %vm1362_vm11, %v2444_v40  ;;  %v2453_v13 = vpop.permute.xlu0 %2452 }
 0x6fa   :  { %2458 = vst.msk [vmem:[#allocation24 + $0x70] sm:$0xff] %vm1362_vm11, %v2453_v13 }
 0x700   :  { %v2460_v45 = vpop.permute.xlu1 %2459 }
 0x701   :  { %2466 = vst.msk [vmem:[#allocation24 + $0x38] sm:$0xff] %vm1362_vm11, %v2460_v45 }
 0x702   :  { %2480 = dma.vmem_to_hbm [thread:$0]  %s2473_s19, 2048, %s2475_s7, [#allocation7], %s3046_s25, %s3046_s25, %s3047_s26  }
 0x703   :  { %3043 = dma.done.wait [#allocation7], 2048  }
 0x704   :  { %3044 = vsyncadd [#allocation7], 4294965248 }
 0x705   :  { %2485 = vsyncpa [#allocation6], 1 }
 0x706   :  { %2486 = vsyncpa [#allocation11], 1 }
 0x707   :  { %2487 = vsyncpa [#allocation14], 1 }
 0x708   :  { %2488 = vsyncpa [#allocation17], 1 }
 0x709   :  { %2489 = vsyncpa [#allocation20], 1 }
 0x70a   :  { %2490 = vsyncpa [#allocation23], 1 }
 0x70b   :  { %2491 = vsyncpa [#allocation7], 1 }
 0x70c   :  { %2492 = vsyncpa [#allocation8], 1 }

</bundles_post_ra>
